<compile_context>
chip_gen: v7x
topology: tpu7x:2x2x1
jax: 0.10.0
libtpu: 0.0.40
codegen_flags: <defaults>
</compile_context>

<pallas_src>
import functools

import jax
import jax.numpy as jnp
from jax.experimental import pallas as pl
from jax.experimental.pallas import tpu as pltpu

CONV_OUT = 64
CONV_K = 3
SUBLANE = 8


def _lstm_step(xg_t, h, c, w_hh, H):
    """One LSTM cell step with the 4 gates packed along the lane dimension.

    xg_t : (B, 4H) input projection (+ folded bias) for this timestep
    h, c : (B, H)  previous hidden / cell state
    w_hh : (H, 4H) packed recurrent weight (value, hoisted out of the loop)
    Lane layout of the 4H axis: [0:H]=i, [H:2H]=f, [2H:3H]=g, [3H:4H]=o.
    """
    z = xg_t + jnp.dot(h, w_hh, preferred_element_type=jnp.float32)   # (B, 4H)
    # Whole-vreg nonlinearities: 2 EUP pushes instead of 4 per step.
    sg = jax.nn.sigmoid(z)
    th = jnp.tanh(z)
    i = sg[:, 0:H]
    f = sg[:, H:2 * H]
    g = th[:, 2 * H:3 * H]
    o = sg[:, 3 * H:4 * H]
    c_new = f * c + i * g
    h_new = o * jnp.tanh(c_new)
    return h_new, c_new


def _cnn_bilstm_kernel(x_ref, conv_w_ref, conv_b_ref, *args,
                       layer_dim, hidden, t_out, batch):
    # args = [w_ih_f, w_hh_f, b_f, w_ih_b, w_hh_b, b_b] * layer_dim,
    #        fc_w, fc_b, out_ref, h_buf
    H, B, T = hidden, batch, t_out
    TB = T * B
    n_lstm = layer_dim * 6
    fc_w_ref = args[n_lstm]
    fc_b_ref = args[n_lstm + 1]
    out_ref = args[n_lstm + 2]
    h_buf = args[n_lstm + 3]        # (TB, 2H) scratch: lanes [0:H]=fwd, [H:2H]=bwd

    # ------------------- Conv1d (valid, K taps) + ReLU ----------------------
    # x_ref is time-major flattened: row r = t*B + b, with B padded to a
    # sublane multiple, so tap k's window is the aligned row range
    # [k*B, k*B + TB).
    x2d = x_ref[...]                                        # (T_in*B, Cin)
    cout = conv_w_ref.shape[2]
    acc = jnp.zeros((TB, cout), jnp.float32) + conv_b_ref[...]
    for k in range(conv_w_ref.shape[0]):                    # static unroll (K=3)
        acc = acc + jnp.dot(x2d[k * B:k * B + TB, :], conv_w_ref[k],
                            preferred_element_type=jnp.float32)
    feat = jnp.maximum(acc, 0.0)                            # (TB, 64)
    # (conv Dropout / LSTM inter-layer dropout are identity at inference)

    # ------------------- Bidirectional LSTM stack ---------------------------
    for l in range(layer_dim):
        w_ih_f, w_hh_f, b_f = args[l * 6 + 0], args[l * 6 + 1], args[l * 6 + 2]
        w_ih_b, w_hh_b, b_b = args[l * 6 + 3], args[l * 6 + 4], args[l * 6 + 5]

        # Layer input: conv features for layer 0, else [fwd | bwd] hidden of
        # the previous layer, loaded from the shared scratch before it gets
        # overwritten below.
        layer_in = feat if l == 0 else h_buf[...]           # (TB, Din)

        # Input projection for ALL timesteps: one lane-dense matmul per
        # direction into a packed (TB, 4H=128) pre-activation (bias folded).
        xg_f = (jnp.dot(layer_in, w_ih_f[...],
                        preferred_element_type=jnp.float32) + b_f[...])
        xg_b = (jnp.dot(layer_in, w_ih_b[...],
                        preferred_element_type=jnp.float32) + b_b[...])

        # Hoist packed recurrent weights out of the unrolled time loop.
        whh_f = w_hh_f[...]                                 # (H, 4H)
        whh_b = w_hh_b[...]

        h_f = jnp.zeros((B, H), jnp.float32)
        c_f = jnp.zeros((B, H), jnp.float32)
        h_b = jnp.zeros((B, H), jnp.float32)
        c_b = jnp.zeros((B, H), jnp.float32)

        # Static unroll over time; fwd walks t, bwd walks T-1-t on the same
        # (non-reversed) layer input -> no reverses / concats anywhere.
        for t in range(T):
            h_f, c_f = _lstm_step(xg_f[t * B:(t + 1) * B, :],
                                  h_f, c_f, whh_f, H)
            h_buf[t * B:(t + 1) * B, 0:H] = h_f

            tb = T - 1 - t
            h_b, c_b = _lstm_step(xg_b[tb * B:(tb + 1) * B, :],
                                  h_b, c_b, whh_b, H)
            h_buf[tb * B:(tb + 1) * B, H:2 * H] = h_b

    # ------------------- Linear(2H -> out) + Sigmoid ------------------------
    hcat = h_buf[...]                                       # (TB, 2H)
    y = (jnp.dot(hcat, fc_w_ref[...], preferred_element_type=jnp.float32)
         + fc_b_ref[...])
    out_ref[...] = jax.nn.sigmoid(y)                        # (TB, out)


def cnn_bilstm_forward(x, params, hidden_dim):
    B, T_in, Cin = x.shape
    K = params["conv_w"].shape[0]
    Tm = T_in - K + 1
    out_dim = params["fc_w"].shape[1]
    layer_dim = len(params["lstm"])

    # Pad batch to a sublane multiple so every per-timestep slab and every
    # conv tap window starts on an 8-row tile boundary (unmasked accesses).
    Bp = -(-B // SUBLANE) * SUBLANE
    if Bp != B:
        x = jnp.pad(x, ((0, Bp - B), (0, 0), (0, 0)))
    TB = Tm * Bp

    # Time-major (t, b) flattening of the network INPUT only (tiny, one-time).
    x2d = x.transpose(1, 0, 2).reshape(T_in * Bp, Cin)

    lstm_flat = []
    for layer in params["lstm"]:
        for d in ("fwd", "bwd"):
            lstm_flat += [layer[d]["w_ih"], layer[d]["w_hh"], layer[d]["b"]]

    operands = [x2d, params["conv_w"], params["conv_b"], *lstm_flat,
                params["fc_w"], params["fc_b"]]

    def _full(a):
        nd = a.ndim
        return pl.BlockSpec(a.shape, lambda i, _nd=nd: (0,) * _nd)

    kernel = functools.partial(
        _cnn_bilstm_kernel, layer_dim=layer_dim, hidden=hidden_dim,
        t_out=Tm, batch=Bp)

    y2d = pl.pallas_call(
        kernel,
        out_shape=jax.ShapeDtypeStruct((TB, out_dim), jnp.float32),
        grid_spec=pltpu.PrefetchScalarGridSpec(
            num_scalar_prefetch=0,
            grid=(1,),                                   # single fused program
            in_specs=[_full(op) for op in operands],
            out_specs=pl.BlockSpec((TB, out_dim), lambda i: (0, 0)),
            scratch_shapes=[pltpu.VMEM((TB, 2 * hidden_dim), jnp.float32)]),
    )(*operands)

    # rows t*Bp + b -> (B, T, out); drop batch padding.
    return y2d.reshape(Tm, Bp, out_dim)[:, :B, :].transpose(1, 0, 2)


def init_params(key, input_dim, hidden_dim, layer_dim, output_dim):
    keys = iter(jax.random.split(key, 128))

    def u(shape, scale):
        return jax.random.uniform(next(keys), shape, jnp.float32, -scale, scale)

    p = {}
    conv_scale = 1.0 / (input_dim * CONV_K) ** 0.5
    p["conv_w"] = u((CONV_K, input_dim, CONV_OUT), conv_scale)  # (K, Cin, Cout)
    p["conv_b"] = u((1, CONV_OUT), conv_scale)

    stdv = 1.0 / hidden_dim ** 0.5
    layers = []
    d_in = CONV_OUT
    for _ in range(layer_dim):
        layer = {}
        for d in ("fwd", "bwd"):
            layer[d] = dict(
                # gate-packed along lanes, gate order (i, f, g, o);
                # transpose of torch's (4H, Din) / (4H, H) stacks.
                w_ih=u((d_in, 4 * hidden_dim), stdv),
                w_hh=u((hidden_dim, 4 * hidden_dim), stdv),
                # torch b_ih + b_hh folded into one (1, 4H) bias
                b=u((1, 4 * hidden_dim), stdv) + u((1, 4 * hidden_dim), stdv),
            )
        layers.append(layer)
        d_in = 2 * hidden_dim
    p["lstm"] = layers

    fc_scale = 1.0 / (2 * hidden_dim) ** 0.5
    p["fc_w"] = u((2 * hidden_dim, output_dim), fc_scale)
    p["fc_b"] = u((1, output_dim), fc_scale)
    return p


if __name__ == "__main__":
    # shapes consistent with the module:
    # batchsize=2, seq_len=10, input_dim=4, hidden_dim=32, layer_dim=2, output_dim=3
    B, T, input_dim = 2, 10, 4
    hidden_dim, layer_dim, output_dim = 32, 2, 3

    key = jax.random.PRNGKey(0)
    kx, kp = jax.random.split(key)
    x = jax.random.normal(kx, (B, T, input_dim), jnp.float32)
    params = init_params(kp, input_dim, hidden_dim, layer_dim, output_dim)

    fwd = jax.jit(lambda xx: cnn_bilstm_forward(xx, params, hidden_dim))
    y = fwd(x)
    jax.block_until_ready(y)
    assert y.shape == (B, T - CONV_K + 1, output_dim)
    assert bool(jnp.all(jnp.isfinite(y)))
    print("KERNEL_OK")
</pallas_src>

<mosaic_0001>
module attributes {stable_mosaic.version = 11 : i64} {
  func.func @_cnn_bilstm_kernel(%arg0: i32, %arg1: memref<80x4xf32, #tpu.memory_space<vmem>>, %arg2: memref<3x4x64xf32, #tpu.memory_space<vmem>>, %arg3: memref<1x64xf32, #tpu.memory_space<vmem>>, %arg4: memref<64x128xf32, #tpu.memory_space<vmem>>, %arg5: memref<32x128xf32, #tpu.memory_space<vmem>>, %arg6: memref<1x128xf32, #tpu.memory_space<vmem>>, %arg7: memref<64x128xf32, #tpu.memory_space<vmem>>, %arg8: memref<32x128xf32, #tpu.memory_space<vmem>>, %arg9: memref<1x128xf32, #tpu.memory_space<vmem>>, %arg10: memref<64x128xf32, #tpu.memory_space<vmem>>, %arg11: memref<32x128xf32, #tpu.memory_space<vmem>>, %arg12: memref<1x128xf32, #tpu.memory_space<vmem>>, %arg13: memref<64x128xf32, #tpu.memory_space<vmem>>, %arg14: memref<32x128xf32, #tpu.memory_space<vmem>>, %arg15: memref<1x128xf32, #tpu.memory_space<vmem>>, %arg16: memref<64x3xf32, #tpu.memory_space<vmem>>, %arg17: memref<1x3xf32, #tpu.memory_space<vmem>>, %arg18: memref<64x3xf32, #tpu.memory_space<vmem>>, %arg19: memref<64x64xf32, #tpu.memory_space<vmem>>) attributes {dimension_semantics = [#tpu.dimension_semantics<arbitrary>], iteration_bounds = array<i64: 1>, scalar_prefetch = 0 : i64, scratch_operands = 1 : i64, tpu.core_type = #tpu.core_type<tc>, window_params = [{pipeline_mode = #tpu.pipeline_mode<synchronous>, transform_indices = @transform_0, window_bounds = array<i64: 80, 4>}, {pipeline_mode = #tpu.pipeline_mode<synchronous>, transform_indices = @transform_1, window_bounds = array<i64: 3, 4, 64>}, {pipeline_mode = #tpu.pipeline_mode<synchronous>, transform_indices = @transform_2, window_bounds = array<i64: 1, 64>}, {pipeline_mode = #tpu.pipeline_mode<synchronous>, transform_indices = @transform_3, window_bounds = array<i64: 64, 128>}, {pipeline_mode = #tpu.pipeline_mode<synchronous>, transform_indices = @transform_4, window_bounds = array<i64: 32, 128>}, {pipeline_mode = #tpu.pipeline_mode<synchronous>, transform_indices = @transform_5, window_bounds = array<i64: 1, 128>}, {pipeline_mode = #tpu.pipeline_mode<synchronous>, transform_indices = @transform_6, window_bounds = array<i64: 64, 128>}, {pipeline_mode = #tpu.pipeline_mode<synchronous>, transform_indices = @transform_7, window_bounds = array<i64: 32, 128>}, {pipeline_mode = #tpu.pipeline_mode<synchronous>, transform_indices = @transform_8, window_bounds = array<i64: 1, 128>}, {pipeline_mode = #tpu.pipeline_mode<synchronous>, transform_indices = @transform_9, window_bounds = array<i64: 64, 128>}, {pipeline_mode = #tpu.pipeline_mode<synchronous>, transform_indices = @transform_10, window_bounds = array<i64: 32, 128>}, {pipeline_mode = #tpu.pipeline_mode<synchronous>, transform_indices = @transform_11, window_bounds = array<i64: 1, 128>}, {pipeline_mode = #tpu.pipeline_mode<synchronous>, transform_indices = @transform_12, window_bounds = array<i64: 64, 128>}, {pipeline_mode = #tpu.pipeline_mode<synchronous>, transform_indices = @transform_13, window_bounds = array<i64: 32, 128>}, {pipeline_mode = #tpu.pipeline_mode<synchronous>, transform_indices = @transform_14, window_bounds = array<i64: 1, 128>}, {pipeline_mode = #tpu.pipeline_mode<synchronous>, transform_indices = @transform_15, window_bounds = array<i64: 64, 3>}, {pipeline_mode = #tpu.pipeline_mode<synchronous>, transform_indices = @transform_16, window_bounds = array<i64: 1, 3>}, {pipeline_mode = #tpu.pipeline_mode<synchronous>, transform_indices = @transform_17, window_bounds = array<i64: 64, 3>}]} {
    %c0 = arith.constant 0 : index
    %c0_0 = arith.constant 0 : index
    %0 = vector.load %arg1[%c0, %c0_0] : memref<80x4xf32, #tpu.memory_space<vmem>>, vector<80x4xf32>
    %cst = arith.constant 0.000000e+00 : f32
    %1 = vector.broadcast %cst : f32 to vector<64x64xf32>
    %c0_1 = arith.constant 0 : index
    %c0_2 = arith.constant 0 : index
    %2 = vector.load %arg3[%c0_1, %c0_2] : memref<1x64xf32, #tpu.memory_space<vmem>>, vector<1x64xf32>
    %3 = vector.broadcast %2 : vector<1x64xf32> to vector<64x64xf32>
    %4 = arith.addf %1, %3 : vector<64x64xf32>
    %5 = vector.extract_strided_slice %0 {offsets = [0, 0], sizes = [64, 4], strides = [1, 1]} : vector<80x4xf32> to vector<64x4xf32>
    %c0_3 = arith.constant 0 : index
    %c0_4 = arith.constant 0 : index
    %c0_5 = arith.constant 0 : index
    %6 = vector.load %arg2[%c0_3, %c0_4, %c0_5] : memref<3x4x64xf32, #tpu.memory_space<vmem>>, vector<1x4x64xf32>
    %7 = vector.shape_cast %6 : vector<1x4x64xf32> to vector<4x64xf32>
    %cst_6 = arith.constant dense<0.000000e+00> : vector<64x64xf32>
    %8 = tpu.matmul %5, %7, %cst_6 {dimension_numbers = #tpu.dot_dimension_numbers<[1], [0], [0], [1], [0, 0, 1, 1], [], []>} : vector<64x4xf32>, vector<4x64xf32>, vector<64x64xf32> -> vector<64x64xf32>
    %9 = arith.addf %4, %8 : vector<64x64xf32>
    %10 = vector.extract_strided_slice %0 {offsets = [8, 0], sizes = [64, 4], strides = [1, 1]} : vector<80x4xf32> to vector<64x4xf32>
    %c1 = arith.constant 1 : index
    %c0_7 = arith.constant 0 : index
    %c0_8 = arith.constant 0 : index
    %11 = vector.load %arg2[%c1, %c0_7, %c0_8] : memref<3x4x64xf32, #tpu.memory_space<vmem>>, vector<1x4x64xf32>
    %12 = vector.shape_cast %11 : vector<1x4x64xf32> to vector<4x64xf32>
    %cst_9 = arith.constant dense<0.000000e+00> : vector<64x64xf32>
    %13 = tpu.matmul %10, %12, %cst_9 {dimension_numbers = #tpu.dot_dimension_numbers<[1], [0], [0], [1], [0, 0, 1, 1], [], []>} : vector<64x4xf32>, vector<4x64xf32>, vector<64x64xf32> -> vector<64x64xf32>
    %14 = arith.addf %9, %13 : vector<64x64xf32>
    %15 = vector.extract_strided_slice %0 {offsets = [16, 0], sizes = [64, 4], strides = [1, 1]} : vector<80x4xf32> to vector<64x4xf32>
    %c2 = arith.constant 2 : index
    %c0_10 = arith.constant 0 : index
    %c0_11 = arith.constant 0 : index
    %16 = vector.load %arg2[%c2, %c0_10, %c0_11] : memref<3x4x64xf32, #tpu.memory_space<vmem>>, vector<1x4x64xf32>
    %17 = vector.shape_cast %16 : vector<1x4x64xf32> to vector<4x64xf32>
    %cst_12 = arith.constant dense<0.000000e+00> : vector<64x64xf32>
    %18 = tpu.matmul %15, %17, %cst_12 {dimension_numbers = #tpu.dot_dimension_numbers<[1], [0], [0], [1], [0, 0, 1, 1], [], []>} : vector<64x4xf32>, vector<4x64xf32>, vector<64x64xf32> -> vector<64x64xf32>
    %19 = arith.addf %14, %18 : vector<64x64xf32>
    %cst_13 = arith.constant 0.000000e+00 : f32
    %20 = vector.broadcast %cst_13 : f32 to vector<64x64xf32>
    %21 = arith.maximumf %19, %20 : vector<64x64xf32>
    %c0_14 = arith.constant 0 : index
    %c0_15 = arith.constant 0 : index
    %22 = vector.load %arg4[%c0_14, %c0_15] : memref<64x128xf32, #tpu.memory_space<vmem>>, vector<64x128xf32>
    %cst_16 = arith.constant dense<0.000000e+00> : vector<64x128xf32>
    %23 = tpu.matmul %21, %22, %cst_16 {dimension_numbers = #tpu.dot_dimension_numbers<[1], [0], [0], [1], [0, 0, 1, 1], [], []>} : vector<64x64xf32>, vector<64x128xf32>, vector<64x128xf32> -> vector<64x128xf32>
    %c0_17 = arith.constant 0 : index
    %c0_18 = arith.constant 0 : index
    %24 = vector.load %arg6[%c0_17, %c0_18] : memref<1x128xf32, #tpu.memory_space<vmem>>, vector<1x128xf32>
    %25 = vector.broadcast %24 : vector<1x128xf32> to vector<64x128xf32>
    %26 = arith.addf %23, %25 : vector<64x128xf32>
    %c0_19 = arith.constant 0 : index
    %c0_20 = arith.constant 0 : index
    %27 = vector.load %arg7[%c0_19, %c0_20] : memref<64x128xf32, #tpu.memory_space<vmem>>, vector<64x128xf32>
    %cst_21 = arith.constant dense<0.000000e+00> : vector<64x128xf32>
    %28 = tpu.matmul %21, %27, %cst_21 {dimension_numbers = #tpu.dot_dimension_numbers<[1], [0], [0], [1], [0, 0, 1, 1], [], []>} : vector<64x64xf32>, vector<64x128xf32>, vector<64x128xf32> -> vector<64x128xf32>
    %c0_22 = arith.constant 0 : index
    %c0_23 = arith.constant 0 : index
    %29 = vector.load %arg9[%c0_22, %c0_23] : memref<1x128xf32, #tpu.memory_space<vmem>>, vector<1x128xf32>
    %30 = vector.broadcast %29 : vector<1x128xf32> to vector<64x128xf32>
    %31 = arith.addf %28, %30 : vector<64x128xf32>
    %c0_24 = arith.constant 0 : index
    %c0_25 = arith.constant 0 : index
    %32 = vector.load %arg5[%c0_24, %c0_25] : memref<32x128xf32, #tpu.memory_space<vmem>>, vector<32x128xf32>
    %c0_26 = arith.constant 0 : index
    %c0_27 = arith.constant 0 : index
    %33 = vector.load %arg8[%c0_26, %c0_27] : memref<32x128xf32, #tpu.memory_space<vmem>>, vector<32x128xf32>
    %cst_28 = arith.constant 0.000000e+00 : f32
    %34 = vector.broadcast %cst_28 : f32 to vector<8x32xf32>
    %cst_29 = arith.constant 0.000000e+00 : f32
    %35 = vector.broadcast %cst_29 : f32 to vector<8x32xf32>
    %cst_30 = arith.constant 0.000000e+00 : f32
    %36 = vector.broadcast %cst_30 : f32 to vector<8x32xf32>
    %cst_31 = arith.constant 0.000000e+00 : f32
    %37 = vector.broadcast %cst_31 : f32 to vector<8x32xf32>
    %38 = vector.extract_strided_slice %26 {offsets = [0, 0], sizes = [8, 128], strides = [1, 1]} : vector<64x128xf32> to vector<8x128xf32>
    %cst_32 = arith.constant dense<0.000000e+00> : vector<8x128xf32>
    %39 = tpu.matmul %34, %32, %cst_32 {dimension_numbers = #tpu.dot_dimension_numbers<[1], [0], [0], [1], [0, 0, 1, 1], [], []>} : vector<8x32xf32>, vector<32x128xf32>, vector<8x128xf32> -> vector<8x128xf32>
    %40 = arith.addf %38, %39 : vector<8x128xf32>
    %41 = arith.negf %40 : vector<8x128xf32>
    %42 = math.exp %41 : vector<8x128xf32>
    %cst_33 = arith.constant 1.000000e+00 : f32
    %43 = vector.broadcast %cst_33 : f32 to vector<8x128xf32>
    %44 = arith.addf %43, %42 : vector<8x128xf32>
    %45 = arith.divf %43, %44 : vector<8x128xf32>
    %46 = math.tanh %40 : vector<8x128xf32>
    %47 = vector.extract_strided_slice %45 {offsets = [0, 0], sizes = [8, 32], strides = [1, 1]} : vector<8x128xf32> to vector<8x32xf32>
    %48 = vector.extract_strided_slice %45 {offsets = [0, 32], sizes = [8, 32], strides = [1, 1]} : vector<8x128xf32> to vector<8x32xf32>
    %49 = vector.extract_strided_slice %46 {offsets = [0, 64], sizes = [8, 32], strides = [1, 1]} : vector<8x128xf32> to vector<8x32xf32>
    %50 = vector.extract_strided_slice %45 {offsets = [0, 96], sizes = [8, 32], strides = [1, 1]} : vector<8x128xf32> to vector<8x32xf32>
    %51 = arith.mulf %48, %35 : vector<8x32xf32>
    %52 = arith.mulf %47, %49 : vector<8x32xf32>
    %53 = arith.addf %51, %52 : vector<8x32xf32>
    %54 = math.tanh %53 : vector<8x32xf32>
    %55 = arith.mulf %50, %54 : vector<8x32xf32>
    %c0_34 = arith.constant 0 : index
    %c0_35 = arith.constant 0 : index
    %56 = vector.load %arg19[%c0_34, %c0_35] : memref<64x64xf32, #tpu.memory_space<vmem>>, vector<8x32xf32>
    tpu.vector_store %arg19[%c0_34, %c0_35], %55 {strides = array<i32>} : memref<64x64xf32, #tpu.memory_space<vmem>>, vector<8x32xf32>,
    %57 = vector.extract_strided_slice %31 {offsets = [56, 0], sizes = [8, 128], strides = [1, 1]} : vector<64x128xf32> to vector<8x128xf32>
    %cst_36 = arith.constant dense<0.000000e+00> : vector<8x128xf32>
    %58 = tpu.matmul %36, %33, %cst_36 {dimension_numbers = #tpu.dot_dimension_numbers<[1], [0], [0], [1], [0, 0, 1, 1], [], []>} : vector<8x32xf32>, vector<32x128xf32>, vector<8x128xf32> -> vector<8x128xf32>
    %59 = arith.addf %57, %58 : vector<8x128xf32>
    %60 = arith.negf %59 : vector<8x128xf32>
    %61 = math.exp %60 : vector<8x128xf32>
    %cst_37 = arith.constant 1.000000e+00 : f32
    %62 = vector.broadcast %cst_37 : f32 to vector<8x128xf32>
    %63 = arith.addf %62, %61 : vector<8x128xf32>
    %64 = arith.divf %62, %63 : vector<8x128xf32>
    %65 = math.tanh %59 : vector<8x128xf32>
    %66 = vector.extract_strided_slice %64 {offsets = [0, 0], sizes = [8, 32], strides = [1, 1]} : vector<8x128xf32> to vector<8x32xf32>
    %67 = vector.extract_strided_slice %64 {offsets = [0, 32], sizes = [8, 32], strides = [1, 1]} : vector<8x128xf32> to vector<8x32xf32>
    %68 = vector.extract_strided_slice %65 {offsets = [0, 64], sizes = [8, 32], strides = [1, 1]} : vector<8x128xf32> to vector<8x32xf32>
    %69 = vector.extract_strided_slice %64 {offsets = [0, 96], sizes = [8, 32], strides = [1, 1]} : vector<8x128xf32> to vector<8x32xf32>
    %70 = arith.mulf %67, %37 : vector<8x32xf32>
    %71 = arith.mulf %66, %68 : vector<8x32xf32>
    %72 = arith.addf %70, %71 : vector<8x32xf32>
    %73 = math.tanh %72 : vector<8x32xf32>
    %74 = arith.mulf %69, %73 : vector<8x32xf32>
    %c56 = arith.constant 56 : index
    %c32 = arith.constant 32 : index
    %75 = vector.load %arg19[%c56, %c32] : memref<64x64xf32, #tpu.memory_space<vmem>>, vector<8x32xf32>
    tpu.vector_store %arg19[%c56, %c32], %74 {strides = array<i32>} : memref<64x64xf32, #tpu.memory_space<vmem>>, vector<8x32xf32>,
    %76 = vector.extract_strided_slice %26 {offsets = [8, 0], sizes = [8, 128], strides = [1, 1]} : vector<64x128xf32> to vector<8x128xf32>
    %cst_38 = arith.constant dense<0.000000e+00> : vector<8x128xf32>
    %77 = tpu.matmul %55, %32, %cst_38 {dimension_numbers = #tpu.dot_dimension_numbers<[1], [0], [0], [1], [0, 0, 1, 1], [], []>} : vector<8x32xf32>, vector<32x128xf32>, vector<8x128xf32> -> vector<8x128xf32>
    %78 = arith.addf %76, %77 : vector<8x128xf32>
    %79 = arith.negf %78 : vector<8x128xf32>
    %80 = math.exp %79 : vector<8x128xf32>
    %cst_39 = arith.constant 1.000000e+00 : f32
    %81 = vector.broadcast %cst_39 : f32 to vector<8x128xf32>
    %82 = arith.addf %81, %80 : vector<8x128xf32>
    %83 = arith.divf %81, %82 : vector<8x128xf32>
    %84 = math.tanh %78 : vector<8x128xf32>
    %85 = vector.extract_strided_slice %83 {offsets = [0, 0], sizes = [8, 32], strides = [1, 1]} : vector<8x128xf32> to vector<8x32xf32>
    %86 = vector.extract_strided_slice %83 {offsets = [0, 32], sizes = [8, 32], strides = [1, 1]} : vector<8x128xf32> to vector<8x32xf32>
    %87 = vector.extract_strided_slice %84 {offsets = [0, 64], sizes = [8, 32], strides = [1, 1]} : vector<8x128xf32> to vector<8x32xf32>
    %88 = vector.extract_strided_slice %83 {offsets = [0, 96], sizes = [8, 32], strides = [1, 1]} : vector<8x128xf32> to vector<8x32xf32>
    %89 = arith.mulf %86, %53 : vector<8x32xf32>
    %90 = arith.mulf %85, %87 : vector<8x32xf32>
    %91 = arith.addf %89, %90 : vector<8x32xf32>
    %92 = math.tanh %91 : vector<8x32xf32>
    %93 = arith.mulf %88, %92 : vector<8x32xf32>
    %c8 = arith.constant 8 : index
    %c0_40 = arith.constant 0 : index
    %94 = vector.load %arg19[%c8, %c0_40] : memref<64x64xf32, #tpu.memory_space<vmem>>, vector<8x32xf32>
    tpu.vector_store %arg19[%c8, %c0_40], %93 {strides = array<i32>} : memref<64x64xf32, #tpu.memory_space<vmem>>, vector<8x32xf32>,
    %95 = vector.extract_strided_slice %31 {offsets = [48, 0], sizes = [8, 128], strides = [1, 1]} : vector<64x128xf32> to vector<8x128xf32>
    %cst_41 = arith.constant dense<0.000000e+00> : vector<8x128xf32>
    %96 = tpu.matmul %74, %33, %cst_41 {dimension_numbers = #tpu.dot_dimension_numbers<[1], [0], [0], [1], [0, 0, 1, 1], [], []>} : vector<8x32xf32>, vector<32x128xf32>, vector<8x128xf32> -> vector<8x128xf32>
    %97 = arith.addf %95, %96 : vector<8x128xf32>
    %98 = arith.negf %97 : vector<8x128xf32>
    %99 = math.exp %98 : vector<8x128xf32>
    %cst_42 = arith.constant 1.000000e+00 : f32
    %100 = vector.broadcast %cst_42 : f32 to vector<8x128xf32>
    %101 = arith.addf %100, %99 : vector<8x128xf32>
    %102 = arith.divf %100, %101 : vector<8x128xf32>
    %103 = math.tanh %97 : vector<8x128xf32>
    %104 = vector.extract_strided_slice %102 {offsets = [0, 0], sizes = [8, 32], strides = [1, 1]} : vector<8x128xf32> to vector<8x32xf32>
    %105 = vector.extract_strided_slice %102 {offsets = [0, 32], sizes = [8, 32], strides = [1, 1]} : vector<8x128xf32> to vector<8x32xf32>
    %106 = vector.extract_strided_slice %103 {offsets = [0, 64], sizes = [8, 32], strides = [1, 1]} : vector<8x128xf32> to vector<8x32xf32>
    %107 = vector.extract_strided_slice %102 {offsets = [0, 96], sizes = [8, 32], strides = [1, 1]} : vector<8x128xf32> to vector<8x32xf32>
    %108 = arith.mulf %105, %72 : vector<8x32xf32>
    %109 = arith.mulf %104, %106 : vector<8x32xf32>
    %110 = arith.addf %108, %109 : vector<8x32xf32>
    %111 = math.tanh %110 : vector<8x32xf32>
    %112 = arith.mulf %107, %111 : vector<8x32xf32>
    %c48 = arith.constant 48 : index
    %c32_43 = arith.constant 32 : index
    %113 = vector.load %arg19[%c48, %c32_43] : memref<64x64xf32, #tpu.memory_space<vmem>>, vector<8x32xf32>
    tpu.vector_store %arg19[%c48, %c32_43], %112 {strides = array<i32>} : memref<64x64xf32, #tpu.memory_space<vmem>>, vector<8x32xf32>,
    %114 = vector.extract_strided_slice %26 {offsets = [16, 0], sizes = [8, 128], strides = [1, 1]} : vector<64x128xf32> to vector<8x128xf32>
    %cst_44 = arith.constant dense<0.000000e+00> : vector<8x128xf32>
    %115 = tpu.matmul %93, %32, %cst_44 {dimension_numbers = #tpu.dot_dimension_numbers<[1], [0], [0], [1], [0, 0, 1, 1], [], []>} : vector<8x32xf32>, vector<32x128xf32>, vector<8x128xf32> -> vector<8x128xf32>
    %116 = arith.addf %114, %115 : vector<8x128xf32>
    %117 = arith.negf %116 : vector<8x128xf32>
    %118 = math.exp %117 : vector<8x128xf32>
    %cst_45 = arith.constant 1.000000e+00 : f32
    %119 = vector.broadcast %cst_45 : f32 to vector<8x128xf32>
    %120 = arith.addf %119, %118 : vector<8x128xf32>
    %121 = arith.divf %119, %120 : vector<8x128xf32>
    %122 = math.tanh %116 : vector<8x128xf32>
    %123 = vector.extract_strided_slice %121 {offsets = [0, 0], sizes = [8, 32], strides = [1, 1]} : vector<8x128xf32> to vector<8x32xf32>
    %124 = vector.extract_strided_slice %121 {offsets = [0, 32], sizes = [8, 32], strides = [1, 1]} : vector<8x128xf32> to vector<8x32xf32>
    %125 = vector.extract_strided_slice %122 {offsets = [0, 64], sizes = [8, 32], strides = [1, 1]} : vector<8x128xf32> to vector<8x32xf32>
    %126 = vector.extract_strided_slice %121 {offsets = [0, 96], sizes = [8, 32], strides = [1, 1]} : vector<8x128xf32> to vector<8x32xf32>
    %127 = arith.mulf %124, %91 : vector<8x32xf32>
    %128 = arith.mulf %123, %125 : vector<8x32xf32>
    %129 = arith.addf %127, %128 : vector<8x32xf32>
    %130 = math.tanh %129 : vector<8x32xf32>
    %131 = arith.mulf %126, %130 : vector<8x32xf32>
    %c16 = arith.constant 16 : index
    %c0_46 = arith.constant 0 : index
    %132 = vector.load %arg19[%c16, %c0_46] : memref<64x64xf32, #tpu.memory_space<vmem>>, vector<8x32xf32>
    tpu.vector_store %arg19[%c16, %c0_46], %131 {strides = array<i32>} : memref<64x64xf32, #tpu.memory_space<vmem>>, vector<8x32xf32>,
    %133 = vector.extract_strided_slice %31 {offsets = [40, 0], sizes = [8, 128], strides = [1, 1]} : vector<64x128xf32> to vector<8x128xf32>
    %cst_47 = arith.constant dense<0.000000e+00> : vector<8x128xf32>
    %134 = tpu.matmul %112, %33, %cst_47 {dimension_numbers = #tpu.dot_dimension_numbers<[1], [0], [0], [1], [0, 0, 1, 1], [], []>} : vector<8x32xf32>, vector<32x128xf32>, vector<8x128xf32> -> vector<8x128xf32>
    %135 = arith.addf %133, %134 : vector<8x128xf32>
    %136 = arith.negf %135 : vector<8x128xf32>
    %137 = math.exp %136 : vector<8x128xf32>
    %cst_48 = arith.constant 1.000000e+00 : f32
    %138 = vector.broadcast %cst_48 : f32 to vector<8x128xf32>
    %139 = arith.addf %138, %137 : vector<8x128xf32>
    %140 = arith.divf %138, %139 : vector<8x128xf32>
    %141 = math.tanh %135 : vector<8x128xf32>
    %142 = vector.extract_strided_slice %140 {offsets = [0, 0], sizes = [8, 32], strides = [1, 1]} : vector<8x128xf32> to vector<8x32xf32>
    %143 = vector.extract_strided_slice %140 {offsets = [0, 32], sizes = [8, 32], strides = [1, 1]} : vector<8x128xf32> to vector<8x32xf32>
    %144 = vector.extract_strided_slice %141 {offsets = [0, 64], sizes = [8, 32], strides = [1, 1]} : vector<8x128xf32> to vector<8x32xf32>
    %145 = vector.extract_strided_slice %140 {offsets = [0, 96], sizes = [8, 32], strides = [1, 1]} : vector<8x128xf32> to vector<8x32xf32>
    %146 = arith.mulf %143, %110 : vector<8x32xf32>
    %147 = arith.mulf %142, %144 : vector<8x32xf32>
    %148 = arith.addf %146, %147 : vector<8x32xf32>
    %149 = math.tanh %148 : vector<8x32xf32>
    %150 = arith.mulf %145, %149 : vector<8x32xf32>
    %c40 = arith.constant 40 : index
    %c32_49 = arith.constant 32 : index
    %151 = vector.load %arg19[%c40, %c32_49] : memref<64x64xf32, #tpu.memory_space<vmem>>, vector<8x32xf32>
    tpu.vector_store %arg19[%c40, %c32_49], %150 {strides = array<i32>} : memref<64x64xf32, #tpu.memory_space<vmem>>, vector<8x32xf32>,
    %152 = vector.extract_strided_slice %26 {offsets = [24, 0], sizes = [8, 128], strides = [1, 1]} : vector<64x128xf32> to vector<8x128xf32>
    %cst_50 = arith.constant dense<0.000000e+00> : vector<8x128xf32>
    %153 = tpu.matmul %131, %32, %cst_50 {dimension_numbers = #tpu.dot_dimension_numbers<[1], [0], [0], [1], [0, 0, 1, 1], [], []>} : vector<8x32xf32>, vector<32x128xf32>, vector<8x128xf32> -> vector<8x128xf32>
    %154 = arith.addf %152, %153 : vector<8x128xf32>
    %155 = arith.negf %154 : vector<8x128xf32>
    %156 = math.exp %155 : vector<8x128xf32>
    %cst_51 = arith.constant 1.000000e+00 : f32
    %157 = vector.broadcast %cst_51 : f32 to vector<8x128xf32>
    %158 = arith.addf %157, %156 : vector<8x128xf32>
    %159 = arith.divf %157, %158 : vector<8x128xf32>
    %160 = math.tanh %154 : vector<8x128xf32>
    %161 = vector.extract_strided_slice %159 {offsets = [0, 0], sizes = [8, 32], strides = [1, 1]} : vector<8x128xf32> to vector<8x32xf32>
    %162 = vector.extract_strided_slice %159 {offsets = [0, 32], sizes = [8, 32], strides = [1, 1]} : vector<8x128xf32> to vector<8x32xf32>
    %163 = vector.extract_strided_slice %160 {offsets = [0, 64], sizes = [8, 32], strides = [1, 1]} : vector<8x128xf32> to vector<8x32xf32>
    %164 = vector.extract_strided_slice %159 {offsets = [0, 96], sizes = [8, 32], strides = [1, 1]} : vector<8x128xf32> to vector<8x32xf32>
    %165 = arith.mulf %162, %129 : vector<8x32xf32>
    %166 = arith.mulf %161, %163 : vector<8x32xf32>
    %167 = arith.addf %165, %166 : vector<8x32xf32>
    %168 = math.tanh %167 : vector<8x32xf32>
    %169 = arith.mulf %164, %168 : vector<8x32xf32>
    %c24 = arith.constant 24 : index
    %c0_52 = arith.constant 0 : index
    %170 = vector.load %arg19[%c24, %c0_52] : memref<64x64xf32, #tpu.memory_space<vmem>>, vector<8x32xf32>
    tpu.vector_store %arg19[%c24, %c0_52], %169 {strides = array<i32>} : memref<64x64xf32, #tpu.memory_space<vmem>>, vector<8x32xf32>,
    %171 = vector.extract_strided_slice %31 {offsets = [32, 0], sizes = [8, 128], strides = [1, 1]} : vector<64x128xf32> to vector<8x128xf32>
    %cst_53 = arith.constant dense<0.000000e+00> : vector<8x128xf32>
    %172 = tpu.matmul %150, %33, %cst_53 {dimension_numbers = #tpu.dot_dimension_numbers<[1], [0], [0], [1], [0, 0, 1, 1], [], []>} : vector<8x32xf32>, vector<32x128xf32>, vector<8x128xf32> -> vector<8x128xf32>
    %173 = arith.addf %171, %172 : vector<8x128xf32>
    %174 = arith.negf %173 : vector<8x128xf32>
    %175 = math.exp %174 : vector<8x128xf32>
    %cst_54 = arith.constant 1.000000e+00 : f32
    %176 = vector.broadcast %cst_54 : f32 to vector<8x128xf32>
    %177 = arith.addf %176, %175 : vector<8x128xf32>
    %178 = arith.divf %176, %177 : vector<8x128xf32>
    %179 = math.tanh %173 : vector<8x128xf32>
    %180 = vector.extract_strided_slice %178 {offsets = [0, 0], sizes = [8, 32], strides = [1, 1]} : vector<8x128xf32> to vector<8x32xf32>
    %181 = vector.extract_strided_slice %178 {offsets = [0, 32], sizes = [8, 32], strides = [1, 1]} : vector<8x128xf32> to vector<8x32xf32>
    %182 = vector.extract_strided_slice %179 {offsets = [0, 64], sizes = [8, 32], strides = [1, 1]} : vector<8x128xf32> to vector<8x32xf32>
    %183 = vector.extract_strided_slice %178 {offsets = [0, 96], sizes = [8, 32], strides = [1, 1]} : vector<8x128xf32> to vector<8x32xf32>
    %184 = arith.mulf %181, %148 : vector<8x32xf32>
    %185 = arith.mulf %180, %182 : vector<8x32xf32>
    %186 = arith.addf %184, %185 : vector<8x32xf32>
    %187 = math.tanh %186 : vector<8x32xf32>
    %188 = arith.mulf %183, %187 : vector<8x32xf32>
    %c32_55 = arith.constant 32 : index
    %c32_56 = arith.constant 32 : index
    %189 = vector.load %arg19[%c32_55, %c32_56] : memref<64x64xf32, #tpu.memory_space<vmem>>, vector<8x32xf32>
    tpu.vector_store %arg19[%c32_55, %c32_56], %188 {strides = array<i32>} : memref<64x64xf32, #tpu.memory_space<vmem>>, vector<8x32xf32>,
    %190 = vector.extract_strided_slice %26 {offsets = [32, 0], sizes = [8, 128], strides = [1, 1]} : vector<64x128xf32> to vector<8x128xf32>
    %cst_57 = arith.constant dense<0.000000e+00> : vector<8x128xf32>
    %191 = tpu.matmul %169, %32, %cst_57 {dimension_numbers = #tpu.dot_dimension_numbers<[1], [0], [0], [1], [0, 0, 1, 1], [], []>} : vector<8x32xf32>, vector<32x128xf32>, vector<8x128xf32> -> vector<8x128xf32>
    %192 = arith.addf %190, %191 : vector<8x128xf32>
    %193 = arith.negf %192 : vector<8x128xf32>
    %194 = math.exp %193 : vector<8x128xf32>
    %cst_58 = arith.constant 1.000000e+00 : f32
    %195 = vector.broadcast %cst_58 : f32 to vector<8x128xf32>
    %196 = arith.addf %195, %194 : vector<8x128xf32>
    %197 = arith.divf %195, %196 : vector<8x128xf32>
    %198 = math.tanh %192 : vector<8x128xf32>
    %199 = vector.extract_strided_slice %197 {offsets = [0, 0], sizes = [8, 32], strides = [1, 1]} : vector<8x128xf32> to vector<8x32xf32>
    %200 = vector.extract_strided_slice %197 {offsets = [0, 32], sizes = [8, 32], strides = [1, 1]} : vector<8x128xf32> to vector<8x32xf32>
    %201 = vector.extract_strided_slice %198 {offsets = [0, 64], sizes = [8, 32], strides = [1, 1]} : vector<8x128xf32> to vector<8x32xf32>
    %202 = vector.extract_strided_slice %197 {offsets = [0, 96], sizes = [8, 32], strides = [1, 1]} : vector<8x128xf32> to vector<8x32xf32>
    %203 = arith.mulf %200, %167 : vector<8x32xf32>
    %204 = arith.mulf %199, %201 : vector<8x32xf32>
    %205 = arith.addf %203, %204 : vector<8x32xf32>
    %206 = math.tanh %205 : vector<8x32xf32>
    %207 = arith.mulf %202, %206 : vector<8x32xf32>
    %c32_59 = arith.constant 32 : index
    %c0_60 = arith.constant 0 : index
    %208 = vector.load %arg19[%c32_59, %c0_60] : memref<64x64xf32, #tpu.memory_space<vmem>>, vector<8x32xf32>
    tpu.vector_store %arg19[%c32_59, %c0_60], %207 {strides = array<i32>} : memref<64x64xf32, #tpu.memory_space<vmem>>, vector<8x32xf32>,
    %209 = vector.extract_strided_slice %31 {offsets = [24, 0], sizes = [8, 128], strides = [1, 1]} : vector<64x128xf32> to vector<8x128xf32>
    %cst_61 = arith.constant dense<0.000000e+00> : vector<8x128xf32>
    %210 = tpu.matmul %188, %33, %cst_61 {dimension_numbers = #tpu.dot_dimension_numbers<[1], [0], [0], [1], [0, 0, 1, 1], [], []>} : vector<8x32xf32>, vector<32x128xf32>, vector<8x128xf32> -> vector<8x128xf32>
    %211 = arith.addf %209, %210 : vector<8x128xf32>
    %212 = arith.negf %211 : vector<8x128xf32>
    %213 = math.exp %212 : vector<8x128xf32>
    %cst_62 = arith.constant 1.000000e+00 : f32
    %214 = vector.broadcast %cst_62 : f32 to vector<8x128xf32>
    %215 = arith.addf %214, %213 : vector<8x128xf32>
    %216 = arith.divf %214, %215 : vector<8x128xf32>
    %217 = math.tanh %211 : vector<8x128xf32>
    %218 = vector.extract_strided_slice %216 {offsets = [0, 0], sizes = [8, 32], strides = [1, 1]} : vector<8x128xf32> to vector<8x32xf32>
    %219 = vector.extract_strided_slice %216 {offsets = [0, 32], sizes = [8, 32], strides = [1, 1]} : vector<8x128xf32> to vector<8x32xf32>
    %220 = vector.extract_strided_slice %217 {offsets = [0, 64], sizes = [8, 32], strides = [1, 1]} : vector<8x128xf32> to vector<8x32xf32>
    %221 = vector.extract_strided_slice %216 {offsets = [0, 96], sizes = [8, 32], strides = [1, 1]} : vector<8x128xf32> to vector<8x32xf32>
    %222 = arith.mulf %219, %186 : vector<8x32xf32>
    %223 = arith.mulf %218, %220 : vector<8x32xf32>
    %224 = arith.addf %222, %223 : vector<8x32xf32>
    %225 = math.tanh %224 : vector<8x32xf32>
    %226 = arith.mulf %221, %225 : vector<8x32xf32>
    %c24_63 = arith.constant 24 : index
    %c32_64 = arith.constant 32 : index
    %227 = vector.load %arg19[%c24_63, %c32_64] : memref<64x64xf32, #tpu.memory_space<vmem>>, vector<8x32xf32>
    tpu.vector_store %arg19[%c24_63, %c32_64], %226 {strides = array<i32>} : memref<64x64xf32, #tpu.memory_space<vmem>>, vector<8x32xf32>,
    %228 = vector.extract_strided_slice %26 {offsets = [40, 0], sizes = [8, 128], strides = [1, 1]} : vector<64x128xf32> to vector<8x128xf32>
    %cst_65 = arith.constant dense<0.000000e+00> : vector<8x128xf32>
    %229 = tpu.matmul %207, %32, %cst_65 {dimension_numbers = #tpu.dot_dimension_numbers<[1], [0], [0], [1], [0, 0, 1, 1], [], []>} : vector<8x32xf32>, vector<32x128xf32>, vector<8x128xf32> -> vector<8x128xf32>
    %230 = arith.addf %228, %229 : vector<8x128xf32>
    %231 = arith.negf %230 : vector<8x128xf32>
    %232 = math.exp %231 : vector<8x128xf32>
    %cst_66 = arith.constant 1.000000e+00 : f32
    %233 = vector.broadcast %cst_66 : f32 to vector<8x128xf32>
    %234 = arith.addf %233, %232 : vector<8x128xf32>
    %235 = arith.divf %233, %234 : vector<8x128xf32>
    %236 = math.tanh %230 : vector<8x128xf32>
    %237 = vector.extract_strided_slice %235 {offsets = [0, 0], sizes = [8, 32], strides = [1, 1]} : vector<8x128xf32> to vector<8x32xf32>
    %238 = vector.extract_strided_slice %235 {offsets = [0, 32], sizes = [8, 32], strides = [1, 1]} : vector<8x128xf32> to vector<8x32xf32>
    %239 = vector.extract_strided_slice %236 {offsets = [0, 64], sizes = [8, 32], strides = [1, 1]} : vector<8x128xf32> to vector<8x32xf32>
    %240 = vector.extract_strided_slice %235 {offsets = [0, 96], sizes = [8, 32], strides = [1, 1]} : vector<8x128xf32> to vector<8x32xf32>
    %241 = arith.mulf %238, %205 : vector<8x32xf32>
    %242 = arith.mulf %237, %239 : vector<8x32xf32>
    %243 = arith.addf %241, %242 : vector<8x32xf32>
    %244 = math.tanh %243 : vector<8x32xf32>
    %245 = arith.mulf %240, %244 : vector<8x32xf32>
    %c40_67 = arith.constant 40 : index
    %c0_68 = arith.constant 0 : index
    %246 = vector.load %arg19[%c40_67, %c0_68] : memref<64x64xf32, #tpu.memory_space<vmem>>, vector<8x32xf32>
    tpu.vector_store %arg19[%c40_67, %c0_68], %245 {strides = array<i32>} : memref<64x64xf32, #tpu.memory_space<vmem>>, vector<8x32xf32>,
    %247 = vector.extract_strided_slice %31 {offsets = [16, 0], sizes = [8, 128], strides = [1, 1]} : vector<64x128xf32> to vector<8x128xf32>
    %cst_69 = arith.constant dense<0.000000e+00> : vector<8x128xf32>
    %248 = tpu.matmul %226, %33, %cst_69 {dimension_numbers = #tpu.dot_dimension_numbers<[1], [0], [0], [1], [0, 0, 1, 1], [], []>} : vector<8x32xf32>, vector<32x128xf32>, vector<8x128xf32> -> vector<8x128xf32>
    %249 = arith.addf %247, %248 : vector<8x128xf32>
    %250 = arith.negf %249 : vector<8x128xf32>
    %251 = math.exp %250 : vector<8x128xf32>
    %cst_70 = arith.constant 1.000000e+00 : f32
    %252 = vector.broadcast %cst_70 : f32 to vector<8x128xf32>
    %253 = arith.addf %252, %251 : vector<8x128xf32>
    %254 = arith.divf %252, %253 : vector<8x128xf32>
    %255 = math.tanh %249 : vector<8x128xf32>
    %256 = vector.extract_strided_slice %254 {offsets = [0, 0], sizes = [8, 32], strides = [1, 1]} : vector<8x128xf32> to vector<8x32xf32>
    %257 = vector.extract_strided_slice %254 {offsets = [0, 32], sizes = [8, 32], strides = [1, 1]} : vector<8x128xf32> to vector<8x32xf32>
    %258 = vector.extract_strided_slice %255 {offsets = [0, 64], sizes = [8, 32], strides = [1, 1]} : vector<8x128xf32> to vector<8x32xf32>
    %259 = vector.extract_strided_slice %254 {offsets = [0, 96], sizes = [8, 32], strides = [1, 1]} : vector<8x128xf32> to vector<8x32xf32>
    %260 = arith.mulf %257, %224 : vector<8x32xf32>
    %261 = arith.mulf %256, %258 : vector<8x32xf32>
    %262 = arith.addf %260, %261 : vector<8x32xf32>
    %263 = math.tanh %262 : vector<8x32xf32>
    %264 = arith.mulf %259, %263 : vector<8x32xf32>
    %c16_71 = arith.constant 16 : index
    %c32_72 = arith.constant 32 : index
    %265 = vector.load %arg19[%c16_71, %c32_72] : memref<64x64xf32, #tpu.memory_space<vmem>>, vector<8x32xf32>
    tpu.vector_store %arg19[%c16_71, %c32_72], %264 {strides = array<i32>} : memref<64x64xf32, #tpu.memory_space<vmem>>, vector<8x32xf32>,
    %266 = vector.extract_strided_slice %26 {offsets = [48, 0], sizes = [8, 128], strides = [1, 1]} : vector<64x128xf32> to vector<8x128xf32>
    %cst_73 = arith.constant dense<0.000000e+00> : vector<8x128xf32>
    %267 = tpu.matmul %245, %32, %cst_73 {dimension_numbers = #tpu.dot_dimension_numbers<[1], [0], [0], [1], [0, 0, 1, 1], [], []>} : vector<8x32xf32>, vector<32x128xf32>, vector<8x128xf32> -> vector<8x128xf32>
    %268 = arith.addf %266, %267 : vector<8x128xf32>
    %269 = arith.negf %268 : vector<8x128xf32>
    %270 = math.exp %269 : vector<8x128xf32>
    %cst_74 = arith.constant 1.000000e+00 : f32
    %271 = vector.broadcast %cst_74 : f32 to vector<8x128xf32>
    %272 = arith.addf %271, %270 : vector<8x128xf32>
    %273 = arith.divf %271, %272 : vector<8x128xf32>
    %274 = math.tanh %268 : vector<8x128xf32>
    %275 = vector.extract_strided_slice %273 {offsets = [0, 0], sizes = [8, 32], strides = [1, 1]} : vector<8x128xf32> to vector<8x32xf32>
    %276 = vector.extract_strided_slice %273 {offsets = [0, 32], sizes = [8, 32], strides = [1, 1]} : vector<8x128xf32> to vector<8x32xf32>
    %277 = vector.extract_strided_slice %274 {offsets = [0, 64], sizes = [8, 32], strides = [1, 1]} : vector<8x128xf32> to vector<8x32xf32>
    %278 = vector.extract_strided_slice %273 {offsets = [0, 96], sizes = [8, 32], strides = [1, 1]} : vector<8x128xf32> to vector<8x32xf32>
    %279 = arith.mulf %276, %243 : vector<8x32xf32>
    %280 = arith.mulf %275, %277 : vector<8x32xf32>
    %281 = arith.addf %279, %280 : vector<8x32xf32>
    %282 = math.tanh %281 : vector<8x32xf32>
    %283 = arith.mulf %278, %282 : vector<8x32xf32>
    %c48_75 = arith.constant 48 : index
    %c0_76 = arith.constant 0 : index
    %284 = vector.load %arg19[%c48_75, %c0_76] : memref<64x64xf32, #tpu.memory_space<vmem>>, vector<8x32xf32>
    tpu.vector_store %arg19[%c48_75, %c0_76], %283 {strides = array<i32>} : memref<64x64xf32, #tpu.memory_space<vmem>>, vector<8x32xf32>,
    %285 = vector.extract_strided_slice %31 {offsets = [8, 0], sizes = [8, 128], strides = [1, 1]} : vector<64x128xf32> to vector<8x128xf32>
    %cst_77 = arith.constant dense<0.000000e+00> : vector<8x128xf32>
    %286 = tpu.matmul %264, %33, %cst_77 {dimension_numbers = #tpu.dot_dimension_numbers<[1], [0], [0], [1], [0, 0, 1, 1], [], []>} : vector<8x32xf32>, vector<32x128xf32>, vector<8x128xf32> -> vector<8x128xf32>
    %287 = arith.addf %285, %286 : vector<8x128xf32>
    %288 = arith.negf %287 : vector<8x128xf32>
    %289 = math.exp %288 : vector<8x128xf32>
    %cst_78 = arith.constant 1.000000e+00 : f32
    %290 = vector.broadcast %cst_78 : f32 to vector<8x128xf32>
    %291 = arith.addf %290, %289 : vector<8x128xf32>
    %292 = arith.divf %290, %291 : vector<8x128xf32>
    %293 = math.tanh %287 : vector<8x128xf32>
    %294 = vector.extract_strided_slice %292 {offsets = [0, 0], sizes = [8, 32], strides = [1, 1]} : vector<8x128xf32> to vector<8x32xf32>
    %295 = vector.extract_strided_slice %292 {offsets = [0, 32], sizes = [8, 32], strides = [1, 1]} : vector<8x128xf32> to vector<8x32xf32>
    %296 = vector.extract_strided_slice %293 {offsets = [0, 64], sizes = [8, 32], strides = [1, 1]} : vector<8x128xf32> to vector<8x32xf32>
    %297 = vector.extract_strided_slice %292 {offsets = [0, 96], sizes = [8, 32], strides = [1, 1]} : vector<8x128xf32> to vector<8x32xf32>
    %298 = arith.mulf %295, %262 : vector<8x32xf32>
    %299 = arith.mulf %294, %296 : vector<8x32xf32>
    %300 = arith.addf %298, %299 : vector<8x32xf32>
    %301 = math.tanh %300 : vector<8x32xf32>
    %302 = arith.mulf %297, %301 : vector<8x32xf32>
    %c8_79 = arith.constant 8 : index
    %c32_80 = arith.constant 32 : index
    %303 = vector.load %arg19[%c8_79, %c32_80] : memref<64x64xf32, #tpu.memory_space<vmem>>, vector<8x32xf32>
    tpu.vector_store %arg19[%c8_79, %c32_80], %302 {strides = array<i32>} : memref<64x64xf32, #tpu.memory_space<vmem>>, vector<8x32xf32>,
    %304 = vector.extract_strided_slice %26 {offsets = [56, 0], sizes = [8, 128], strides = [1, 1]} : vector<64x128xf32> to vector<8x128xf32>
    %cst_81 = arith.constant dense<0.000000e+00> : vector<8x128xf32>
    %305 = tpu.matmul %283, %32, %cst_81 {dimension_numbers = #tpu.dot_dimension_numbers<[1], [0], [0], [1], [0, 0, 1, 1], [], []>} : vector<8x32xf32>, vector<32x128xf32>, vector<8x128xf32> -> vector<8x128xf32>
    %306 = arith.addf %304, %305 : vector<8x128xf32>
    %307 = arith.negf %306 : vector<8x128xf32>
    %308 = math.exp %307 : vector<8x128xf32>
    %cst_82 = arith.constant 1.000000e+00 : f32
    %309 = vector.broadcast %cst_82 : f32 to vector<8x128xf32>
    %310 = arith.addf %309, %308 : vector<8x128xf32>
    %311 = arith.divf %309, %310 : vector<8x128xf32>
    %312 = math.tanh %306 : vector<8x128xf32>
    %313 = vector.extract_strided_slice %311 {offsets = [0, 0], sizes = [8, 32], strides = [1, 1]} : vector<8x128xf32> to vector<8x32xf32>
    %314 = vector.extract_strided_slice %311 {offsets = [0, 32], sizes = [8, 32], strides = [1, 1]} : vector<8x128xf32> to vector<8x32xf32>
    %315 = vector.extract_strided_slice %312 {offsets = [0, 64], sizes = [8, 32], strides = [1, 1]} : vector<8x128xf32> to vector<8x32xf32>
    %316 = vector.extract_strided_slice %311 {offsets = [0, 96], sizes = [8, 32], strides = [1, 1]} : vector<8x128xf32> to vector<8x32xf32>
    %317 = arith.mulf %314, %281 : vector<8x32xf32>
    %318 = arith.mulf %313, %315 : vector<8x32xf32>
    %319 = arith.addf %317, %318 : vector<8x32xf32>
    %320 = math.tanh %319 : vector<8x32xf32>
    %321 = arith.mulf %316, %320 : vector<8x32xf32>
    %c56_83 = arith.constant 56 : index
    %c0_84 = arith.constant 0 : index
    %322 = vector.load %arg19[%c56_83, %c0_84] : memref<64x64xf32, #tpu.memory_space<vmem>>, vector<8x32xf32>
    tpu.vector_store %arg19[%c56_83, %c0_84], %321 {strides = array<i32>} : memref<64x64xf32, #tpu.memory_space<vmem>>, vector<8x32xf32>,
    %323 = vector.extract_strided_slice %31 {offsets = [0, 0], sizes = [8, 128], strides = [1, 1]} : vector<64x128xf32> to vector<8x128xf32>
    %cst_85 = arith.constant dense<0.000000e+00> : vector<8x128xf32>
    %324 = tpu.matmul %302, %33, %cst_85 {dimension_numbers = #tpu.dot_dimension_numbers<[1], [0], [0], [1], [0, 0, 1, 1], [], []>} : vector<8x32xf32>, vector<32x128xf32>, vector<8x128xf32> -> vector<8x128xf32>
    %325 = arith.addf %323, %324 : vector<8x128xf32>
    %326 = arith.negf %325 : vector<8x128xf32>
    %327 = math.exp %326 : vector<8x128xf32>
    %cst_86 = arith.constant 1.000000e+00 : f32
    %328 = vector.broadcast %cst_86 : f32 to vector<8x128xf32>
    %329 = arith.addf %328, %327 : vector<8x128xf32>
    %330 = arith.divf %328, %329 : vector<8x128xf32>
    %331 = math.tanh %325 : vector<8x128xf32>
    %332 = vector.extract_strided_slice %330 {offsets = [0, 0], sizes = [8, 32], strides = [1, 1]} : vector<8x128xf32> to vector<8x32xf32>
    %333 = vector.extract_strided_slice %330 {offsets = [0, 32], sizes = [8, 32], strides = [1, 1]} : vector<8x128xf32> to vector<8x32xf32>
    %334 = vector.extract_strided_slice %331 {offsets = [0, 64], sizes = [8, 32], strides = [1, 1]} : vector<8x128xf32> to vector<8x32xf32>
    %335 = vector.extract_strided_slice %330 {offsets = [0, 96], sizes = [8, 32], strides = [1, 1]} : vector<8x128xf32> to vector<8x32xf32>
    %336 = arith.mulf %333, %300 : vector<8x32xf32>
    %337 = arith.mulf %332, %334 : vector<8x32xf32>
    %338 = arith.addf %336, %337 : vector<8x32xf32>
    %339 = math.tanh %338 : vector<8x32xf32>
    %340 = arith.mulf %335, %339 : vector<8x32xf32>
    %c0_87 = arith.constant 0 : index
    %c32_88 = arith.constant 32 : index
    %341 = vector.load %arg19[%c0_87, %c32_88] : memref<64x64xf32, #tpu.memory_space<vmem>>, vector<8x32xf32>
    tpu.vector_store %arg19[%c0_87, %c32_88], %340 {strides = array<i32>} : memref<64x64xf32, #tpu.memory_space<vmem>>, vector<8x32xf32>,
    %c0_89 = arith.constant 0 : index
    %c0_90 = arith.constant 0 : index
    %342 = vector.load %arg19[%c0_89, %c0_90] : memref<64x64xf32, #tpu.memory_space<vmem>>, vector<64x64xf32>
    %c0_91 = arith.constant 0 : index
    %c0_92 = arith.constant 0 : index
    %343 = vector.load %arg10[%c0_91, %c0_92] : memref<64x128xf32, #tpu.memory_space<vmem>>, vector<64x128xf32>
    %cst_93 = arith.constant dense<0.000000e+00> : vector<64x128xf32>
    %344 = tpu.matmul %342, %343, %cst_93 {dimension_numbers = #tpu.dot_dimension_numbers<[1], [0], [0], [1], [0, 0, 1, 1], [], []>} : vector<64x64xf32>, vector<64x128xf32>, vector<64x128xf32> -> vector<64x128xf32>
    %c0_94 = arith.constant 0 : index
    %c0_95 = arith.constant 0 : index
    %345 = vector.load %arg12[%c0_94, %c0_95] : memref<1x128xf32, #tpu.memory_space<vmem>>, vector<1x128xf32>
    %346 = vector.broadcast %345 : vector<1x128xf32> to vector<64x128xf32>
    %347 = arith.addf %344, %346 : vector<64x128xf32>
    %c0_96 = arith.constant 0 : index
    %c0_97 = arith.constant 0 : index
    %348 = vector.load %arg13[%c0_96, %c0_97] : memref<64x128xf32, #tpu.memory_space<vmem>>, vector<64x128xf32>
    %cst_98 = arith.constant dense<0.000000e+00> : vector<64x128xf32>
    %349 = tpu.matmul %342, %348, %cst_98 {dimension_numbers = #tpu.dot_dimension_numbers<[1], [0], [0], [1], [0, 0, 1, 1], [], []>} : vector<64x64xf32>, vector<64x128xf32>, vector<64x128xf32> -> vector<64x128xf32>
    %c0_99 = arith.constant 0 : index
    %c0_100 = arith.constant 0 : index
    %350 = vector.load %arg15[%c0_99, %c0_100] : memref<1x128xf32, #tpu.memory_space<vmem>>, vector<1x128xf32>
    %351 = vector.broadcast %350 : vector<1x128xf32> to vector<64x128xf32>
    %352 = arith.addf %349, %351 : vector<64x128xf32>
    %c0_101 = arith.constant 0 : index
    %c0_102 = arith.constant 0 : index
    %353 = vector.load %arg11[%c0_101, %c0_102] : memref<32x128xf32, #tpu.memory_space<vmem>>, vector<32x128xf32>
    %c0_103 = arith.constant 0 : index
    %c0_104 = arith.constant 0 : index
    %354 = vector.load %arg14[%c0_103, %c0_104] : memref<32x128xf32, #tpu.memory_space<vmem>>, vector<32x128xf32>
    %cst_105 = arith.constant 0.000000e+00 : f32
    %355 = vector.broadcast %cst_105 : f32 to vector<8x32xf32>
    %cst_106 = arith.constant 0.000000e+00 : f32
    %356 = vector.broadcast %cst_106 : f32 to vector<8x32xf32>
    %cst_107 = arith.constant 0.000000e+00 : f32
    %357 = vector.broadcast %cst_107 : f32 to vector<8x32xf32>
    %cst_108 = arith.constant 0.000000e+00 : f32
    %358 = vector.broadcast %cst_108 : f32 to vector<8x32xf32>
    %359 = vector.extract_strided_slice %347 {offsets = [0, 0], sizes = [8, 128], strides = [1, 1]} : vector<64x128xf32> to vector<8x128xf32>
    %cst_109 = arith.constant dense<0.000000e+00> : vector<8x128xf32>
    %360 = tpu.matmul %355, %353, %cst_109 {dimension_numbers = #tpu.dot_dimension_numbers<[1], [0], [0], [1], [0, 0, 1, 1], [], []>} : vector<8x32xf32>, vector<32x128xf32>, vector<8x128xf32> -> vector<8x128xf32>
    %361 = arith.addf %359, %360 : vector<8x128xf32>
    %362 = arith.negf %361 : vector<8x128xf32>
    %363 = math.exp %362 : vector<8x128xf32>
    %cst_110 = arith.constant 1.000000e+00 : f32
    %364 = vector.broadcast %cst_110 : f32 to vector<8x128xf32>
    %365 = arith.addf %364, %363 : vector<8x128xf32>
    %366 = arith.divf %364, %365 : vector<8x128xf32>
    %367 = math.tanh %361 : vector<8x128xf32>
    %368 = vector.extract_strided_slice %366 {offsets = [0, 0], sizes = [8, 32], strides = [1, 1]} : vector<8x128xf32> to vector<8x32xf32>
    %369 = vector.extract_strided_slice %366 {offsets = [0, 32], sizes = [8, 32], strides = [1, 1]} : vector<8x128xf32> to vector<8x32xf32>
    %370 = vector.extract_strided_slice %367 {offsets = [0, 64], sizes = [8, 32], strides = [1, 1]} : vector<8x128xf32> to vector<8x32xf32>
    %371 = vector.extract_strided_slice %366 {offsets = [0, 96], sizes = [8, 32], strides = [1, 1]} : vector<8x128xf32> to vector<8x32xf32>
    %372 = arith.mulf %369, %356 : vector<8x32xf32>
    %373 = arith.mulf %368, %370 : vector<8x32xf32>
    %374 = arith.addf %372, %373 : vector<8x32xf32>
    %375 = math.tanh %374 : vector<8x32xf32>
    %376 = arith.mulf %371, %375 : vector<8x32xf32>
    %c0_111 = arith.constant 0 : index
    %c0_112 = arith.constant 0 : index
    %377 = vector.load %arg19[%c0_111, %c0_112] : memref<64x64xf32, #tpu.memory_space<vmem>>, vector<8x32xf32>
    tpu.vector_store %arg19[%c0_111, %c0_112], %376 {strides = array<i32>} : memref<64x64xf32, #tpu.memory_space<vmem>>, vector<8x32xf32>,
    %378 = vector.extract_strided_slice %352 {offsets = [56, 0], sizes = [8, 128], strides = [1, 1]} : vector<64x128xf32> to vector<8x128xf32>
    %cst_113 = arith.constant dense<0.000000e+00> : vector<8x128xf32>
    %379 = tpu.matmul %357, %354, %cst_113 {dimension_numbers = #tpu.dot_dimension_numbers<[1], [0], [0], [1], [0, 0, 1, 1], [], []>} : vector<8x32xf32>, vector<32x128xf32>, vector<8x128xf32> -> vector<8x128xf32>
    %380 = arith.addf %378, %379 : vector<8x128xf32>
    %381 = arith.negf %380 : vector<8x128xf32>
    %382 = math.exp %381 : vector<8x128xf32>
    %cst_114 = arith.constant 1.000000e+00 : f32
    %383 = vector.broadcast %cst_114 : f32 to vector<8x128xf32>
    %384 = arith.addf %383, %382 : vector<8x128xf32>
    %385 = arith.divf %383, %384 : vector<8x128xf32>
    %386 = math.tanh %380 : vector<8x128xf32>
    %387 = vector.extract_strided_slice %385 {offsets = [0, 0], sizes = [8, 32], strides = [1, 1]} : vector<8x128xf32> to vector<8x32xf32>
    %388 = vector.extract_strided_slice %385 {offsets = [0, 32], sizes = [8, 32], strides = [1, 1]} : vector<8x128xf32> to vector<8x32xf32>
    %389 = vector.extract_strided_slice %386 {offsets = [0, 64], sizes = [8, 32], strides = [1, 1]} : vector<8x128xf32> to vector<8x32xf32>
    %390 = vector.extract_strided_slice %385 {offsets = [0, 96], sizes = [8, 32], strides = [1, 1]} : vector<8x128xf32> to vector<8x32xf32>
    %391 = arith.mulf %388, %358 : vector<8x32xf32>
    %392 = arith.mulf %387, %389 : vector<8x32xf32>
    %393 = arith.addf %391, %392 : vector<8x32xf32>
    %394 = math.tanh %393 : vector<8x32xf32>
    %395 = arith.mulf %390, %394 : vector<8x32xf32>
    %c56_115 = arith.constant 56 : index
    %c32_116 = arith.constant 32 : index
    %396 = vector.load %arg19[%c56_115, %c32_116] : memref<64x64xf32, #tpu.memory_space<vmem>>, vector<8x32xf32>
    tpu.vector_store %arg19[%c56_115, %c32_116], %395 {strides = array<i32>} : memref<64x64xf32, #tpu.memory_space<vmem>>, vector<8x32xf32>,
    %397 = vector.extract_strided_slice %347 {offsets = [8, 0], sizes = [8, 128], strides = [1, 1]} : vector<64x128xf32> to vector<8x128xf32>
    %cst_117 = arith.constant dense<0.000000e+00> : vector<8x128xf32>
    %398 = tpu.matmul %376, %353, %cst_117 {dimension_numbers = #tpu.dot_dimension_numbers<[1], [0], [0], [1], [0, 0, 1, 1], [], []>} : vector<8x32xf32>, vector<32x128xf32>, vector<8x128xf32> -> vector<8x128xf32>
    %399 = arith.addf %397, %398 : vector<8x128xf32>
    %400 = arith.negf %399 : vector<8x128xf32>
    %401 = math.exp %400 : vector<8x128xf32>
    %cst_118 = arith.constant 1.000000e+00 : f32
    %402 = vector.broadcast %cst_118 : f32 to vector<8x128xf32>
    %403 = arith.addf %402, %401 : vector<8x128xf32>
    %404 = arith.divf %402, %403 : vector<8x128xf32>
    %405 = math.tanh %399 : vector<8x128xf32>
    %406 = vector.extract_strided_slice %404 {offsets = [0, 0], sizes = [8, 32], strides = [1, 1]} : vector<8x128xf32> to vector<8x32xf32>
    %407 = vector.extract_strided_slice %404 {offsets = [0, 32], sizes = [8, 32], strides = [1, 1]} : vector<8x128xf32> to vector<8x32xf32>
    %408 = vector.extract_strided_slice %405 {offsets = [0, 64], sizes = [8, 32], strides = [1, 1]} : vector<8x128xf32> to vector<8x32xf32>
    %409 = vector.extract_strided_slice %404 {offsets = [0, 96], sizes = [8, 32], strides = [1, 1]} : vector<8x128xf32> to vector<8x32xf32>
    %410 = arith.mulf %407, %374 : vector<8x32xf32>
    %411 = arith.mulf %406, %408 : vector<8x32xf32>
    %412 = arith.addf %410, %411 : vector<8x32xf32>
    %413 = math.tanh %412 : vector<8x32xf32>
    %414 = arith.mulf %409, %413 : vector<8x32xf32>
    %c8_119 = arith.constant 8 : index
    %c0_120 = arith.constant 0 : index
    %415 = vector.load %arg19[%c8_119, %c0_120] : memref<64x64xf32, #tpu.memory_space<vmem>>, vector<8x32xf32>
    tpu.vector_store %arg19[%c8_119, %c0_120], %414 {strides = array<i32>} : memref<64x64xf32, #tpu.memory_space<vmem>>, vector<8x32xf32>,
    %416 = vector.extract_strided_slice %352 {offsets = [48, 0], sizes = [8, 128], strides = [1, 1]} : vector<64x128xf32> to vector<8x128xf32>
    %cst_121 = arith.constant dense<0.000000e+00> : vector<8x128xf32>
    %417 = tpu.matmul %395, %354, %cst_121 {dimension_numbers = #tpu.dot_dimension_numbers<[1], [0], [0], [1], [0, 0, 1, 1], [], []>} : vector<8x32xf32>, vector<32x128xf32>, vector<8x128xf32> -> vector<8x128xf32>
    %418 = arith.addf %416, %417 : vector<8x128xf32>
    %419 = arith.negf %418 : vector<8x128xf32>
    %420 = math.exp %419 : vector<8x128xf32>
    %cst_122 = arith.constant 1.000000e+00 : f32
    %421 = vector.broadcast %cst_122 : f32 to vector<8x128xf32>
    %422 = arith.addf %421, %420 : vector<8x128xf32>
    %423 = arith.divf %421, %422 : vector<8x128xf32>
    %424 = math.tanh %418 : vector<8x128xf32>
    %425 = vector.extract_strided_slice %423 {offsets = [0, 0], sizes = [8, 32], strides = [1, 1]} : vector<8x128xf32> to vector<8x32xf32>
    %426 = vector.extract_strided_slice %423 {offsets = [0, 32], sizes = [8, 32], strides = [1, 1]} : vector<8x128xf32> to vector<8x32xf32>
    %427 = vector.extract_strided_slice %424 {offsets = [0, 64], sizes = [8, 32], strides = [1, 1]} : vector<8x128xf32> to vector<8x32xf32>
    %428 = vector.extract_strided_slice %423 {offsets = [0, 96], sizes = [8, 32], strides = [1, 1]} : vector<8x128xf32> to vector<8x32xf32>
    %429 = arith.mulf %426, %393 : vector<8x32xf32>
    %430 = arith.mulf %425, %427 : vector<8x32xf32>
    %431 = arith.addf %429, %430 : vector<8x32xf32>
    %432 = math.tanh %431 : vector<8x32xf32>
    %433 = arith.mulf %428, %432 : vector<8x32xf32>
    %c48_123 = arith.constant 48 : index
    %c32_124 = arith.constant 32 : index
    %434 = vector.load %arg19[%c48_123, %c32_124] : memref<64x64xf32, #tpu.memory_space<vmem>>, vector<8x32xf32>
    tpu.vector_store %arg19[%c48_123, %c32_124], %433 {strides = array<i32>} : memref<64x64xf32, #tpu.memory_space<vmem>>, vector<8x32xf32>,
    %435 = vector.extract_strided_slice %347 {offsets = [16, 0], sizes = [8, 128], strides = [1, 1]} : vector<64x128xf32> to vector<8x128xf32>
    %cst_125 = arith.constant dense<0.000000e+00> : vector<8x128xf32>
    %436 = tpu.matmul %414, %353, %cst_125 {dimension_numbers = #tpu.dot_dimension_numbers<[1], [0], [0], [1], [0, 0, 1, 1], [], []>} : vector<8x32xf32>, vector<32x128xf32>, vector<8x128xf32> -> vector<8x128xf32>
    %437 = arith.addf %435, %436 : vector<8x128xf32>
    %438 = arith.negf %437 : vector<8x128xf32>
    %439 = math.exp %438 : vector<8x128xf32>
    %cst_126 = arith.constant 1.000000e+00 : f32
    %440 = vector.broadcast %cst_126 : f32 to vector<8x128xf32>
    %441 = arith.addf %440, %439 : vector<8x128xf32>
    %442 = arith.divf %440, %441 : vector<8x128xf32>
    %443 = math.tanh %437 : vector<8x128xf32>
    %444 = vector.extract_strided_slice %442 {offsets = [0, 0], sizes = [8, 32], strides = [1, 1]} : vector<8x128xf32> to vector<8x32xf32>
    %445 = vector.extract_strided_slice %442 {offsets = [0, 32], sizes = [8, 32], strides = [1, 1]} : vector<8x128xf32> to vector<8x32xf32>
    %446 = vector.extract_strided_slice %443 {offsets = [0, 64], sizes = [8, 32], strides = [1, 1]} : vector<8x128xf32> to vector<8x32xf32>
    %447 = vector.extract_strided_slice %442 {offsets = [0, 96], sizes = [8, 32], strides = [1, 1]} : vector<8x128xf32> to vector<8x32xf32>
    %448 = arith.mulf %445, %412 : vector<8x32xf32>
    %449 = arith.mulf %444, %446 : vector<8x32xf32>
    %450 = arith.addf %448, %449 : vector<8x32xf32>
    %451 = math.tanh %450 : vector<8x32xf32>
    %452 = arith.mulf %447, %451 : vector<8x32xf32>
    %c16_127 = arith.constant 16 : index
    %c0_128 = arith.constant 0 : index
    %453 = vector.load %arg19[%c16_127, %c0_128] : memref<64x64xf32, #tpu.memory_space<vmem>>, vector<8x32xf32>
    tpu.vector_store %arg19[%c16_127, %c0_128], %452 {strides = array<i32>} : memref<64x64xf32, #tpu.memory_space<vmem>>, vector<8x32xf32>,
    %454 = vector.extract_strided_slice %352 {offsets = [40, 0], sizes = [8, 128], strides = [1, 1]} : vector<64x128xf32> to vector<8x128xf32>
    %cst_129 = arith.constant dense<0.000000e+00> : vector<8x128xf32>
    %455 = tpu.matmul %433, %354, %cst_129 {dimension_numbers = #tpu.dot_dimension_numbers<[1], [0], [0], [1], [0, 0, 1, 1], [], []>} : vector<8x32xf32>, vector<32x128xf32>, vector<8x128xf32> -> vector<8x128xf32>
    %456 = arith.addf %454, %455 : vector<8x128xf32>
    %457 = arith.negf %456 : vector<8x128xf32>
    %458 = math.exp %457 : vector<8x128xf32>
    %cst_130 = arith.constant 1.000000e+00 : f32
    %459 = vector.broadcast %cst_130 : f32 to vector<8x128xf32>
    %460 = arith.addf %459, %458 : vector<8x128xf32>
    %461 = arith.divf %459, %460 : vector<8x128xf32>
    %462 = math.tanh %456 : vector<8x128xf32>
    %463 = vector.extract_strided_slice %461 {offsets = [0, 0], sizes = [8, 32], strides = [1, 1]} : vector<8x128xf32> to vector<8x32xf32>
    %464 = vector.extract_strided_slice %461 {offsets = [0, 32], sizes = [8, 32], strides = [1, 1]} : vector<8x128xf32> to vector<8x32xf32>
    %465 = vector.extract_strided_slice %462 {offsets = [0, 64], sizes = [8, 32], strides = [1, 1]} : vector<8x128xf32> to vector<8x32xf32>
    %466 = vector.extract_strided_slice %461 {offsets = [0, 96], sizes = [8, 32], strides = [1, 1]} : vector<8x128xf32> to vector<8x32xf32>
    %467 = arith.mulf %464, %431 : vector<8x32xf32>
    %468 = arith.mulf %463, %465 : vector<8x32xf32>
    %469 = arith.addf %467, %468 : vector<8x32xf32>
    %470 = math.tanh %469 : vector<8x32xf32>
    %471 = arith.mulf %466, %470 : vector<8x32xf32>
    %c40_131 = arith.constant 40 : index
    %c32_132 = arith.constant 32 : index
    %472 = vector.load %arg19[%c40_131, %c32_132] : memref<64x64xf32, #tpu.memory_space<vmem>>, vector<8x32xf32>
    tpu.vector_store %arg19[%c40_131, %c32_132], %471 {strides = array<i32>} : memref<64x64xf32, #tpu.memory_space<vmem>>, vector<8x32xf32>,
    %473 = vector.extract_strided_slice %347 {offsets = [24, 0], sizes = [8, 128], strides = [1, 1]} : vector<64x128xf32> to vector<8x128xf32>
    %cst_133 = arith.constant dense<0.000000e+00> : vector<8x128xf32>
    %474 = tpu.matmul %452, %353, %cst_133 {dimension_numbers = #tpu.dot_dimension_numbers<[1], [0], [0], [1], [0, 0, 1, 1], [], []>} : vector<8x32xf32>, vector<32x128xf32>, vector<8x128xf32> -> vector<8x128xf32>
    %475 = arith.addf %473, %474 : vector<8x128xf32>
    %476 = arith.negf %475 : vector<8x128xf32>
    %477 = math.exp %476 : vector<8x128xf32>
    %cst_134 = arith.constant 1.000000e+00 : f32
    %478 = vector.broadcast %cst_134 : f32 to vector<8x128xf32>
    %479 = arith.addf %478, %477 : vector<8x128xf32>
    %480 = arith.divf %478, %479 : vector<8x128xf32>
    %481 = math.tanh %475 : vector<8x128xf32>
    %482 = vector.extract_strided_slice %480 {offsets = [0, 0], sizes = [8, 32], strides = [1, 1]} : vector<8x128xf32> to vector<8x32xf32>
    %483 = vector.extract_strided_slice %480 {offsets = [0, 32], sizes = [8, 32], strides = [1, 1]} : vector<8x128xf32> to vector<8x32xf32>
    %484 = vector.extract_strided_slice %481 {offsets = [0, 64], sizes = [8, 32], strides = [1, 1]} : vector<8x128xf32> to vector<8x32xf32>
    %485 = vector.extract_strided_slice %480 {offsets = [0, 96], sizes = [8, 32], strides = [1, 1]} : vector<8x128xf32> to vector<8x32xf32>
    %486 = arith.mulf %483, %450 : vector<8x32xf32>
    %487 = arith.mulf %482, %484 : vector<8x32xf32>
    %488 = arith.addf %486, %487 : vector<8x32xf32>
    %489 = math.tanh %488 : vector<8x32xf32>
    %490 = arith.mulf %485, %489 : vector<8x32xf32>
    %c24_135 = arith.constant 24 : index
    %c0_136 = arith.constant 0 : index
    %491 = vector.load %arg19[%c24_135, %c0_136] : memref<64x64xf32, #tpu.memory_space<vmem>>, vector<8x32xf32>
    tpu.vector_store %arg19[%c24_135, %c0_136], %490 {strides = array<i32>} : memref<64x64xf32, #tpu.memory_space<vmem>>, vector<8x32xf32>,
    %492 = vector.extract_strided_slice %352 {offsets = [32, 0], sizes = [8, 128], strides = [1, 1]} : vector<64x128xf32> to vector<8x128xf32>
    %cst_137 = arith.constant dense<0.000000e+00> : vector<8x128xf32>
    %493 = tpu.matmul %471, %354, %cst_137 {dimension_numbers = #tpu.dot_dimension_numbers<[1], [0], [0], [1], [0, 0, 1, 1], [], []>} : vector<8x32xf32>, vector<32x128xf32>, vector<8x128xf32> -> vector<8x128xf32>
    %494 = arith.addf %492, %493 : vector<8x128xf32>
    %495 = arith.negf %494 : vector<8x128xf32>
    %496 = math.exp %495 : vector<8x128xf32>
    %cst_138 = arith.constant 1.000000e+00 : f32
    %497 = vector.broadcast %cst_138 : f32 to vector<8x128xf32>
    %498 = arith.addf %497, %496 : vector<8x128xf32>
    %499 = arith.divf %497, %498 : vector<8x128xf32>
    %500 = math.tanh %494 : vector<8x128xf32>
    %501 = vector.extract_strided_slice %499 {offsets = [0, 0], sizes = [8, 32], strides = [1, 1]} : vector<8x128xf32> to vector<8x32xf32>
    %502 = vector.extract_strided_slice %499 {offsets = [0, 32], sizes = [8, 32], strides = [1, 1]} : vector<8x128xf32> to vector<8x32xf32>
    %503 = vector.extract_strided_slice %500 {offsets = [0, 64], sizes = [8, 32], strides = [1, 1]} : vector<8x128xf32> to vector<8x32xf32>
    %504 = vector.extract_strided_slice %499 {offsets = [0, 96], sizes = [8, 32], strides = [1, 1]} : vector<8x128xf32> to vector<8x32xf32>
    %505 = arith.mulf %502, %469 : vector<8x32xf32>
    %506 = arith.mulf %501, %503 : vector<8x32xf32>
    %507 = arith.addf %505, %506 : vector<8x32xf32>
    %508 = math.tanh %507 : vector<8x32xf32>
    %509 = arith.mulf %504, %508 : vector<8x32xf32>
    %c32_139 = arith.constant 32 : index
    %c32_140 = arith.constant 32 : index
    %510 = vector.load %arg19[%c32_139, %c32_140] : memref<64x64xf32, #tpu.memory_space<vmem>>, vector<8x32xf32>
    tpu.vector_store %arg19[%c32_139, %c32_140], %509 {strides = array<i32>} : memref<64x64xf32, #tpu.memory_space<vmem>>, vector<8x32xf32>,
    %511 = vector.extract_strided_slice %347 {offsets = [32, 0], sizes = [8, 128], strides = [1, 1]} : vector<64x128xf32> to vector<8x128xf32>
    %cst_141 = arith.constant dense<0.000000e+00> : vector<8x128xf32>
    %512 = tpu.matmul %490, %353, %cst_141 {dimension_numbers = #tpu.dot_dimension_numbers<[1], [0], [0], [1], [0, 0, 1, 1], [], []>} : vector<8x32xf32>, vector<32x128xf32>, vector<8x128xf32> -> vector<8x128xf32>
    %513 = arith.addf %511, %512 : vector<8x128xf32>
    %514 = arith.negf %513 : vector<8x128xf32>
    %515 = math.exp %514 : vector<8x128xf32>
    %cst_142 = arith.constant 1.000000e+00 : f32
    %516 = vector.broadcast %cst_142 : f32 to vector<8x128xf32>
    %517 = arith.addf %516, %515 : vector<8x128xf32>
    %518 = arith.divf %516, %517 : vector<8x128xf32>
    %519 = math.tanh %513 : vector<8x128xf32>
    %520 = vector.extract_strided_slice %518 {offsets = [0, 0], sizes = [8, 32], strides = [1, 1]} : vector<8x128xf32> to vector<8x32xf32>
    %521 = vector.extract_strided_slice %518 {offsets = [0, 32], sizes = [8, 32], strides = [1, 1]} : vector<8x128xf32> to vector<8x32xf32>
    %522 = vector.extract_strided_slice %519 {offsets = [0, 64], sizes = [8, 32], strides = [1, 1]} : vector<8x128xf32> to vector<8x32xf32>
    %523 = vector.extract_strided_slice %518 {offsets = [0, 96], sizes = [8, 32], strides = [1, 1]} : vector<8x128xf32> to vector<8x32xf32>
    %524 = arith.mulf %521, %488 : vector<8x32xf32>
    %525 = arith.mulf %520, %522 : vector<8x32xf32>
    %526 = arith.addf %524, %525 : vector<8x32xf32>
    %527 = math.tanh %526 : vector<8x32xf32>
    %528 = arith.mulf %523, %527 : vector<8x32xf32>
    %c32_143 = arith.constant 32 : index
    %c0_144 = arith.constant 0 : index
    %529 = vector.load %arg19[%c32_143, %c0_144] : memref<64x64xf32, #tpu.memory_space<vmem>>, vector<8x32xf32>
    tpu.vector_store %arg19[%c32_143, %c0_144], %528 {strides = array<i32>} : memref<64x64xf32, #tpu.memory_space<vmem>>, vector<8x32xf32>,
    %530 = vector.extract_strided_slice %352 {offsets = [24, 0], sizes = [8, 128], strides = [1, 1]} : vector<64x128xf32> to vector<8x128xf32>
    %cst_145 = arith.constant dense<0.000000e+00> : vector<8x128xf32>
    %531 = tpu.matmul %509, %354, %cst_145 {dimension_numbers = #tpu.dot_dimension_numbers<[1], [0], [0], [1], [0, 0, 1, 1], [], []>} : vector<8x32xf32>, vector<32x128xf32>, vector<8x128xf32> -> vector<8x128xf32>
    %532 = arith.addf %530, %531 : vector<8x128xf32>
    %533 = arith.negf %532 : vector<8x128xf32>
    %534 = math.exp %533 : vector<8x128xf32>
    %cst_146 = arith.constant 1.000000e+00 : f32
    %535 = vector.broadcast %cst_146 : f32 to vector<8x128xf32>
    %536 = arith.addf %535, %534 : vector<8x128xf32>
    %537 = arith.divf %535, %536 : vector<8x128xf32>
    %538 = math.tanh %532 : vector<8x128xf32>
    %539 = vector.extract_strided_slice %537 {offsets = [0, 0], sizes = [8, 32], strides = [1, 1]} : vector<8x128xf32> to vector<8x32xf32>
    %540 = vector.extract_strided_slice %537 {offsets = [0, 32], sizes = [8, 32], strides = [1, 1]} : vector<8x128xf32> to vector<8x32xf32>
    %541 = vector.extract_strided_slice %538 {offsets = [0, 64], sizes = [8, 32], strides = [1, 1]} : vector<8x128xf32> to vector<8x32xf32>
    %542 = vector.extract_strided_slice %537 {offsets = [0, 96], sizes = [8, 32], strides = [1, 1]} : vector<8x128xf32> to vector<8x32xf32>
    %543 = arith.mulf %540, %507 : vector<8x32xf32>
    %544 = arith.mulf %539, %541 : vector<8x32xf32>
    %545 = arith.addf %543, %544 : vector<8x32xf32>
    %546 = math.tanh %545 : vector<8x32xf32>
    %547 = arith.mulf %542, %546 : vector<8x32xf32>
    %c24_147 = arith.constant 24 : index
    %c32_148 = arith.constant 32 : index
    %548 = vector.load %arg19[%c24_147, %c32_148] : memref<64x64xf32, #tpu.memory_space<vmem>>, vector<8x32xf32>
    tpu.vector_store %arg19[%c24_147, %c32_148], %547 {strides = array<i32>} : memref<64x64xf32, #tpu.memory_space<vmem>>, vector<8x32xf32>,
    %549 = vector.extract_strided_slice %347 {offsets = [40, 0], sizes = [8, 128], strides = [1, 1]} : vector<64x128xf32> to vector<8x128xf32>
    %cst_149 = arith.constant dense<0.000000e+00> : vector<8x128xf32>
    %550 = tpu.matmul %528, %353, %cst_149 {dimension_numbers = #tpu.dot_dimension_numbers<[1], [0], [0], [1], [0, 0, 1, 1], [], []>} : vector<8x32xf32>, vector<32x128xf32>, vector<8x128xf32> -> vector<8x128xf32>
    %551 = arith.addf %549, %550 : vector<8x128xf32>
    %552 = arith.negf %551 : vector<8x128xf32>
    %553 = math.exp %552 : vector<8x128xf32>
    %cst_150 = arith.constant 1.000000e+00 : f32
    %554 = vector.broadcast %cst_150 : f32 to vector<8x128xf32>
    %555 = arith.addf %554, %553 : vector<8x128xf32>
    %556 = arith.divf %554, %555 : vector<8x128xf32>
    %557 = math.tanh %551 : vector<8x128xf32>
    %558 = vector.extract_strided_slice %556 {offsets = [0, 0], sizes = [8, 32], strides = [1, 1]} : vector<8x128xf32> to vector<8x32xf32>
    %559 = vector.extract_strided_slice %556 {offsets = [0, 32], sizes = [8, 32], strides = [1, 1]} : vector<8x128xf32> to vector<8x32xf32>
    %560 = vector.extract_strided_slice %557 {offsets = [0, 64], sizes = [8, 32], strides = [1, 1]} : vector<8x128xf32> to vector<8x32xf32>
    %561 = vector.extract_strided_slice %556 {offsets = [0, 96], sizes = [8, 32], strides = [1, 1]} : vector<8x128xf32> to vector<8x32xf32>
    %562 = arith.mulf %559, %526 : vector<8x32xf32>
    %563 = arith.mulf %558, %560 : vector<8x32xf32>
    %564 = arith.addf %562, %563 : vector<8x32xf32>
    %565 = math.tanh %564 : vector<8x32xf32>
    %566 = arith.mulf %561, %565 : vector<8x32xf32>
    %c40_151 = arith.constant 40 : index
    %c0_152 = arith.constant 0 : index
    %567 = vector.load %arg19[%c40_151, %c0_152] : memref<64x64xf32, #tpu.memory_space<vmem>>, vector<8x32xf32>
    tpu.vector_store %arg19[%c40_151, %c0_152], %566 {strides = array<i32>} : memref<64x64xf32, #tpu.memory_space<vmem>>, vector<8x32xf32>,
    %568 = vector.extract_strided_slice %352 {offsets = [16, 0], sizes = [8, 128], strides = [1, 1]} : vector<64x128xf32> to vector<8x128xf32>
    %cst_153 = arith.constant dense<0.000000e+00> : vector<8x128xf32>
    %569 = tpu.matmul %547, %354, %cst_153 {dimension_numbers = #tpu.dot_dimension_numbers<[1], [0], [0], [1], [0, 0, 1, 1], [], []>} : vector<8x32xf32>, vector<32x128xf32>, vector<8x128xf32> -> vector<8x128xf32>
    %570 = arith.addf %568, %569 : vector<8x128xf32>
    %571 = arith.negf %570 : vector<8x128xf32>
    %572 = math.exp %571 : vector<8x128xf32>
    %cst_154 = arith.constant 1.000000e+00 : f32
    %573 = vector.broadcast %cst_154 : f32 to vector<8x128xf32>
    %574 = arith.addf %573, %572 : vector<8x128xf32>
    %575 = arith.divf %573, %574 : vector<8x128xf32>
    %576 = math.tanh %570 : vector<8x128xf32>
    %577 = vector.extract_strided_slice %575 {offsets = [0, 0], sizes = [8, 32], strides = [1, 1]} : vector<8x128xf32> to vector<8x32xf32>
    %578 = vector.extract_strided_slice %575 {offsets = [0, 32], sizes = [8, 32], strides = [1, 1]} : vector<8x128xf32> to vector<8x32xf32>
    %579 = vector.extract_strided_slice %576 {offsets = [0, 64], sizes = [8, 32], strides = [1, 1]} : vector<8x128xf32> to vector<8x32xf32>
    %580 = vector.extract_strided_slice %575 {offsets = [0, 96], sizes = [8, 32], strides = [1, 1]} : vector<8x128xf32> to vector<8x32xf32>
    %581 = arith.mulf %578, %545 : vector<8x32xf32>
    %582 = arith.mulf %577, %579 : vector<8x32xf32>
    %583 = arith.addf %581, %582 : vector<8x32xf32>
    %584 = math.tanh %583 : vector<8x32xf32>
    %585 = arith.mulf %580, %584 : vector<8x32xf32>
    %c16_155 = arith.constant 16 : index
    %c32_156 = arith.constant 32 : index
    %586 = vector.load %arg19[%c16_155, %c32_156] : memref<64x64xf32, #tpu.memory_space<vmem>>, vector<8x32xf32>
    tpu.vector_store %arg19[%c16_155, %c32_156], %585 {strides = array<i32>} : memref<64x64xf32, #tpu.memory_space<vmem>>, vector<8x32xf32>,
    %587 = vector.extract_strided_slice %347 {offsets = [48, 0], sizes = [8, 128], strides = [1, 1]} : vector<64x128xf32> to vector<8x128xf32>
    %cst_157 = arith.constant dense<0.000000e+00> : vector<8x128xf32>
    %588 = tpu.matmul %566, %353, %cst_157 {dimension_numbers = #tpu.dot_dimension_numbers<[1], [0], [0], [1], [0, 0, 1, 1], [], []>} : vector<8x32xf32>, vector<32x128xf32>, vector<8x128xf32> -> vector<8x128xf32>
    %589 = arith.addf %587, %588 : vector<8x128xf32>
    %590 = arith.negf %589 : vector<8x128xf32>
    %591 = math.exp %590 : vector<8x128xf32>
    %cst_158 = arith.constant 1.000000e+00 : f32
    %592 = vector.broadcast %cst_158 : f32 to vector<8x128xf32>
    %593 = arith.addf %592, %591 : vector<8x128xf32>
    %594 = arith.divf %592, %593 : vector<8x128xf32>
    %595 = math.tanh %589 : vector<8x128xf32>
    %596 = vector.extract_strided_slice %594 {offsets = [0, 0], sizes = [8, 32], strides = [1, 1]} : vector<8x128xf32> to vector<8x32xf32>
    %597 = vector.extract_strided_slice %594 {offsets = [0, 32], sizes = [8, 32], strides = [1, 1]} : vector<8x128xf32> to vector<8x32xf32>
    %598 = vector.extract_strided_slice %595 {offsets = [0, 64], sizes = [8, 32], strides = [1, 1]} : vector<8x128xf32> to vector<8x32xf32>
    %599 = vector.extract_strided_slice %594 {offsets = [0, 96], sizes = [8, 32], strides = [1, 1]} : vector<8x128xf32> to vector<8x32xf32>
    %600 = arith.mulf %597, %564 : vector<8x32xf32>
    %601 = arith.mulf %596, %598 : vector<8x32xf32>
    %602 = arith.addf %600, %601 : vector<8x32xf32>
    %603 = math.tanh %602 : vector<8x32xf32>
    %604 = arith.mulf %599, %603 : vector<8x32xf32>
    %c48_159 = arith.constant 48 : index
    %c0_160 = arith.constant 0 : index
    %605 = vector.load %arg19[%c48_159, %c0_160] : memref<64x64xf32, #tpu.memory_space<vmem>>, vector<8x32xf32>
    tpu.vector_store %arg19[%c48_159, %c0_160], %604 {strides = array<i32>} : memref<64x64xf32, #tpu.memory_space<vmem>>, vector<8x32xf32>,
    %606 = vector.extract_strided_slice %352 {offsets = [8, 0], sizes = [8, 128], strides = [1, 1]} : vector<64x128xf32> to vector<8x128xf32>
    %cst_161 = arith.constant dense<0.000000e+00> : vector<8x128xf32>
    %607 = tpu.matmul %585, %354, %cst_161 {dimension_numbers = #tpu.dot_dimension_numbers<[1], [0], [0], [1], [0, 0, 1, 1], [], []>} : vector<8x32xf32>, vector<32x128xf32>, vector<8x128xf32> -> vector<8x128xf32>
    %608 = arith.addf %606, %607 : vector<8x128xf32>
    %609 = arith.negf %608 : vector<8x128xf32>
    %610 = math.exp %609 : vector<8x128xf32>
    %cst_162 = arith.constant 1.000000e+00 : f32
    %611 = vector.broadcast %cst_162 : f32 to vector<8x128xf32>
    %612 = arith.addf %611, %610 : vector<8x128xf32>
    %613 = arith.divf %611, %612 : vector<8x128xf32>
    %614 = math.tanh %608 : vector<8x128xf32>
    %615 = vector.extract_strided_slice %613 {offsets = [0, 0], sizes = [8, 32], strides = [1, 1]} : vector<8x128xf32> to vector<8x32xf32>
    %616 = vector.extract_strided_slice %613 {offsets = [0, 32], sizes = [8, 32], strides = [1, 1]} : vector<8x128xf32> to vector<8x32xf32>
    %617 = vector.extract_strided_slice %614 {offsets = [0, 64], sizes = [8, 32], strides = [1, 1]} : vector<8x128xf32> to vector<8x32xf32>
    %618 = vector.extract_strided_slice %613 {offsets = [0, 96], sizes = [8, 32], strides = [1, 1]} : vector<8x128xf32> to vector<8x32xf32>
    %619 = arith.mulf %616, %583 : vector<8x32xf32>
    %620 = arith.mulf %615, %617 : vector<8x32xf32>
    %621 = arith.addf %619, %620 : vector<8x32xf32>
    %622 = math.tanh %621 : vector<8x32xf32>
    %623 = arith.mulf %618, %622 : vector<8x32xf32>
    %c8_163 = arith.constant 8 : index
    %c32_164 = arith.constant 32 : index
    %624 = vector.load %arg19[%c8_163, %c32_164] : memref<64x64xf32, #tpu.memory_space<vmem>>, vector<8x32xf32>
    tpu.vector_store %arg19[%c8_163, %c32_164], %623 {strides = array<i32>} : memref<64x64xf32, #tpu.memory_space<vmem>>, vector<8x32xf32>,
    %625 = vector.extract_strided_slice %347 {offsets = [56, 0], sizes = [8, 128], strides = [1, 1]} : vector<64x128xf32> to vector<8x128xf32>
    %cst_165 = arith.constant dense<0.000000e+00> : vector<8x128xf32>
    %626 = tpu.matmul %604, %353, %cst_165 {dimension_numbers = #tpu.dot_dimension_numbers<[1], [0], [0], [1], [0, 0, 1, 1], [], []>} : vector<8x32xf32>, vector<32x128xf32>, vector<8x128xf32> -> vector<8x128xf32>
    %627 = arith.addf %625, %626 : vector<8x128xf32>
    %628 = arith.negf %627 : vector<8x128xf32>
    %629 = math.exp %628 : vector<8x128xf32>
    %cst_166 = arith.constant 1.000000e+00 : f32
    %630 = vector.broadcast %cst_166 : f32 to vector<8x128xf32>
    %631 = arith.addf %630, %629 : vector<8x128xf32>
    %632 = arith.divf %630, %631 : vector<8x128xf32>
    %633 = math.tanh %627 : vector<8x128xf32>
    %634 = vector.extract_strided_slice %632 {offsets = [0, 0], sizes = [8, 32], strides = [1, 1]} : vector<8x128xf32> to vector<8x32xf32>
    %635 = vector.extract_strided_slice %632 {offsets = [0, 32], sizes = [8, 32], strides = [1, 1]} : vector<8x128xf32> to vector<8x32xf32>
    %636 = vector.extract_strided_slice %633 {offsets = [0, 64], sizes = [8, 32], strides = [1, 1]} : vector<8x128xf32> to vector<8x32xf32>
    %637 = vector.extract_strided_slice %632 {offsets = [0, 96], sizes = [8, 32], strides = [1, 1]} : vector<8x128xf32> to vector<8x32xf32>
    %638 = arith.mulf %635, %602 : vector<8x32xf32>
    %639 = arith.mulf %634, %636 : vector<8x32xf32>
    %640 = arith.addf %638, %639 : vector<8x32xf32>
    %641 = math.tanh %640 : vector<8x32xf32>
    %642 = arith.mulf %637, %641 : vector<8x32xf32>
    %c56_167 = arith.constant 56 : index
    %c0_168 = arith.constant 0 : index
    %643 = vector.load %arg19[%c56_167, %c0_168] : memref<64x64xf32, #tpu.memory_space<vmem>>, vector<8x32xf32>
    tpu.vector_store %arg19[%c56_167, %c0_168], %642 {strides = array<i32>} : memref<64x64xf32, #tpu.memory_space<vmem>>, vector<8x32xf32>,
    %644 = vector.extract_strided_slice %352 {offsets = [0, 0], sizes = [8, 128], strides = [1, 1]} : vector<64x128xf32> to vector<8x128xf32>
    %cst_169 = arith.constant dense<0.000000e+00> : vector<8x128xf32>
    %645 = tpu.matmul %623, %354, %cst_169 {dimension_numbers = #tpu.dot_dimension_numbers<[1], [0], [0], [1], [0, 0, 1, 1], [], []>} : vector<8x32xf32>, vector<32x128xf32>, vector<8x128xf32> -> vector<8x128xf32>
    %646 = arith.addf %644, %645 : vector<8x128xf32>
    %647 = arith.negf %646 : vector<8x128xf32>
    %648 = math.exp %647 : vector<8x128xf32>
    %cst_170 = arith.constant 1.000000e+00 : f32
    %649 = vector.broadcast %cst_170 : f32 to vector<8x128xf32>
    %650 = arith.addf %649, %648 : vector<8x128xf32>
    %651 = arith.divf %649, %650 : vector<8x128xf32>
    %652 = math.tanh %646 : vector<8x128xf32>
    %653 = vector.extract_strided_slice %651 {offsets = [0, 0], sizes = [8, 32], strides = [1, 1]} : vector<8x128xf32> to vector<8x32xf32>
    %654 = vector.extract_strided_slice %651 {offsets = [0, 32], sizes = [8, 32], strides = [1, 1]} : vector<8x128xf32> to vector<8x32xf32>
    %655 = vector.extract_strided_slice %652 {offsets = [0, 64], sizes = [8, 32], strides = [1, 1]} : vector<8x128xf32> to vector<8x32xf32>
    %656 = vector.extract_strided_slice %651 {offsets = [0, 96], sizes = [8, 32], strides = [1, 1]} : vector<8x128xf32> to vector<8x32xf32>
    %657 = arith.mulf %654, %621 : vector<8x32xf32>
    %658 = arith.mulf %653, %655 : vector<8x32xf32>
    %659 = arith.addf %657, %658 : vector<8x32xf32>
    %660 = math.tanh %659 : vector<8x32xf32>
    %661 = arith.mulf %656, %660 : vector<8x32xf32>
    %c0_171 = arith.constant 0 : index
    %c32_172 = arith.constant 32 : index
    %662 = vector.load %arg19[%c0_171, %c32_172] : memref<64x64xf32, #tpu.memory_space<vmem>>, vector<8x32xf32>
    tpu.vector_store %arg19[%c0_171, %c32_172], %661 {strides = array<i32>} : memref<64x64xf32, #tpu.memory_space<vmem>>, vector<8x32xf32>,
    %c0_173 = arith.constant 0 : index
    %c0_174 = arith.constant 0 : index
    %663 = vector.load %arg19[%c0_173, %c0_174] : memref<64x64xf32, #tpu.memory_space<vmem>>, vector<64x64xf32>
    %c0_175 = arith.constant 0 : index
    %c0_176 = arith.constant 0 : index
    %664 = vector.load %arg16[%c0_175, %c0_176] : memref<64x3xf32, #tpu.memory_space<vmem>>, vector<64x3xf32>
    %cst_177 = arith.constant dense<0.000000e+00> : vector<64x3xf32>
    %665 = tpu.matmul %663, %664, %cst_177 {dimension_numbers = #tpu.dot_dimension_numbers<[1], [0], [0], [1], [0, 0, 1, 1], [], []>} : vector<64x64xf32>, vector<64x3xf32>, vector<64x3xf32> -> vector<64x3xf32>
    %c0_178 = arith.constant 0 : index
    %c0_179 = arith.constant 0 : index
    %666 = vector.load %arg17[%c0_178, %c0_179] : memref<1x3xf32, #tpu.memory_space<vmem>>, vector<1x3xf32>
    %667 = vector.broadcast %666 : vector<1x3xf32> to vector<64x3xf32>
    %668 = arith.addf %665, %667 : vector<64x3xf32>
    %669 = arith.negf %668 : vector<64x3xf32>
    %670 = math.exp %669 : vector<64x3xf32>
    %cst_180 = arith.constant 1.000000e+00 : f32
    %671 = vector.broadcast %cst_180 : f32 to vector<64x3xf32>
    %672 = arith.addf %671, %670 : vector<64x3xf32>
    %673 = arith.divf %671, %672 : vector<64x3xf32>
    %c0_181 = arith.constant 0 : index
    %c0_182 = arith.constant 0 : index
    %674 = vector.load %arg18[%c0_181, %c0_182] : memref<64x3xf32, #tpu.memory_space<vmem>>, vector<64x3xf32>
    tpu.vector_store %arg18[%c0_181, %c0_182], %673 {strides = array<i32>} : memref<64x3xf32, #tpu.memory_space<vmem>>, vector<64x3xf32>,
    return
  }
  func.func @transform_0(%arg0: i32) -> (i32, i32) {
    %c0_i32 = arith.constant 0 : i32
    %c0_i32_0 = arith.constant 0 : i32
    %c0_i32_1 = arith.constant 0 : i32
    return %c0_i32, %c0_i32_0 : i32, i32
  }
  func.func @transform_1(%arg0: i32) -> (i32, i32, i32) {
    %c0_i32 = arith.constant 0 : i32
    %c0_i32_0 = arith.constant 0 : i32
    %c0_i32_1 = arith.constant 0 : i32
    %c0_i32_2 = arith.constant 0 : i32
    return %c0_i32, %c0_i32_0, %c0_i32_1 : i32, i32, i32
  }
  func.func @transform_2(%arg0: i32) -> (i32, i32) {
    %c0_i32 = arith.constant 0 : i32
    %c0_i32_0 = arith.constant 0 : i32
    %c0_i32_1 = arith.constant 0 : i32
    return %c0_i32, %c0_i32_0 : i32, i32
  }
  func.func @transform_3(%arg0: i32) -> (i32, i32) {
    %c0_i32 = arith.constant 0 : i32
    %c0_i32_0 = arith.constant 0 : i32
    %c0_i32_1 = arith.constant 0 : i32
    return %c0_i32, %c0_i32_0 : i32, i32
  }
  func.func @transform_4(%arg0: i32) -> (i32, i32) {
    %c0_i32 = arith.constant 0 : i32
    %c0_i32_0 = arith.constant 0 : i32
    %c0_i32_1 = arith.constant 0 : i32
    return %c0_i32, %c0_i32_0 : i32, i32
  }
  func.func @transform_5(%arg0: i32) -> (i32, i32) {
    %c0_i32 = arith.constant 0 : i32
    %c0_i32_0 = arith.constant 0 : i32
    %c0_i32_1 = arith.constant 0 : i32
    return %c0_i32, %c0_i32_0 : i32, i32
  }
  func.func @transform_6(%arg0: i32) -> (i32, i32) {
    %c0_i32 = arith.constant 0 : i32
    %c0_i32_0 = arith.constant 0 : i32
    %c0_i32_1 = arith.constant 0 : i32
    return %c0_i32, %c0_i32_0 : i32, i32
  }
  func.func @transform_7(%arg0: i32) -> (i32, i32) {
    %c0_i32 = arith.constant 0 : i32
    %c0_i32_0 = arith.constant 0 : i32
    %c0_i32_1 = arith.constant 0 : i32
    return %c0_i32, %c0_i32_0 : i32, i32
  }
  func.func @transform_8(%arg0: i32) -> (i32, i32) {
    %c0_i32 = arith.constant 0 : i32
    %c0_i32_0 = arith.constant 0 : i32
    %c0_i32_1 = arith.constant 0 : i32
    return %c0_i32, %c0_i32_0 : i32, i32
  }
  func.func @transform_9(%arg0: i32) -> (i32, i32) {
    %c0_i32 = arith.constant 0 : i32
    %c0_i32_0 = arith.constant 0 : i32
    %c0_i32_1 = arith.constant 0 : i32
    return %c0_i32, %c0_i32_0 : i32, i32
  }
  func.func @transform_10(%arg0: i32) -> (i32, i32) {
    %c0_i32 = arith.constant 0 : i32
    %c0_i32_0 = arith.constant 0 : i32
    %c0_i32_1 = arith.constant 0 : i32
    return %c0_i32, %c0_i32_0 : i32, i32
  }
  func.func @transform_11(%arg0: i32) -> (i32, i32) {
    %c0_i32 = arith.constant 0 : i32
    %c0_i32_0 = arith.constant 0 : i32
    %c0_i32_1 = arith.constant 0 : i32
    return %c0_i32, %c0_i32_0 : i32, i32
  }
  func.func @transform_12(%arg0: i32) -> (i32, i32) {
    %c0_i32 = arith.constant 0 : i32
    %c0_i32_0 = arith.constant 0 : i32
    %c0_i32_1 = arith.constant 0 : i32
    return %c0_i32, %c0_i32_0 : i32, i32
  }
  func.func @transform_13(%arg0: i32) -> (i32, i32) {
    %c0_i32 = arith.constant 0 : i32
    %c0_i32_0 = arith.constant 0 : i32
    %c0_i32_1 = arith.constant 0 : i32
    return %c0_i32, %c0_i32_0 : i32, i32
  }
  func.func @transform_14(%arg0: i32) -> (i32, i32) {
    %c0_i32 = arith.constant 0 : i32
    %c0_i32_0 = arith.constant 0 : i32
    %c0_i32_1 = arith.constant 0 : i32
    return %c0_i32, %c0_i32_0 : i32, i32
  }
  func.func @transform_15(%arg0: i32) -> (i32, i32) {
    %c0_i32 = arith.constant 0 : i32
    %c0_i32_0 = arith.constant 0 : i32
    %c0_i32_1 = arith.constant 0 : i32
    return %c0_i32, %c0_i32_0 : i32, i32
  }
  func.func @transform_16(%arg0: i32) -> (i32, i32) {
    %c0_i32 = arith.constant 0 : i32
    %c0_i32_0 = arith.constant 0 : i32
    %c0_i32_1 = arith.constant 0 : i32
    return %c0_i32, %c0_i32_0 : i32, i32
  }
  func.func @transform_17(%arg0: i32) -> (i32, i32) {
    %c0_i32 = arith.constant 0 : i32
    %c0_i32_0 = arith.constant 0 : i32
    %c0_i32_1 = arith.constant 0 : i32
    return %c0_i32, %c0_i32_0 : i32, i32
  }
}

</mosaic_0001>

<bundles_post_ra>
// kernel: _lambda_.1
= control target key start
LH: loop header
LB: loop body
LE: loop exit
PB: predicated region body
PF: predicated region fallthrough
CT: control target
= control target key end

     0   :  { %s7445_s0 = inlined_call_operand.vmem [shape: f32[80,4], index: 0, kind: input, shape index: {}]   ;;  %s7446_s1 = inlined_call_operand.hbm [shape: f32[3,4,64], index: 1, kind: input, shape index: {}]   ;;  %s7447_s2 = inlined_call_operand.hbm [shape: f32[1,64], index: 2, kind: input, shape index: {}]   ;;  %s7448_s3 = inlined_call_operand.hbm [shape: f32[64,128], index: 3, kind: input, shape index: {}]   ;;  %s7449_s4 = inlined_call_operand.hbm [shape: f32[32,128], index: 4, kind: input, shape index: {}]   ;;  %s7450_s5 = inlined_call_operand.hbm [shape: f32[1,128], index: 5, kind: input, shape index: {}]   ;;  %s7451_s6 = inlined_call_operand.hbm [shape: f32[64,128], index: 6, kind: input, shape index: {}]   ;;  %s7452_s7 = inlined_call_operand.hbm [shape: f32[32,128], index: 7, kind: input, shape index: {}]   ;;  %s7453_s8 = inlined_call_operand.hbm [shape: f32[1,128], index: 8, kind: input, shape index: {}]   ;;  %s7454_s9 = inlined_call_operand.hbm [shape: f32[64,128], index: 9, kind: input, shape index: {}]   ;;  %s7455_s10 = inlined_call_operand.vmem [shape: f32[32,128], index: 10, kind: input, shape index: {}]   ;;  %s7456_s11 = inlined_call_operand.vmem [shape: f32[1,128], index: 11, kind: input, shape index: {}]   ;;  %s7457_s12 = inlined_call_operand.vmem [shape: f32[64,128], index: 12, kind: input, shape index: {}]   ;;  %s7458_s13 = inlined_call_operand.vmem [shape: f32[32,128], index: 13, kind: input, shape index: {}]   ;;  %s7459_s14 = inlined_call_operand.vmem [shape: f32[1,128], index: 14, kind: input, shape index: {}]   ;;  %s7460_s15 = inlined_call_operand.vmem [shape: f32[64,3], index: 15, kind: input, shape index: {}]   ;;  %s7461_s16 = inlined_call_operand.vmem [shape: f32[1,3], index: 16, kind: input, shape index: {}]   ;;  %s7462_s17 = inlined_call_operand.vmem [shape: f32[64,3], index: 17, kind: output, shape index: {}]  }
   0x1   :  { %7465 = sst [smem:[#allocation22_spill]] %s7445_s0 }
   0x2   :  { %7466 = sst [smem:[#allocation23_spill]] %s7446_s1 }
   0x3   :  { %22 = vsyncpa [#allocation4], 0 }
   0x4   :  { %23 = vsyncpa [#allocation6], 0 }
   0x5   :  { %24 = vsyncpa [#allocation9], 0 }
   0x6   :  { %25 = vsyncpa [#allocation12], 0 }
   0x7   :  { %26 = vsyncpa [#allocation15], 0  ;;  %s6402_s24 = smov [#allocation5]   ;;  %s6194_s28 = scalar_lea.hbm %s7447_s2, 16 }
   0x8   :  { %s47_s25 = sshll.u32 %s6402_s24, 4  ;;  %p6195_p0 = scmp.ne.s32.totalorder %s7447_s2, %s6194_s28  ;;  %s48_s25 = int_to_ptr.vmem [resolvable:$true] %s47_s25 }
   0x9   :  { %p6198_p1 = scmp.lt.u32.totalorder %s6194_s28, %s7447_s2 }
   0xb   :  { %p6200_p2 = pnand %p6198_p1, %p6195_p0 }
   0xd   :  { %6203 = shalt.err (!%p6200_p2)
}
   0xe   :  { %s6204_s19 = scalar_lea.vmem %s48_s25, 16  ;;  %s6208_s1 = scalar_lea.vmem %s48_s25, 32 }
   0xf   :  { %p6205_p3 = scmp.ne.s32.totalorder %s48_s25, %s6204_s19  ;;  %p6209_p4 = scmp.lt.s32.totalorder %s48_s25, %s48_s25 }
  0x10   :  { %p6210_p5 = scmp.lt.s32.totalorder %s6208_s1, %s6204_s19 }
  0x12   :  { %p6211_p6 = por %p6210_p5, %p6209_p4 }
  0x14   :  { %p6212_p7 = pnand %p6211_p6, %p6205_p3 }
  0x16   :  { %6215 = shalt.err (!%p6212_p7)
}
  0x17   :  { %50 = dma.hbm_to_vmem [thread:$0]  %s7447_s2, 16, %s48_s25, [#allocation6]  }
  0x18   :  { %s6403_s22 = smov [#allocation8]   ;;  %s6404_s24 = smov [#allocation11]  }
  0x19   :  { %s68_s23 = sshll.u32 %s6403_s22, 4  ;;  %s90_s26 = sshll.u32 %s6404_s24, 4  ;;  %s69_s23 = int_to_ptr.vmem [resolvable:$true] %s68_s23  ;;  %s91_s26 = int_to_ptr.vmem [resolvable:$true] %s90_s26 }
  0x1a   :  { %s6216_s29 = scalar_lea.hbm %s7449_s4, 512 }
  0x1b   :  { %p6217_p8 = scmp.ne.s32.totalorder %s7449_s4, %s6216_s29  ;;  %p6220_p9 = scmp.lt.u32.totalorder %s6216_s29, %s7449_s4 }
  0x1d   :  { %p6222_p10 = pnand %p6220_p9, %p6217_p8 }
  0x1f   :  { %6225 = shalt.err (!%p6222_p10)
}
  0x20   :  { %s6226_s2 = scalar_lea.vmem %s69_s23, 512  ;;  %p6231_p12 = scmp.lt.s32.totalorder %s69_s23, %s69_s23 }
  0x21   :  { %p6227_p11 = scmp.ne.s32.totalorder %s69_s23, %s6226_s2  ;;  %p6232_p13 = scmp.lt.s32.totalorder %s6226_s2, %s6226_s2 }
  0x23   :  { %p6233_p0 = por %p6232_p13, %p6231_p12 }
  0x25   :  { %p6234_p1 = pnand %p6233_p0, %p6227_p11 }
  0x27   :  { %6237 = shalt.err (!%p6234_p1)
}
  0x28   :  { %s6405_s25 = smov 128   ;;  %s6406_s1 = smov 8  }
  0x29   :  { %74 = dma.hbm_to_vmem [thread:$0]  %s7449_s4, 512, %s69_s23, [#allocation9], %s6405_s25, %s6405_s25, %s6406_s1  }
  0x2a   :  { %s6238_s27 = scalar_lea.hbm %s7451_s6, 1024 }
  0x2b   :  { %p6239_p2 = scmp.ne.s32.totalorder %s7451_s6, %s6238_s27  ;;  %p6242_p3 = scmp.lt.u32.totalorder %s6238_s27, %s7451_s6 }
  0x2d   :  { %p6244_p4 = pnand %p6242_p3, %p6239_p2 }
  0x2f   :  { %6247 = shalt.err (!%p6244_p4)
}
  0x30   :  { %s6248_s18 = scalar_lea.vmem %s91_s26, 1024  ;;  %p6253_p6 = scmp.lt.s32.totalorder %s91_s26, %s91_s26 }
  0x31   :  { %p6249_p5 = scmp.ne.s32.totalorder %s91_s26, %s6248_s18  ;;  %p6254_p7 = scmp.lt.s32.totalorder %s6248_s18, %s6248_s18 }
  0x33   :  { %p6255_p8 = por %p6254_p7, %p6253_p6 }
  0x35   :  { %p6256_p9 = pnand %p6255_p8, %p6249_p5 }
  0x37   :  { %6259 = shalt.err (!%p6256_p9)
}
  0x38   :  { %96 = dma.hbm_to_vmem [thread:$0]  %s7451_s6, 1024, %s91_s26, [#allocation12], %s6405_s25, %s6405_s25, %s6406_s1  }
  0x39   :  { %s6407_s19 = smov [#allocation14]   ;;  %s6408_s20 = smov [#allocation3]  }
  0x3a   :  { %s115_s2 = sshll.u32 %s6407_s19, 4  ;;  %s34_s21 = sshll.u32 %s6408_s20, 4  ;;  %s116_s2 = int_to_ptr.vmem [resolvable:$true] %s115_s2  ;;  %s35_s21 = int_to_ptr.vmem [resolvable:$true] %s34_s21 }
  0x3b   :  { %s6260_s27 = scalar_lea.hbm %s7453_s8, 16 }
  0x3c   :  { %p6261_p10 = scmp.ne.s32.totalorder %s7453_s8, %s6260_s27  ;;  %p6264_p11 = scmp.lt.u32.totalorder %s6260_s27, %s7453_s8 }
  0x3e   :  { %p6266_p12 = pnand %p6264_p11, %p6261_p10 }
  0x40   :  { %6269 = shalt.err (!%p6266_p12)
}
  0x41   :  { %s6270_s6 = scalar_lea.vmem %s116_s2, 16  ;;  %s6274_s26 = scalar_lea.vmem %s116_s2, 32 }
  0x42   :  { %p6271_p13 = scmp.ne.s32.totalorder %s116_s2, %s6270_s6  ;;  %p6275_p0 = scmp.lt.s32.totalorder %s116_s2, %s116_s2 }
  0x43   :  { %p6276_p1 = scmp.lt.s32.totalorder %s6274_s26, %s6270_s6 }
  0x45   :  { %p6277_p2 = por %p6276_p1, %p6275_p0 }
  0x47   :  { %p6278_p3 = pnand %p6277_p2, %p6271_p13 }
  0x49   :  { %6281 = shalt.err (!%p6278_p3)
}
  0x4a   :  { %118 = dma.hbm_to_vmem [thread:$0]  %s7453_s8, 16, %s116_s2, [#allocation15]  }
  0x4b   :  { %s7467_s20 = sld [smem:[#allocation23_spill]] }
  0x51   :  { %s6282_s22 = scalar_lea.hbm %s7467_s20, 192 }
  0x52   :  { %p6283_p4 = scmp.ne.s32.totalorder %s7467_s20, %s6282_s22  ;;  %p6286_p5 = scmp.lt.u32.totalorder %s6282_s22, %s7467_s20 }
  0x54   :  { %p6288_p6 = pnand %p6286_p5, %p6283_p4 }
  0x56   :  { %6291 = shalt.err (!%p6288_p6)
}
  0x57   :  { %s6292_s0 = scalar_lea.vmem %s35_s21, 192  ;;  %p6297_p8 = scmp.lt.s32.totalorder %s35_s21, %s35_s21 }
  0x58   :  { %p6293_p7 = scmp.ne.s32.totalorder %s35_s21, %s6292_s0  ;;  %p6298_p9 = scmp.lt.s32.totalorder %s6292_s0, %s6292_s0 }
  0x5a   :  { %p6299_p10 = por %p6298_p9, %p6297_p8 }
  0x5c   :  { %p6300_p11 = pnand %p6299_p10, %p6293_p7 }
  0x5e   :  { %6303 = shalt.err (!%p6300_p11)
}
  0x5f   :  { %s6409_s8 = smov 64   ;;  %s6410_s2 = smov 4  }
  0x60   :  { %40 = dma.hbm_to_vmem [thread:$0]  %s7467_s20, 192, %s35_s21, [#allocation4], %s6409_s8, %s6409_s8, %s6410_s2  }
  0x61   :  { %s6411_s26 = smov [#allocation7]   ;;  %s6412_s4 = smov [#allocation10]  }
  0x62   :  { %s56_s18 = sshll.u32 %s6411_s26, 4  ;;  %s81_s23 = sshll.u32 %s6412_s4, 4  ;;  %s57_s18 = int_to_ptr.vmem [resolvable:$true] %s56_s18  ;;  %s82_s23 = int_to_ptr.vmem [resolvable:$true] %s81_s23 }
  0x63   :  { %s6304_s24 = scalar_lea.hbm %s7448_s3, 1024 }
  0x64   :  { %p6305_p12 = scmp.ne.s32.totalorder %s7448_s3, %s6304_s24  ;;  %p6308_p13 = scmp.lt.u32.totalorder %s6304_s24, %s7448_s3 }
  0x66   :  { %p6310_p0 = pnand %p6308_p13, %p6305_p12 }
  0x68   :  { %6313 = shalt.err (!%p6310_p0)
}
  0x69   :  { %s6314_s21 = scalar_lea.vmem %s57_s18, 1024  ;;  %p6319_p2 = scmp.lt.s32.totalorder %s57_s18, %s57_s18 }
  0x6a   :  { %p6315_p1 = scmp.ne.s32.totalorder %s57_s18, %s6314_s21  ;;  %p6320_p3 = scmp.lt.s32.totalorder %s6314_s21, %s6314_s21 }
  0x6c   :  { %p6321_p4 = por %p6320_p3, %p6319_p2 }
  0x6e   :  { %p6322_p5 = pnand %p6321_p4, %p6315_p1 }
  0x70   :  { %6325 = shalt.err (!%p6322_p5)
}
  0x71   :  { %62 = dma.hbm_to_vmem [thread:$0]  %s7448_s3, 1024, %s57_s18, [#allocation6], %s6405_s25, %s6405_s25, %s6406_s1  }
  0x72   :  { %s6326_s26 = scalar_lea.hbm %s7450_s5, 16 }
  0x73   :  { %p6327_p6 = scmp.ne.s32.totalorder %s7450_s5, %s6326_s26  ;;  %p6330_p7 = scmp.lt.u32.totalorder %s6326_s26, %s7450_s5 }
  0x75   :  { %p6332_p8 = pnand %p6330_p7, %p6327_p6 }
  0x77   :  { %6335 = shalt.err (!%p6332_p8)
}
  0x78   :  { %s6336_s27 = scalar_lea.vmem %s82_s23, 16  ;;  %s6340_s28 = scalar_lea.vmem %s82_s23, 32 }
  0x79   :  { %p6337_p9 = scmp.ne.s32.totalorder %s82_s23, %s6336_s27  ;;  %p6341_p10 = scmp.lt.s32.totalorder %s82_s23, %s82_s23 }
  0x7a   :  { %p6342_p11 = scmp.lt.s32.totalorder %s6340_s28, %s6336_s27 }
  0x7c   :  { %p6343_p12 = por %p6342_p11, %p6341_p10 }
  0x7e   :  { %p6344_p13 = pnand %p6343_p12, %p6337_p9 }
  0x80   :  { %6347 = shalt.err (!%p6344_p13)
}
  0x81   :  { %84 = dma.hbm_to_vmem [thread:$0]  %s7450_s5, 16, %s82_s23, [#allocation9]  }
  0x82   :  { %s6413_s29 = smov [#allocation13]   ;;  %s6414_s21 = smov [#allocation16]  }
  0x83   :  { %s102_s0 = sshll.u32 %s6413_s29, 4  ;;  %s124_s20 = sshll.u32 %s6414_s21, 4  ;;  %s103_s0 = int_to_ptr.vmem [resolvable:$true] %s102_s0  ;;  %s125_s20 = int_to_ptr.vmem [resolvable:$true] %s124_s20 }
  0x84   :  { %s6348_s6 = scalar_lea.hbm %s7452_s7, 512 }
  0x85   :  { %p6349_p0 = scmp.ne.s32.totalorder %s7452_s7, %s6348_s6  ;;  %p6352_p1 = scmp.lt.u32.totalorder %s6348_s6, %s7452_s7 }
  0x87   :  { %p6354_p2 = pnand %p6352_p1, %p6349_p0 }
  0x89   :  { %6357 = shalt.err (!%p6354_p2)
}
  0x8a   :  { %s6358_s5 = scalar_lea.vmem %s103_s0, 512  ;;  %p6363_p4 = scmp.lt.s32.totalorder %s103_s0, %s103_s0 }
  0x8b   :  { %p6359_p3 = scmp.ne.s32.totalorder %s103_s0, %s6358_s5  ;;  %p6364_p5 = scmp.lt.s32.totalorder %s6358_s5, %s6358_s5 }
  0x8d   :  { %p6365_p6 = por %p6364_p5, %p6363_p4 }
  0x8f   :  { %p6366_p7 = pnand %p6365_p6, %p6359_p3 }
  0x91   :  { %6369 = shalt.err (!%p6366_p7)
}
  0x92   :  { %108 = dma.hbm_to_vmem [thread:$0]  %s7452_s7, 512, %s103_s0, [#allocation12], %s6405_s25, %s6405_s25, %s6406_s1  }
  0x93   :  { %s6370_s3 = scalar_lea.hbm %s7454_s9, 1024 }
  0x94   :  { %p6371_p8 = scmp.ne.s32.totalorder %s7454_s9, %s6370_s3  ;;  %p6374_p9 = scmp.lt.u32.totalorder %s6370_s3, %s7454_s9 }
  0x96   :  { %p6376_p10 = pnand %p6374_p9, %p6371_p8 }
  0x98   :  { %6379 = shalt.err (!%p6376_p10)
}
  0x99   :  { %s6380_s30 = scalar_lea.vmem %s125_s20, 1024  ;;  %p6385_p12 = scmp.lt.s32.totalorder %s125_s20, %s125_s20 }
  0x9a   :  { %p6381_p11 = scmp.ne.s32.totalorder %s125_s20, %s6380_s30  ;;  %p6386_p13 = scmp.lt.s32.totalorder %s6380_s30, %s6380_s30 }
  0x9c   :  { %p6387_p0 = por %p6386_p13, %p6385_p12 }
  0x9e   :  { %p6388_p1 = pnand %p6387_p0, %p6381_p11 }
  0xa0   :  { %6391 = shalt.err (!%p6388_p1)
}
  0xa1   :  { %130 = dma.hbm_to_vmem [thread:$0]  %s7454_s9, 1024, %s125_s20, [#allocation15], %s6405_s25, %s6405_s25, %s6406_s1  }
  0xa2   :  { %6392 = dma.done.wait [#allocation4], 192  }
  0xa3   :  { %6393 = vsyncadd [#allocation4], 4294967104 }
  0xa4   :  { %6394 = dma.done.wait [#allocation6], 1040  }
  0xa5   :  { %6395 = vsyncadd [#allocation6], 4294966256 }
  0xa6   :  { %6396 = dma.done.wait [#allocation9], 528  }
  0xa7   :  { %6397 = vsyncadd [#allocation9], 4294966768 }
  0xa8   :  { %6398 = dma.done.wait [#allocation12], 1536  }
  0xa9   :  { %6399 = vsyncadd [#allocation12], 4294965760 }
  0xaa   :  { %6400 = dma.done.wait [#allocation15], 1040  }
  0xab   :  { %6401 = vsyncadd [#allocation15], 4294966256  ;;  %vm216_vm0 = vcmask 1043456   ;;  %vm191_vm1 = vcmask 31744   ;;  %v334_v0 = vld [vmem:[#allocation3 + $0x4] sm:$0xf] }
  0xac   :  { %s7468_s4 = sld [smem:[#allocation22_spill]]  ;;  %5065 = vmatprep.subr.msk.mxu0 %vm216_vm0, %v334_v0  ;;  %v455_v3 = vld [vmem:[#allocation3 + $0x8] sm:$0xf]  ;;  %v190_v5 = vld [vmem:[#allocation3] sm:$0xf]  ;;  %v583_v8 = vld [vmem:[#allocation7] sm:$0xff] }
  0xad   :  { %5066 = vmatpush3.msk.msra.mxu0 %vm216_vm0, %v334_v0  ;;  %v584_v9 = vld [vmem:[#allocation7 + $0x8] sm:$0xff]  ;;  %5051 = vmatprep.subr.msk.mxu1 %vm216_vm0, %v190_v5  ;;  %v585_v15 = vld [vmem:[#allocation7 + $0x10] sm:$0xff]  ;;  %v586_v16 = vld [vmem:[#allocation7 + $0x18] sm:$0xff]  ;;  %v6415_v37 = vmov 0.0|0.0   ;;  %vm598_vm2 = vcmask 523264   ;;  %vm6416_vm3 = vmmov 0  }
  0xae   :  { %5079 = vmatprep.subr.msk.mxu0 %vm216_vm0, %v455_v3  ;;  %v5585_v11 = vpack.c.bf16 %v584_v9, %v583_v8  ;;  %5052 = vmatpush3.msk.msra.mxu1 %vm216_vm0, %v190_v5  ;;  %v5589_v17 = vpack.c.bf16 %v586_v16, %v585_v15  ;;  %v587_v19 = vld [vmem:[#allocation7 + $0x20] sm:$0xff]  ;;  %v588_v20 = vld [vmem:[#allocation7 + $0x28] sm:$0xff]  ;;  %v589_v25 = vld [vmem:[#allocation7 + $0x30] sm:$0xff]  ;;  %s6418_s0 = smov 32   ;;  %vm856_vm4 = vcmask 261120   ;;  %vm1059_vm5 = vcmask 523520  }
  0xaf   :  { %v728_v21 = vld [vmem:[#allocation11] sm:$0xff]  ;;  %v5593_v22 = vpack.c.bf16 %v588_v20, %v587_v19  ;;  %v729_v23 = vld [vmem:[#allocation11 + $0x8] sm:$0xff]  ;;  %v590_v26 = vld [vmem:[#allocation7 + $0x38] sm:$0xff]  ;;  %vm4625_vm6 = vcmask 23552  }
  0xb0   :  { %v5601_v24 = vpack.c.bf16 %v729_v23, %v728_v21  ;;  %v730_v27 = vld [vmem:[#allocation11 + $0x10] sm:$0xff]  ;;  %v5597_v28 = vpack.c.bf16 %v590_v26, %v589_v25  ;;  %v731_v29 = vld [vmem:[#allocation11 + $0x18] sm:$0xff]  ;;  %v732_v31 = vld [vmem:[#allocation11 + $0x20] sm:$0xff]  ;;  %v6417_v23 = vmov 0.0  }
  0xb1   :  { %v5605_v30 = vpack.c.bf16 %v731_v29, %v730_v27  ;;  %v733_v32 = vld [vmem:[#allocation11 + $0x28] sm:$0xff]  ;;  %v734_v34 = vld [vmem:[#allocation11 + $0x30] sm:$0xff]  ;;  %v735_v35 = vld [vmem:[#allocation11 + $0x38] sm:$0xff] }
  0xb2   :  { %v173_v1 = vld [vmem:[%s7468_s4 + $0x8] sm:$0xff]  ;;  %v174_v2 = vld [vmem:[%s7468_s4 + $0x10] sm:$0xff]  ;;  %v175_v4 = vld [vmem:[%s7468_s4 + $0x18] sm:$0xff]  ;;  %5857 = vmatprep.subr.bf16.mxu1 %v5601_v24  ;;  %v6694_v33 = vpack.c.bf16 %v733_v32, %v732_v31  ;;  %v6698_v36 = vpack.c.bf16 %v735_v35, %v734_v34 }
  0xb3   :  { %5067 = vmatprep.mubr.msk.f32.mxu0 %vm191_vm1, %v173_v1  ;;  %v172_v6 = vld [vmem:[%s7468_s4] sm:$0xff]  ;;  %v177_v10 = vld [vmem:[%s7468_s4 + $0x28] sm:$0xff]  ;;  %v178_v12 = vld [vmem:[%s7468_s4 + $0x30] sm:$0xff] }
  0xb4   :  { %5068 = vmatmul.mubr.msk.f32.vlgmr.msra.gmra.mrb[0].mxu0 %vm191_vm1, %v174_v2  ;;  %v176_v7 = vld [vmem:[%s7468_s4 + $0x20] sm:$0xff]  ;;  %5053 = vmatprep.mubr.msk.f32.mxu1 %vm191_vm1, %v172_v6  ;;  %v179_v13 = vld [vmem:[%s7468_s4 + $0x38] sm:$0xff]  ;;  %v181_v18 = vld [vmem:[%s7468_s4 + $0x48] sm:$0xff] }
  0xb5   :  { %5080 = vmatpush3.msk.msra.mxu0 %vm216_vm0, %v455_v3  ;;  %5070 = vmatprep.mubr.msk.f32.mxu0 %vm191_vm1, %v175_v4  ;;  %v180_v14 = vld [vmem:[%s7468_s4 + $0x40] sm:$0xff]  ;;  %v4643_v42 = vld [vmem:[#allocation5] ss:$0 sm:$0xff]  ;;  %v850_v16 = vld [vmem:[#allocation8 + $0x10] sm:$0xff] }
  0xb6   :  { %5054 = vmatmul.mubr.msk.f32.vlgmr.msra.gmra.mrb[0].mxu1 %vm191_vm1, %v173_v1  ;;  %5586 = vmatprep.subr.bf16.mxu0 %v5585_v11  ;;  %v848_v5 = vld [vmem:[#allocation8] sm:$0xff]  ;;  %v849_v6 = vld [vmem:[#allocation8 + $0x8] sm:$0xff]  ;;  %v854_v25 = vld [vmem:[#allocation13 + $0x10] sm:$0xff] }
  0xb7   :  { %5056 = vmatprep.mubr.msk.f32.mxu1 %vm191_vm1, %v174_v2  ;;  %5861 = vmatpush3.bf16.msra.mxu1 %v5601_v24  ;;  %v852_v21 = vld [vmem:[#allocation13] sm:$0xff]  ;;  %v855_v26 = vld [vmem:[#allocation13 + $0x18] sm:$0xff] }
  0xb8   :  { %5071 = vmatmul.mubr.msk.f32.gmra.mrb[2].mxu0 %vm191_vm1, %v176_v7  ;;  %5858 = vmatprep.subr.bf16.mxu1 %v5605_v30  ;;  %v6743_v27 = vpack.c.bf16 %v855_v26, %v854_v25 }
  0xb9   :  { %5073 = vmatprep.mubr.msk.f32.mxu0 %vm191_vm1, %v177_v10 }
  0xba   :  { %5057 = vmatmul.mubr.msk.f32.gmra.mrb[2].mxu1 %vm191_vm1, %v175_v4 }
  0xbb   :  { %5059 = vmatprep.mubr.msk.f32.mxu1 %vm191_vm1, %v176_v7  ;;  %5862 = vmatpush3.bf16.msra.mxu1 %v5605_v30 }
  0xbc   :  { %5074 = vmatmul.mubr.msk.f32.gmra.mrb[4].mxu0 %vm191_vm1, %v178_v12  ;;  %5859 = vmatprep.subr.bf16.mxu1 %v6694_v33 }
  0xbd   :  { %5076 = vmatprep.mubr.msk.f32.mxu0 %vm191_vm1, %v179_v13 }
  0xbe   :  { %5060 = vmatmul.mubr.msk.f32.gmra.mrb[4].mxu1 %vm191_vm1, %v177_v10 }
  0xbf   :  { %5062 = vmatprep.mubr.msk.f32.mxu1 %vm191_vm1, %v178_v12  ;;  %5863 = vmatpush3.bf16.msra.mxu1 %v6694_v33 }
  0xc0   :  { %5077 = vmatmul.mubr.msk.f32.gmra.mrb[6].mxu0 %vm191_vm1, %v180_v14  ;;  %5860 = vmatprep.subr.bf16.mxu1 %v6698_v36 }
  0xc1   :  { %5081 = vmatprep.mubr.msk.f32.mxu0 %vm191_vm1, %v174_v2 }
  0xc2   :  { %5063 = vmatmul.mubr.msk.f32.gmra.mrb[6].mxu1 %vm191_vm1, %v179_v13 }
  0xc3   :  { %5864 = vmatpush3.bf16.msra.mxu1 %v6698_v36 }
  0xc4   :  { %5082 = vmatmul.mubr.msk.f32.vlgmr.msra.gmra.mrb[0].mxu0 %vm191_vm1, %v175_v4  ;;  %5617 = vmatprep.subr.bf16.mxu1 %v6415_v37 }
  0xc5   :  { %5084 = vmatprep.mubr.msk.f32.mxu0 %vm191_vm1, %v176_v7  ;;  %5588 = vmatpush3.bf16.msra.mxu0 %v5585_v11  ;;  %v6713_v11 = vpack.c.bf16 %v849_v6, %v848_v5 }
  0xc6   :  { %5590 = vmatprep.subr.bf16.mxu0 %v5589_v17 }
  0xc8   :  { %5085 = vmatmul.mubr.msk.f32.gmra.mrb[2].mxu0 %vm191_vm1, %v177_v10 }
  0xc9   :  { %5087 = vmatprep.mubr.msk.f32.mxu0 %vm191_vm1, %v178_v12  ;;  %5592 = vmatpush3.bf16.msra.mxu0 %v5589_v17  ;;  %v851_v17 = vld [vmem:[#allocation8 + $0x18] sm:$0xff] }
  0xca   :  { %5594 = vmatprep.subr.bf16.mxu0 %v5593_v22  ;;  %v6724_v20 = vpack.c.bf16 %v851_v17, %v850_v16 }
  0xcc   :  { %5088 = vmatmul.mubr.msk.f32.gmra.mrb[4].mxu0 %vm191_vm1, %v179_v13 }
  0xcd   :  { %5090 = vmatprep.mubr.msk.f32.mxu0 %vm191_vm1, %v180_v14  ;;  %5596 = vmatpush3.bf16.msra.mxu0 %v5593_v22  ;;  %v853_v22 = vld [vmem:[#allocation13 + $0x8] sm:$0xff] }
  0xce   :  { %5598 = vmatprep.subr.bf16.mxu0 %v5597_v28 }
  0xd0   :  { %5091 = vmatmul.mubr.msk.f32.gmra.mrb[6].mxu0 %vm191_vm1, %v181_v18 }
  0xd1   :  { %5600 = vmatpush3.bf16.msra.mxu0 %v5597_v28  ;;  %v4671_v28 = vld [vmem:[#allocation10] ss:$0 sm:$0xff] }
  0xd2   :  { %5602 = vmatprep.subr.bf16.mxu0 %v5601_v24 }
 0x189   :  { %v5055_v38 = vpop.f32.mrb[0].mxu1 }
 0x18a   :  { %v286_v39 = vpop.f32.mrb[1].mxu1  ;;  %v326_v44 = vadd.f32 %v5055_v38, %v4643_v42 }
 0x18b   :  { %v325_v46 = vadd.f32 %v4643_v42, %v286_v39 }
 0x18d   :  { %v5058_v40 = vpop.f32.mrb[2].mxu1 }
 0x18e   :  { %v296_v41 = vpop.f32.mrb[3].mxu1  ;;  %v328_v51 = vadd.f32 %v5058_v40, %v4643_v42 }
 0x18f   :  { %v327_v54 = vadd.f32 %v4643_v42, %v296_v41 }
 0x191   :  { %v5061_v43 = vpop.f32.mrb[4].mxu1 }
 0x192   :  { %v306_v45 = vpop.f32.mrb[5].mxu1  ;;  %v330_v60 = vadd.f32 %v5061_v43, %v4643_v42 }
 0x193   :  { %v329_v62 = vadd.f32 %v4643_v42, %v306_v45 }
 0x195   :  { %v5064_v48 = vpop.f32.mrb[6].mxu1 }
 0x196   :  { %v316_v52 = vpop.f32.mrb[7].mxu1  ;;  %v332_v4 = vadd.f32 %v5064_v48, %v4643_v42 }
 0x197   :  { %v5083_v47 = vpop.f32.mrb[0].mxu0  ;;  %v331_v8 = vadd.f32 %v4643_v42, %v316_v52 }
 0x198   :  { %v6703_v49 = vadd.f32 %v5083_v47, %v326_v44  ;;  %v528_v50 = vpop.f32.mrb[1].mxu0 }
 0x199   :  { %v5868_v53 = vadd.f32 %v528_v50, %v325_v46 }
 0x19a   :  { %v576_v57 = vmax.f32 %v6703_v49, 0.0 }
 0x19b   :  { %v575_v55 = vmax.f32 %v5868_v53, 0.0  ;;  %v5086_v56 = vpop.f32.mrb[2].mxu0 }
 0x19c   :  { %v6706_v58 = vadd.f32 %v5086_v56, %v328_v51  ;;  %v538_v59 = vpop.f32.mrb[3].mxu0 }
 0x19d   :  { %v5872_v61 = vadd.f32 %v538_v59, %v327_v54  ;;  %5109 = vmatprep.mubr.msk.f32.mxu0 %vm598_vm2, %v575_v55 }
 0x19e   :  { %5110 = vmatmul.mubr.msk.f32.vlgmr.msra.gmra.mrb[8].mxu0 %vm598_vm2, %v576_v57  ;;  %v578_v1 = vmax.f32 %v6706_v58, 0.0 }
 0x19f   :  { %v577_v63 = vmax.f32 %v5872_v61, 0.0  ;;  %v5089_v0 = vpop.f32.mrb[4].mxu0  ;;  %5604 = vmatpush3.bf16.msra.mxu0 %v5601_v24  ;;  %v6735_v24 = vpack.c.bf16 %v853_v22, %v852_v21 }
 0x1a0   :  { %v5874_v2 = vadd.f32 %v5089_v0, %v330_v60  ;;  %v548_v3 = vpop.f32.mrb[5].mxu0  ;;  %5606 = vmatprep.subr.bf16.mxu0 %v5605_v30 }
 0x1a1   :  { %v5876_v7 = vadd.f32 %v548_v3, %v329_v62  ;;  %5112 = vmatprep.mubr.msk.f32.mxu0 %vm598_vm2, %v577_v63 }
 0x1a2   :  { %5113 = vmatmul.mubr.msk.f32.gmra.mrb[10].mxu0 %vm598_vm2, %v578_v1  ;;  %v580_v12 = vmax.f32 %v5874_v2, 0.0 }
 0x1a3   :  { %v579_v9 = vmax.f32 %v5876_v7, 0.0  ;;  %v5092_v10 = vpop.f32.mrb[6].mxu0  ;;  %5608 = vmatpush3.bf16.msra.mxu0 %v5605_v30 }
 0x1a4   :  { %v5878_v13 = vadd.f32 %v5092_v10, %v332_v4  ;;  %v558_v14 = vpop.f32.mrb[7].mxu0  ;;  %5610 = vmatprep.subr.bf16.mxu0 %v6694_v33 }
 0x1a5   :  { %v5880_v15 = vadd.f32 %v558_v14, %v331_v8  ;;  %5115 = vmatprep.mubr.msk.f32.mxu0 %vm598_vm2, %v579_v9  ;;  %5143 = vmatprep.mubr.msk.f32.mxu1 %vm598_vm2, %v579_v9 }
 0x1a6   :  { %5116 = vmatmul.mubr.msk.f32.gmra.mrb[12].mxu0 %vm598_vm2, %v580_v12  ;;  %5144 = vmatmul.mubr.msk.f32.vlgmr.msra.gmra.mrb[8].mxu1 %vm598_vm2, %v580_v12  ;;  %v582_v19 = vmax.f32 %v5878_v13, 0.0 }
 0x1a7   :  { %v581_v18 = vmax.f32 %v5880_v15, 0.0  ;;  %5612 = vmatpush3.bf16.msra.mxu0 %v6694_v33  ;;  %5619 = vmatpush3.bf16.msra.mxu1 %v6713_v11 }
 0x1a8   :  { %5614 = vmatprep.subr.bf16.mxu0 %v6698_v36  ;;  %5620 = vmatprep.subr.bf16.mxu1 %v6415_v37 }
 0x1a9   :  { %5118 = vmatprep.mubr.msk.f32.mxu0 %vm598_vm2, %v581_v18  ;;  %5146 = vmatprep.mubr.msk.f32.mxu1 %vm598_vm2, %v581_v18 }
 0x1aa   :  { %5119 = vmatmul.mubr.msk.f32.gmra.mrb[14].mxu0 %vm598_vm2, %v582_v19  ;;  %5147 = vmatmul.mubr.msk.f32.gmra.mrb[10].mxu1 %vm598_vm2, %v582_v19 }
 0x1ab   :  { %5616 = vmatpush3.bf16.msra.mxu0 %v6698_v36  ;;  %5137 = vmatprep.mubr.msk.f32.mxu0 %vm598_vm2, %v575_v55  ;;  %v4680_v36 = vld [vmem:[#allocation14] ss:$0 sm:$0xff] }
 0x1ac   :  { %5622 = vmatpush3.bf16.msra.mxu1 %v6724_v20  ;;  %5157 = vmatprep.mubr.msk.f32.mxu1 %vm6416_vm3, %v6417_v23 }
 0x1ad   :  { %5623 = vmatprep.subr.bf16.mxu0 %v6415_v37  ;;  %5629 = vmatprep.subr.bf16.mxu1 %v6415_v37 }
 0x1ae   :  { %5138 = vmatmul.mubr.msk.f32.vlgmr.msra.gmra.mrb[16].mxu0 %vm598_vm2, %v576_v57 }
 0x1af   :  { %5158 = vmatmul.mubr.f32.vlgmr.msra.gmra.mrb[12].mxu1 %v6417_v23  ;;  %5140 = vmatprep.mubr.msk.f32.mxu0 %vm598_vm2, %v577_v63 }
 0x1b0   :  { %5625 = vmatpush3.bf16.msra.mxu0 %v6735_v24  ;;  %5631 = vmatpush3.bf16.msra.mxu1 %v6713_v11 }
 0x1b1   :  { %5626 = vmatprep.subr.bf16.mxu0 %v6415_v37  ;;  %5632 = vmatprep.subr.bf16.mxu1 %v6415_v37 }
 0x1b2   :  { %5141 = vmatmul.mubr.msk.f32.gmra.mrb[18].mxu0 %vm598_vm2, %v578_v1  ;;  %5179 = vmatprep.mubr.msk.f32.mxu1 %vm6416_vm3, %v6417_v23 }
 0x1b3   :  { %5168 = vmatprep.mubr.msk.f32.mxu0 %vm6416_vm3, %v6417_v23 }
 0x1b4   :  { %5628 = vmatpush3.bf16.msra.mxu0 %v6743_v27  ;;  %5634 = vmatpush3.bf16.msra.mxu1 %v6724_v20 }
 0x1b5   :  { %5635 = vmatprep.subr.bf16.mxu0 %v6415_v37  ;;  %5641 = vmatprep.subr.bf16.mxu1 %v6415_v37 }
 0x1b7   :  { %5169 = vmatmul.mubr.f32.vlgmr.msra.gmra.mrb[20].mxu0 %v6417_v23 }
 0x1b8   :  { %5637 = vmatpush3.bf16.msra.mxu0 %v6735_v24  ;;  %5190 = vmatprep.mubr.msk.f32.mxu0 %vm6416_vm3, %v6417_v23 }
 0x1b9   :  { %5638 = vmatprep.subr.bf16.mxu0 %v6415_v37 }
 0x1bc   :  { %5640 = vmatpush3.bf16.msra.mxu0 %v6743_v27 }
 0x1bd   :  { %5647 = vmatprep.subr.bf16.mxu0 %v6415_v37 }
 0x271   :  { %v5111_v29 = vpop.f32.mrb[8].mxu0 }
 0x272   :  { %v6764_v30 = vadd.f32 %v5111_v29, %v4671_v28  ;;  %v689_v31 = vpop.f32.mrb[9].mxu0 }
 0x273   :  { %v690_v53 = vadd.f32 %v4671_v28, %v689_v31 }
 0x275   :  { %v5114_v32 = vpop.f32.mrb[10].mxu0 }
 0x276   :  { %v6766_v33 = vadd.f32 %v5114_v32, %v4671_v28  ;;  %v699_v34 = vpop.f32.mrb[11].mxu0 }
 0x277   :  { %v6768_v35 = vadd.f32 %v4671_v28, %v699_v34 }
 0x279   :  { %v5117_v38 = vpop.f32.mrb[12].mxu0  ;;  %v5145_v39 = vpop.f32.mrb[8].mxu1 }
 0x27a   :  { %v6770_v40 = vadd.f32 %v5117_v38, %v4671_v28  ;;  %v6772_v41 = vadd.f32 %v5145_v39, %v4680_v36  ;;  %v709_v42 = vpop.f32.mrb[13].mxu0  ;;  %v829_v43 = vpop.f32.mrb[9].mxu1 }
 0x27b   :  { %v6774_v44 = vadd.f32 %v4671_v28, %v709_v42  ;;  %v6776_v45 = vadd.f32 %v4680_v36, %v829_v43 }
 0x27d   :  { %v5120_v46 = vpop.f32.mrb[14].mxu0  ;;  %v5148_v47 = vpop.f32.mrb[10].mxu1 }
 0x27e   :  { %v6778_v48 = vadd.f32 %v5120_v46, %v4671_v28  ;;  %v719_v49 = vpop.f32.mrb[15].mxu0  ;;  %v839_v50 = vpop.f32.mrb[11].mxu1  ;;  %v845_v1 = vadd.f32 %v5148_v47, %v4680_v36 }
 0x27f   :  { %v6780_v51 = vadd.f32 %v4671_v28, %v719_v49  ;;  %v6782_v52 = vadd.f32 %v4680_v36, %v839_v50 }
 0x281   :  { %v5139_v54 = vpop.f32.mrb[16].mxu0 }
 0x282   :  { %v6784_v55 = vadd.f32 %v5139_v54, %v4680_v36  ;;  %v926_v56 = vpop.f32.mrb[12].mxu1  ;;  %v809_v57 = vpop.f32.mrb[17].mxu0 }
 0x283   :  { %v930_v58 = vadd.f32 %v926_v56, %v690_v53  ;;  %v6786_v59 = vadd.f32 %v4680_v36, %v809_v57  ;;  %v5159_v60 = vpop.f32.mrb[13].mxu1 }
 0x285   :  { %v5142_v61 = vpop.f32.mrb[18].mxu0  ;;  %v4689_v8 = vmul.f32 -1.442695, %v930_v58 }
 0x286   :  { %v6788_v62 = vadd.f32 %v5142_v61, %v4680_v36  ;;  %v819_v63 = vpop.f32.mrb[19].mxu0 }
 0x287   :  { %v6790_v0 = vadd.f32 %v4680_v36, %v819_v63 }
 0x28a   :  { %v1026_v2 = vpop.f32.mrb[20].mxu0 }
 0x28b   :  { %v1030_v3 = vadd.f32 %v1026_v2, %v845_v1  ;;  %v5170_v4 = vpop.f32.mrb[21].mxu0 }
 0x28d   :  { %5906 = vtanh.f32 %v1030_v3  ;;  %v4690_v7 = vmul.f32 -1.442695, %v1030_v3 }
 0x28e   :  { %5908 = vtanh.f32 %v930_v58 }
 0x28f   :  { %5910 = vpow2.f32 %v4690_v7 }
 0x290   :  { %5912 = vpow2.f32 %v4689_v8 }
 0x297   :  { %v5907_v5 = vpop.eup %5906 }
 0x298   :  { %1040 = vrot.lane.b32.xlu0 %v5907_v5, %s6409_s8  ;;  %v5909_v6 = vpop.eup %5908 }
 0x299   :  { %v5911_v9 = vpop.eup %5910 }
 0x29a   :  { %v1034_v10 = vadd.f32 1.0, %v5911_v9  ;;  %v5913_v12 = vpop.eup %5912 }
 0x29b   :  { %v934_v13 = vadd.f32 1.0, %v5913_v12 }
 0x29c   :  { %940 = vrot.lane.b32.xlu0 %v5909_v6, %s6409_s8  ;;  %5914 = vrcp.f32 %v1034_v10 }
 0x29d   :  { %5916 = vrcp.f32 %v934_v13 }
 0x2a6   :  { %v5915_v14 = vpop.eup %5914 }
 0x2a7   :  { %v5917_v17 = vpop.eup %5916  ;;  %v1038_v21 = vmul.f32 0.0, %v5915_v14 }
 0x2a8   :  { %v938_v26 = vmul.f32 0.0, %v5917_v17 }
 0x30a   :  { %v1041_v15 = vpop.permute.xlu0 %1040 }
 0x30b   :  { %v1043_v16 = vmul.f32 %v5915_v14, %v1041_v15 }
 0x30d   :  { %1045 = vrot.lane.b32.xlu1 %v1043_v16, %s6418_s0 }
 0x30e   :  { %v941_v18 = vpop.permute.xlu0 %940 }
 0x30f   :  { %v943_v19 = vmul.f32 %v5917_v17, %v941_v18 }
 0x311   :  { %945 = vrot.lane.b32.xlu1 %v943_v19, %s6418_s0 }
 0x37f   :  { %v1046_v22 = vpop.permute.xlu1 %1045 }
 0x380   :  { %v1048_v25 = vadd.f32 %v1046_v22, %v1038_v21 }
 0x382   :  { %5918 = vtanh.f32 %v1048_v25 }
 0x383   :  { %v946_v28 = vpop.permute.xlu1 %945 }
 0x384   :  { %v948_v29 = vadd.f32 %v946_v28, %v938_v26 }
 0x386   :  { %5920 = vtanh.f32 %v948_v29 }
 0x38c   :  { %v5919_v31 = vpop.eup %5918 }
 0x38d   :  { %1051 = vrot.lane.b32.xlu0 %v5919_v31, %s6409_s8 }
 0x390   :  { %v5921_v32 = vpop.eup %5920 }
 0x391   :  { %951 = vrot.lane.b32.xlu1 %v5921_v32, %s6409_s8 }
 0x3ff   :  { %v1052_v34 = vpop.permute.xlu0 %1051 }
 0x400   :  { %v6798_v36 = vmul.f32 %v5915_v14, %v1052_v34 }
 0x402   :  { %1163 = vrot.lane.b32.xlu0 %v6798_v36, %s6418_s0 }
 0x403   :  { %v952_v38 = vpop.permute.xlu1 %951 }
 0x404   :  { %v954_v39 = vmul.f32 %v5917_v17, %v952_v38 }
 0x406   :  { %956 = vrot.lane.b32.xlu1 %v954_v39, %s6418_s0 }
 0x474   :  { %v1164_v42 = vpop.permute.xlu0 %1163 }
 0x475   :  { %5191 = vmatmul.mubr.msk.f32.vlgmr.msra.gmra.mrb[22].mxu0 %vm856_vm4, %v1164_v42 }
 0x476   :  { %5649 = vmatpush3.bf16.msra.mxu0 %v6735_v24  ;;  %5212 = vmatprep.mubr.msk.f32.mxu0 %vm6416_vm3, %v6417_v23 }
 0x477   :  { %5650 = vmatprep.subr.bf16.mxu0 %v6415_v37 }
 0x478   :  { %v957_v43 = vpop.permute.xlu1 %956 }
 0x479   :  { %959 = vst.msk [vmem:[#allocation2] sm:$0xff] %vm856_vm4, %v957_v43  ;;  %5180 = vmatmul.mubr.msk.f32.vlgmr.msra.gmra.mrb[14].mxu1 %vm856_vm4, %v957_v43 }
 0x47a   :  { %5643 = vmatpush3.bf16.msra.mxu1 %v6713_v11  ;;  %5652 = vmatpush3.bf16.msra.mxu0 %v6743_v27 }
 0x47b   :  { %5644 = vmatprep.subr.bf16.mxu1 %v6415_v37  ;;  %5201 = vmatprep.mubr.msk.f32.mxu1 %vm6416_vm3, %v6417_v23 }
 0x47c   :  { %5659 = vmatprep.subr.bf16.mxu0 %v6415_v37 }
 0x47e   :  { %5646 = vmatpush3.bf16.msra.mxu1 %v6724_v20 }
 0x47f   :  { %5653 = vmatprep.subr.bf16.mxu1 %v6415_v37 }
 0x548   :  { %v1233_v46 = vpop.f32.mrb[22].mxu0 }
 0x549   :  { %v1237_v47 = vadd.f32 %v1233_v46, %v6782_v52  ;;  %v5192_v49 = vpop.f32.mrb[23].mxu0 }
 0x54b   :  { %5922 = vtanh.f32 %v1237_v47  ;;  %v4694_v58 = vmul.f32 -1.442695, %v1237_v47 }
 0x54c   :  { %v1129_v50 = vpop.f32.mrb[14].mxu1 }
 0x54d   :  { %v1133_v53 = vadd.f32 %v1129_v50, %v6764_v30  ;;  %v5181_v54 = vpop.f32.mrb[15].mxu1 }
 0x54f   :  { %5924 = vtanh.f32 %v1133_v53  ;;  %v4692_v60 = vmul.f32 -1.442695, %v1133_v53 }
 0x550   :  { %5926 = vpow2.f32 %v4694_v58 }
 0x551   :  { %5928 = vpow2.f32 %v4692_v60 }
 0x555   :  { %v5923_v56 = vpop.eup %5922 }
 0x556   :  { %1247 = vrot.lane.b32.xlu0 %v5923_v56, %s6409_s8 }
 0x559   :  { %v5925_v57 = vpop.eup %5924 }
 0x55a   :  { %1143 = vrot.lane.b32.xlu1 %v5925_v57, %s6409_s8  ;;  %v5927_v61 = vpop.eup %5926 }
 0x55b   :  { %v1241_v63 = vadd.f32 1.0, %v5927_v61  ;;  %v5929_v52 = vpop.eup %5928 }
 0x55c   :  { %v1137_v1 = vadd.f32 1.0, %v5929_v52 }
 0x55d   :  { %5930 = vrcp.f32 %v1241_v63 }
 0x55e   :  { %5932 = vrcp.f32 %v1137_v1 }
 0x567   :  { %v5931_v2 = vpop.eup %5930 }
 0x568   :  { %v5933_v4 = vpop.eup %5932  ;;  %v1245_v7 = vmul.f32 %v5931_v2, %v1048_v25 }
 0x569   :  { %v1141_v10 = vmul.f32 %v5933_v4, %v948_v29 }
 0x5c8   :  { %v1248_v30 = vpop.permute.xlu0 %1247 }
 0x5c9   :  { %v1250_v3 = vmul.f32 %v5931_v2, %v1248_v30 }
 0x5cb   :  { %1252 = vrot.lane.b32.xlu0 %v1250_v3, %s6418_s0 }
 0x5cc   :  { %v1144_v5 = vpop.permute.xlu1 %1143 }
 0x5cd   :  { %v1146_v6 = vmul.f32 %v5933_v4, %v1144_v5 }
 0x5cf   :  { %1148 = vrot.lane.b32.xlu1 %v1146_v6, %s6418_s0 }
 0x63d   :  { %v1253_v8 = vpop.permute.xlu0 %1252 }
 0x63e   :  { %v1255_v9 = vadd.f32 %v1253_v8, %v1245_v7 }
 0x640   :  { %5934 = vtanh.f32 %v1255_v9 }
 0x641   :  { %v1149_v12 = vpop.permute.xlu1 %1148 }
 0x642   :  { %v1151_v13 = vadd.f32 %v1149_v12, %v1141_v10 }
 0x644   :  { %5936 = vtanh.f32 %v1151_v13 }
 0x64a   :  { %v5935_v14 = vpop.eup %5934 }
 0x64b   :  { %1258 = vrot.lane.b32.xlu0 %v5935_v14, %s6409_s8 }
 0x64e   :  { %v5937_v15 = vpop.eup %5936 }
 0x64f   :  { %1154 = vrot.lane.b32.xlu1 %v5937_v15, %s6409_s8 }
 0x6bd   :  { %v1259_v16 = vpop.permute.xlu0 %1258 }
 0x6be   :  { %v6826_v17 = vmul.f32 %v5931_v2, %v1259_v16 }
 0x6c0   :  { %1369 = vrot.lane.b32.xlu0 %v6826_v17, %s6418_s0 }
 0x6c1   :  { %v1155_v18 = vpop.permute.xlu1 %1154 }
 0x6c2   :  { %v1157_v19 = vmul.f32 %v5933_v4, %v1155_v18 }
 0x6c4   :  { %1159 = vrot.lane.b32.xlu1 %v1157_v19, %s6418_s0 }
 0x732   :  { %v1370_v21 = vpop.permute.xlu0 %1369 }
 0x733   :  { %5213 = vmatmul.mubr.msk.f32.vlgmr.msra.gmra.mrb[24].mxu0 %vm856_vm4, %v1370_v21 }
 0x734   :  { %5661 = vmatpush3.bf16.msra.mxu0 %v6735_v24  ;;  %5234 = vmatprep.mubr.msk.f32.mxu0 %vm6416_vm3, %v6417_v23 }
 0x735   :  { %5662 = vmatprep.subr.bf16.mxu0 %v6415_v37 }
 0x736   :  { %v1160_v22 = vpop.permute.xlu1 %1159 }
 0x737   :  { %1162 = vst.msk [vmem:[#allocation2 + $0x8] sm:$0xff] %vm856_vm4, %v1160_v22  ;;  %5202 = vmatmul.mubr.msk.f32.vlgmr.msra.gmra.mrb[16].mxu1 %vm856_vm4, %v1160_v22 }
 0x738   :  { %5655 = vmatpush3.bf16.msra.mxu1 %v6713_v11  ;;  %5664 = vmatpush3.bf16.msra.mxu0 %v6743_v27 }
 0x739   :  { %5656 = vmatprep.subr.bf16.mxu1 %v6415_v37  ;;  %5223 = vmatprep.mubr.msk.f32.mxu1 %vm6416_vm3, %v6417_v23 }
 0x73a   :  { %5671 = vmatprep.subr.bf16.mxu0 %v6415_v37 }
 0x73c   :  { %5658 = vmatpush3.bf16.msra.mxu1 %v6724_v20 }
 0x73d   :  { %5665 = vmatprep.subr.bf16.mxu1 %v6415_v37 }
 0x806   :  { %v1439_v25 = vpop.f32.mrb[24].mxu0 }
 0x807   :  { %v1443_v26 = vadd.f32 %v1439_v25, %v6772_v41  ;;  %v5214_v28 = vpop.f32.mrb[25].mxu0 }
 0x809   :  { %5938 = vtanh.f32 %v1443_v26  ;;  %v4698_v39 = vmul.f32 -1.442695, %v1443_v26 }
 0x80a   :  { %v1335_v29 = vpop.f32.mrb[16].mxu1 }
 0x80b   :  { %v1339_v31 = vadd.f32 %v1335_v29, %v6768_v35  ;;  %v5203_v32 = vpop.f32.mrb[17].mxu1 }
 0x80d   :  { %5940 = vtanh.f32 %v1339_v31  ;;  %v4696_v42 = vmul.f32 -1.442695, %v1339_v31 }
 0x80e   :  { %5942 = vpow2.f32 %v4698_v39 }
 0x80f   :  { %5944 = vpow2.f32 %v4696_v42 }
 0x813   :  { %v5939_v34 = vpop.eup %5938 }
 0x814   :  { %1453 = vrot.lane.b32.xlu0 %v5939_v34, %s6409_s8 }
 0x817   :  { %v5941_v38 = vpop.eup %5940 }
 0x818   :  { %1349 = vrot.lane.b32.xlu1 %v5941_v38, %s6409_s8  ;;  %v5943_v43 = vpop.eup %5942 }
 0x819   :  { %v1447_v46 = vadd.f32 1.0, %v5943_v43  ;;  %v5945_v41 = vpop.eup %5944 }
 0x81a   :  { %v1343_v47 = vadd.f32 1.0, %v5945_v41 }
 0x81b   :  { %5946 = vrcp.f32 %v1447_v46 }
 0x81c   :  { %5948 = vrcp.f32 %v1343_v47 }
 0x825   :  { %v5947_v49 = vpop.eup %5946 }
 0x826   :  { %v5949_v53 = vpop.eup %5948  ;;  %v1451_v57 = vmul.f32 %v5947_v49, %v1255_v9 }
 0x827   :  { %v1347_v61 = vmul.f32 %v5949_v53, %v1151_v13 }
 0x886   :  { %v1454_v35 = vpop.permute.xlu0 %1453 }
 0x887   :  { %v1456_v50 = vmul.f32 %v5947_v49, %v1454_v35 }
 0x889   :  { %1458 = vrot.lane.b32.xlu0 %v1456_v50, %s6418_s0 }
 0x88a   :  { %v1350_v54 = vpop.permute.xlu1 %1349 }
 0x88b   :  { %v1352_v56 = vmul.f32 %v5949_v53, %v1350_v54 }
 0x88d   :  { %1354 = vrot.lane.b32.xlu1 %v1352_v56, %s6418_s0 }
 0x8fb   :  { %v1459_v58 = vpop.permute.xlu0 %1458 }
 0x8fc   :  { %v1461_v60 = vadd.f32 %v1459_v58, %v1451_v57 }
 0x8fe   :  { %5950 = vtanh.f32 %v1461_v60 }
 0x8ff   :  { %v1355_v63 = vpop.permute.xlu1 %1354 }
 0x900   :  { %v1357_v52 = vadd.f32 %v1355_v63, %v1347_v61 }
 0x902   :  { %5952 = vtanh.f32 %v1357_v52 }
 0x908   :  { %v5951_v1 = vpop.eup %5950 }
 0x909   :  { %1464 = vrot.lane.b32.xlu0 %v5951_v1, %s6409_s8 }
 0x90c   :  { %v5953_v2 = vpop.eup %5952 }
 0x90d   :  { %1360 = vrot.lane.b32.xlu1 %v5953_v2, %s6409_s8 }
 0x97b   :  { %v1465_v30 = vpop.permute.xlu0 %1464 }
 0x97c   :  { %v6854_v3 = vmul.f32 %v5947_v49, %v1465_v30 }
 0x97e   :  { %1575 = vrot.lane.b32.xlu0 %v6854_v3, %s6418_s0 }
 0x97f   :  { %v1361_v4 = vpop.permute.xlu1 %1360 }
 0x980   :  { %v1363_v5 = vmul.f32 %v5949_v53, %v1361_v4 }
 0x982   :  { %1365 = vrot.lane.b32.xlu1 %v1363_v5, %s6418_s0 }
 0x9f0   :  { %v1576_v6 = vpop.permute.xlu0 %1575 }
 0x9f1   :  { %5235 = vmatmul.mubr.msk.f32.vlgmr.msra.gmra.mrb[26].mxu0 %vm856_vm4, %v1576_v6 }
 0x9f2   :  { %5673 = vmatpush3.bf16.msra.mxu0 %v6735_v24  ;;  %5256 = vmatprep.mubr.msk.f32.mxu0 %vm6416_vm3, %v6417_v23 }
 0x9f3   :  { %5674 = vmatprep.subr.bf16.mxu0 %v6415_v37 }
 0x9f4   :  { %v1366_v7 = vpop.permute.xlu1 %1365 }
 0x9f5   :  { %1368 = vst.msk [vmem:[#allocation2 + $0x10] sm:$0xff] %vm856_vm4, %v1366_v7  ;;  %5224 = vmatmul.mubr.msk.f32.vlgmr.msra.gmra.mrb[18].mxu1 %vm856_vm4, %v1366_v7 }
 0x9f6   :  { %5667 = vmatpush3.bf16.msra.mxu1 %v6713_v11  ;;  %5676 = vmatpush3.bf16.msra.mxu0 %v6743_v27 }
 0x9f7   :  { %5668 = vmatprep.subr.bf16.mxu1 %v6415_v37  ;;  %5245 = vmatprep.mubr.msk.f32.mxu1 %vm6416_vm3, %v6417_v23 }
 0x9f8   :  { %5683 = vmatprep.subr.bf16.mxu0 %v6415_v37 }
 0x9fa   :  { %5670 = vmatpush3.bf16.msra.mxu1 %v6724_v20 }
 0x9fb   :  { %5677 = vmatprep.subr.bf16.mxu1 %v6415_v37 }
 0xac4   :  { %v1645_v8 = vpop.f32.mrb[26].mxu0 }
 0xac5   :  { %v1649_v9 = vadd.f32 %v1645_v8, %v6776_v45  ;;  %v5236_v10 = vpop.f32.mrb[27].mxu0 }
 0xac7   :  { %5954 = vtanh.f32 %v1649_v9  ;;  %v4702_v18 = vmul.f32 -1.442695, %v1649_v9 }
 0xac8   :  { %v1541_v12 = vpop.f32.mrb[18].mxu1 }
 0xac9   :  { %v1545_v13 = vadd.f32 %v1541_v12, %v6766_v33  ;;  %v5225_v14 = vpop.f32.mrb[19].mxu1 }
 0xacb   :  { %5956 = vtanh.f32 %v1545_v13  ;;  %v4700_v19 = vmul.f32 -1.442695, %v1545_v13 }
 0xacc   :  { %5958 = vpow2.f32 %v4702_v18 }
 0xacd   :  { %5960 = vpow2.f32 %v4700_v19 }
 0xad1   :  { %v5955_v15 = vpop.eup %5954 }
 0xad2   :  { %1659 = vrot.lane.b32.xlu0 %v5955_v15, %s6409_s8 }
 0xad5   :  { %v5957_v16 = vpop.eup %5956 }
 0xad6   :  { %1555 = vrot.lane.b32.xlu1 %v5957_v16, %s6409_s8  ;;  %v5959_v21 = vpop.eup %5958 }
 0xad7   :  { %v1653_v22 = vadd.f32 1.0, %v5959_v21  ;;  %v5961_v45 = vpop.eup %5960 }
 0xad8   :  { %v1549_v25 = vadd.f32 1.0, %v5961_v45 }
 0xad9   :  { %5962 = vrcp.f32 %v1653_v22 }
 0xada   :  { %5964 = vrcp.f32 %v1549_v25 }
 0xae3   :  { %v5963_v26 = vpop.eup %5962 }
 0xae4   :  { %v5965_v29 = vpop.eup %5964  ;;  %v1657_v34 = vmul.f32 %v5963_v26, %v1461_v60 }
 0xae5   :  { %v1553_v42 = vmul.f32 %v5965_v29, %v1357_v52 }
 0xb44   :  { %v1660_v33 = vpop.permute.xlu0 %1659 }
 0xb45   :  { %v1662_v28 = vmul.f32 %v5963_v26, %v1660_v33 }
 0xb47   :  { %1664 = vrot.lane.b32.xlu0 %v1662_v28, %s6418_s0 }
 0xb48   :  { %v1556_v31 = vpop.permute.xlu1 %1555 }
 0xb49   :  { %v1558_v32 = vmul.f32 %v5965_v29, %v1556_v31 }
 0xb4b   :  { %1560 = vrot.lane.b32.xlu1 %v1558_v32, %s6418_s0 }
 0xbb9   :  { %v1665_v38 = vpop.permute.xlu0 %1664 }
 0xbba   :  { %v1667_v39 = vadd.f32 %v1665_v38, %v1657_v34 }
 0xbbc   :  { %5966 = vtanh.f32 %v1667_v39 }
 0xbbd   :  { %v1561_v43 = vpop.permute.xlu1 %1560 }
 0xbbe   :  { %v1563_v46 = vadd.f32 %v1561_v43, %v1553_v42 }
 0xbc0   :  { %5968 = vtanh.f32 %v1563_v46 }
 0xbc6   :  { %v5967_v41 = vpop.eup %5966 }
 0xbc7   :  { %1670 = vrot.lane.b32.xlu0 %v5967_v41, %s6409_s8 }
 0xbca   :  { %v5969_v47 = vpop.eup %5968 }
 0xbcb   :  { %1566 = vrot.lane.b32.xlu1 %v5969_v47, %s6409_s8 }
 0xc39   :  { %v1671_v49 = vpop.permute.xlu0 %1670 }
 0xc3a   :  { %v6882_v35 = vmul.f32 %v5963_v26, %v1671_v49 }
 0xc3c   :  { %1781 = vrot.lane.b32.xlu0 %v6882_v35, %s6418_s0 }
 0xc3d   :  { %v1567_v50 = vpop.permute.xlu1 %1566 }
 0xc3e   :  { %v1569_v53 = vmul.f32 %v5965_v29, %v1567_v50 }
 0xc40   :  { %1571 = vrot.lane.b32.xlu1 %v1569_v53, %s6418_s0 }
 0xcae   :  { %v1782_v54 = vpop.permute.xlu0 %1781 }
 0xcaf   :  { %5257 = vmatmul.mubr.msk.f32.vlgmr.msra.gmra.mrb[28].mxu0 %vm856_vm4, %v1782_v54 }
 0xcb0   :  { %5685 = vmatpush3.bf16.msra.mxu0 %v6735_v24  ;;  %5278 = vmatprep.mubr.msk.f32.mxu0 %vm6416_vm3, %v6417_v23 }
 0xcb1   :  { %5686 = vmatprep.subr.bf16.mxu0 %v6415_v37 }
 0xcb2   :  { %v1572_v56 = vpop.permute.xlu1 %1571 }
 0xcb3   :  { %1574 = vst.msk [vmem:[#allocation2 + $0x18] sm:$0xff] %vm856_vm4, %v1572_v56  ;;  %5246 = vmatmul.mubr.msk.f32.vlgmr.msra.gmra.mrb[20].mxu1 %vm856_vm4, %v1572_v56 }
 0xcb4   :  { %5679 = vmatpush3.bf16.msra.mxu1 %v6713_v11  ;;  %5688 = vmatpush3.bf16.msra.mxu0 %v6743_v27 }
 0xcb5   :  { %5680 = vmatprep.subr.bf16.mxu1 %v6415_v37  ;;  %5267 = vmatprep.mubr.msk.f32.mxu1 %vm6416_vm3, %v6417_v23 }
 0xcb6   :  { %5695 = vmatprep.subr.bf16.mxu0 %v6415_v37 }
 0xcb8   :  { %5682 = vmatpush3.bf16.msra.mxu1 %v6724_v20 }
 0xcb9   :  { %5689 = vmatprep.subr.bf16.mxu1 %v6415_v37 }
 0xd82   :  { %v1851_v57 = vpop.f32.mrb[28].mxu0 }
 0xd83   :  { %v1855_v58 = vadd.f32 %v1851_v57, %v6788_v62  ;;  %v5258_v60 = vpop.f32.mrb[29].mxu0 }
 0xd85   :  { %5970 = vtanh.f32 %v1855_v58  ;;  %v4706_v30 = vmul.f32 -1.442695, %v1855_v58 }
 0xd86   :  { %v1747_v61 = vpop.f32.mrb[20].mxu1 }
 0xd87   :  { %v1751_v63 = vadd.f32 %v1747_v61, %v6774_v44  ;;  %v5247_v52 = vpop.f32.mrb[21].mxu1 }
 0xd89   :  { %5972 = vtanh.f32 %v1751_v63  ;;  %v4704_v4 = vmul.f32 -1.442695, %v1751_v63 }
 0xd8a   :  { %5974 = vpow2.f32 %v4706_v30 }
 0xd8b   :  { %5976 = vpow2.f32 %v4704_v4 }
 0xd8f   :  { %v5971_v1 = vpop.eup %5970 }
 0xd90   :  { %1865 = vrot.lane.b32.xlu0 %v5971_v1, %s6409_s8 }
 0xd93   :  { %v5973_v2 = vpop.eup %5972 }
 0xd94   :  { %1761 = vrot.lane.b32.xlu1 %v5973_v2, %s6409_s8  ;;  %v5975_v5 = vpop.eup %5974 }
 0xd95   :  { %v1859_v6 = vadd.f32 1.0, %v5975_v5  ;;  %v5977_v62 = vpop.eup %5976 }
 0xd96   :  { %v1755_v7 = vadd.f32 1.0, %v5977_v62 }
 0xd97   :  { %5978 = vrcp.f32 %v1859_v6 }
 0xd98   :  { %5980 = vrcp.f32 %v1755_v7 }
 0xda1   :  { %v5979_v8 = vpop.eup %5978 }
 0xda2   :  { %v5981_v10 = vpop.eup %5980  ;;  %v1863_v14 = vmul.f32 %v5979_v8, %v1667_v39 }
 0xda3   :  { %v1759_v18 = vmul.f32 %v5981_v10, %v1563_v46 }
 0xe02   :  { %v1866_v44 = vpop.permute.xlu0 %1865 }
 0xe03   :  { %v1868_v9 = vmul.f32 %v5979_v8, %v1866_v44 }
 0xe05   :  { %1870 = vrot.lane.b32.xlu0 %v1868_v9, %s6418_s0 }
 0xe06   :  { %v1762_v12 = vpop.permute.xlu1 %1761 }
 0xe07   :  { %v1764_v13 = vmul.f32 %v5981_v10, %v1762_v12 }
 0xe09   :  { %1766 = vrot.lane.b32.xlu1 %v1764_v13, %s6418_s0 }
 0xe77   :  { %v1871_v15 = vpop.permute.xlu0 %1870 }
 0xe78   :  { %v1873_v16 = vadd.f32 %v1871_v15, %v1863_v14 }
 0xe7a   :  { %5982 = vtanh.f32 %v1873_v16 }
 0xe7b   :  { %v1767_v19 = vpop.permute.xlu1 %1766 }
 0xe7c   :  { %v1769_v21 = vadd.f32 %v1767_v19, %v1759_v18 }
 0xe7e   :  { %5984 = vtanh.f32 %v1769_v21 }
 0xe84   :  { %v5983_v22 = vpop.eup %5982 }
 0xe85   :  { %1876 = vrot.lane.b32.xlu0 %v5983_v22, %s6409_s8 }
 0xe88   :  { %v5985_v45 = vpop.eup %5984 }
 0xe89   :  { %1772 = vrot.lane.b32.xlu1 %v5985_v45, %s6409_s8 }
 0xef7   :  { %v1877_v25 = vpop.permute.xlu0 %1876 }
 0xef8   :  { %v6910_v26 = vmul.f32 %v5979_v8, %v1877_v25 }
 0xefa   :  { %1987 = vrot.lane.b32.xlu0 %v6910_v26, %s6418_s0 }
 0xefb   :  { %v1773_v33 = vpop.permute.xlu1 %1772 }
 0xefc   :  { %v1775_v28 = vmul.f32 %v5981_v10, %v1773_v33 }
 0xefe   :  { %1777 = vrot.lane.b32.xlu1 %v1775_v28, %s6418_s0 }
 0xf6c   :  { %v1988_v29 = vpop.permute.xlu0 %1987 }
 0xf6d   :  { %5279 = vmatmul.mubr.msk.f32.vlgmr.msra.gmra.mrb[30].mxu0 %vm856_vm4, %v1988_v29 }
 0xf6e   :  { %5697 = vmatpush3.bf16.msra.mxu0 %v6735_v24  ;;  %5300 = vmatprep.mubr.msk.f32.mxu0 %vm6416_vm3, %v6417_v23 }
 0xf6f   :  { %5698 = vmatprep.subr.bf16.mxu0 %v6415_v37 }
 0xf70   :  { %v6920_v31 = vpop.permute.xlu1 %1777 }
 0xf71   :  { %5268 = vmatmul.mubr.msk.f32.vlgmr.msra.gmra.mrb[22].mxu1 %vm856_vm4, %v6920_v31 }
 0xf72   :  { %5691 = vmatpush3.bf16.msra.mxu1 %v6713_v11  ;;  %5700 = vmatpush3.bf16.msra.mxu0 %v6743_v27 }
 0xf73   :  { %5692 = vmatprep.subr.bf16.mxu1 %v6415_v37  ;;  %5289 = vmatprep.mubr.msk.f32.mxu1 %vm6416_vm3, %v6417_v23 }
 0xf74   :  { %5707 = vmatprep.subr.bf16.mxu0 %v6415_v37 }
 0xf76   :  { %5694 = vmatpush3.bf16.msra.mxu1 %v6724_v20 }
 0xf77   :  { %5701 = vmatprep.subr.bf16.mxu1 %v6415_v37 }
0x1040   :  { %v2057_v32 = vpop.f32.mrb[30].mxu0 }
0x1041   :  { %v2061_v34 = vadd.f32 %v2057_v32, %v6790_v0  ;;  %v5280_v38 = vpop.f32.mrb[31].mxu0 }
0x1043   :  { %5986 = vtanh.f32 %v2061_v34  ;;  %v4710_v47 = vmul.f32 -1.442695, %v2061_v34 }
0x1044   :  { %v1953_v39 = vpop.f32.mrb[22].mxu1 }
0x1045   :  { %v1957_v42 = vadd.f32 %v1953_v39, %v6770_v40  ;;  %v5269_v43 = vpop.f32.mrb[23].mxu1 }
0x1047   :  { %5988 = vtanh.f32 %v1957_v42  ;;  %v4708_v49 = vmul.f32 -1.442695, %v1957_v42 }
0x1048   :  { %5990 = vpow2.f32 %v4710_v47 }
0x1049   :  { %5992 = vpow2.f32 %v4708_v49 }
0x104d   :  { %v5987_v46 = vpop.eup %5986 }
0x104e   :  { %2071 = vrot.lane.b32.xlu0 %v5987_v46, %s6409_s8 }
0x1051   :  { %v5989_v41 = vpop.eup %5988 }
0x1052   :  { %1967 = vrot.lane.b32.xlu1 %v5989_v41, %s6409_s8  ;;  %v5991_v50 = vpop.eup %5990 }
0x1053   :  { %v2065_v53 = vadd.f32 1.0, %v5991_v50  ;;  %v5993_v0 = vpop.eup %5992 }
0x1054   :  { %v1961_v54 = vadd.f32 1.0, %v5993_v0 }
0x1055   :  { %5994 = vrcp.f32 %v2065_v53 }
0x1056   :  { %5996 = vrcp.f32 %v1961_v54 }
0x105f   :  { %v5995_v56 = vpop.eup %5994 }
0x1060   :  { %v5997_v58 = vpop.eup %5996  ;;  %v2069_v63 = vmul.f32 %v5995_v56, %v1873_v16 }
0x1061   :  { %v1965_v2 = vmul.f32 %v5997_v58, %v1769_v21 }
0x10c0   :  { %v2072_v40 = vpop.permute.xlu0 %2071 }
0x10c1   :  { %v2074_v57 = vmul.f32 %v5995_v56, %v2072_v40 }
0x10c3   :  { %2076 = vrot.lane.b32.xlu0 %v2074_v57, %s6418_s0 }
0x10c4   :  { %v1968_v60 = vpop.permute.xlu1 %1967 }
0x10c5   :  { %v1970_v61 = vmul.f32 %v5997_v58, %v1968_v60 }
0x10c7   :  { %1972 = vrot.lane.b32.xlu1 %v1970_v61, %s6418_s0 }
0x1135   :  { %v2077_v52 = vpop.permute.xlu0 %2076 }
0x1136   :  { %v2079_v1 = vadd.f32 %v2077_v52, %v2069_v63 }
0x1138   :  { %5998 = vtanh.f32 %v2079_v1 }
0x1139   :  { %v1973_v30 = vpop.permute.xlu1 %1972 }
0x113a   :  { %v1975_v4 = vadd.f32 %v1973_v30, %v1965_v2 }
0x113c   :  { %6000 = vtanh.f32 %v1975_v4 }
0x1142   :  { %v5999_v5 = vpop.eup %5998 }
0x1143   :  { %2082 = vrot.lane.b32.xlu0 %v5999_v5, %s6409_s8 }
0x1146   :  { %v6001_v6 = vpop.eup %6000 }
0x1147   :  { %1978 = vrot.lane.b32.xlu1 %v6001_v6, %s6409_s8 }
0x11b5   :  { %v2083_v62 = vpop.permute.xlu0 %2082 }
0x11b6   :  { %v6940_v7 = vmul.f32 %v5995_v56, %v2083_v62 }
0x11b8   :  { %2193 = vrot.lane.b32.xlu0 %v6940_v7, %s6418_s0 }
0x11b9   :  { %v1979_v8 = vpop.permute.xlu1 %1978 }
0x11ba   :  { %v1981_v44 = vmul.f32 %v5997_v58, %v1979_v8 }
0x11bc   :  { %1983 = vrot.lane.b32.xlu1 %v1981_v44, %s6418_s0 }
0x122a   :  { %v2194_v9 = vpop.permute.xlu0 %2193 }
0x122b   :  { %5301 = vmatmul.mubr.msk.f32.vlgmr.msra.gmra.mrb[32].mxu0 %vm856_vm4, %v2194_v9 }
0x122c   :  { %5709 = vmatpush3.bf16.msra.mxu0 %v6735_v24  ;;  %5322 = vmatprep.mubr.msk.f32.mxu0 %vm6416_vm3, %v6417_v23 }
0x122d   :  { %5710 = vmatprep.subr.bf16.mxu0 %v6415_v37 }
0x122e   :  { %v6950_v10 = vpop.permute.xlu1 %1983 }
0x122f   :  { %5290 = vmatmul.mubr.msk.f32.vlgmr.msra.gmra.mrb[24].mxu1 %vm856_vm4, %v6950_v10 }
0x1230   :  { %5703 = vmatpush3.bf16.msra.mxu1 %v6713_v11  ;;  %5712 = vmatpush3.bf16.msra.mxu0 %v6743_v27 }
0x1231   :  { %5704 = vmatprep.subr.bf16.mxu1 %v6415_v37  ;;  %5311 = vmatprep.mubr.msk.f32.mxu1 %vm6416_vm3, %v6417_v23 }
0x1234   :  { %5706 = vmatpush3.bf16.msra.mxu1 %v6724_v20 }
0x12fe   :  { %v2263_v24 = vpop.f32.mrb[32].mxu0 }
0x12ff   :  { %v2267_v12 = vadd.f32 %v2263_v24, %v6784_v55  ;;  %v5302_v13 = vpop.f32.mrb[33].mxu0 }
0x1301   :  { %6002 = vtanh.f32 %v2267_v12  ;;  %v4714_v18 = vmul.f32 -1.442695, %v2267_v12 }
0x1302   :  { %v2159_v14 = vpop.f32.mrb[24].mxu1 }
0x1303   :  { %v2163_v15 = vadd.f32 %v2159_v14, %v6780_v51  ;;  %v5291_v16 = vpop.f32.mrb[25].mxu1 }
0x1305   :  { %6004 = vtanh.f32 %v2163_v15  ;;  %v4712_v19 = vmul.f32 -1.442695, %v2163_v15 }
0x1306   :  { %6006 = vpow2.f32 %v4714_v18  ;;  %v2511_v18 = vld [vmem:[#allocation16] sm:$0xff] }
0x1307   :  { %6008 = vpow2.f32 %v4712_v19  ;;  %v2512_v19 = vld [vmem:[#allocation16 + $0x8] sm:$0xff] }
0x130b   :  { %v6003_v11 = vpop.eup %6002 }
0x130c   :  { %2277 = vrot.lane.b32.xlu0 %v6003_v11, %s6409_s8 }
0x130f   :  { %v6005_v27 = vpop.eup %6004 }
0x1310   :  { %2173 = vrot.lane.b32.xlu1 %v6005_v27, %s6409_s8  ;;  %v6007_v20 = vpop.eup %6006 }
0x1311   :  { %v2271_v21 = vadd.f32 1.0, %v6007_v20  ;;  %v6009_v55 = vpop.eup %6008  ;;  %v2655_v20 = vld [vmem:[%s7457_s12] sm:$0xff] }
0x1312   :  { %v2167_v22 = vadd.f32 1.0, %v6009_v55  ;;  %v2656_v55 = vld [vmem:[%s7457_s12 + $0x8] sm:$0xff] }
0x1313   :  { %6010 = vrcp.f32 %v2271_v21  ;;  %v5713_v21 = vpack.c.bf16 %v2512_v19, %v2511_v18 }
0x1314   :  { %6012 = vrcp.f32 %v2167_v22  ;;  %v2513_v22 = vld [vmem:[#allocation16 + $0x10] sm:$0xff] }
0x1315   :  { %5714 = vmatprep.subr.bf16.mxu1 %v5713_v21 }
0x131d   :  { %v6011_v45 = vpop.eup %6010 }
0x131e   :  { %v6013_v33 = vpop.eup %6012  ;;  %v2275_v32 = vmul.f32 %v6011_v45, %v2079_v1 }
0x131f   :  { %v2171_v39 = vmul.f32 %v6013_v33, %v1975_v4 }
0x137e   :  { %v2278_v51 = vpop.permute.xlu0 %2277 }
0x137f   :  { %v2280_v25 = vmul.f32 %v6011_v45, %v2278_v51  ;;  %v5729_v51 = vpack.c.bf16 %v2656_v55, %v2655_v20 }
0x1381   :  { %2282 = vrot.lane.b32.xlu0 %v2280_v25, %s6418_s0  ;;  %5730 = vmatprep.subr.bf16.mxu0 %v5729_v51 }
0x1382   :  { %v2174_v28 = vpop.permute.xlu1 %2173 }
0x1383   :  { %v2176_v29 = vmul.f32 %v6013_v33, %v2174_v28  ;;  %v2658_v28 = vld [vmem:[%s7457_s12 + $0x18] sm:$0xff] }
0x1385   :  { %2178 = vrot.lane.b32.xlu1 %v2176_v29, %s6418_s0 }
0x13f3   :  { %v2283_v34 = vpop.permute.xlu0 %2282 }
0x13f4   :  { %v2285_v38 = vadd.f32 %v2283_v34, %v2275_v32  ;;  %v2515_v32 = vld [vmem:[#allocation16 + $0x20] sm:$0xff]  ;;  %v2516_v34 = vld [vmem:[#allocation16 + $0x28] sm:$0xff] }
0x13f6   :  { %6014 = vtanh.f32 %v2285_v38 }
0x13f7   :  { %v2179_v42 = vpop.permute.xlu1 %2178 }
0x13f8   :  { %v2181_v43 = vadd.f32 %v2179_v42, %v2171_v39  ;;  %v5721_v39 = vpack.c.bf16 %v2516_v34, %v2515_v32 }
0x13fa   :  { %6016 = vtanh.f32 %v2181_v43 }
0x1400   :  { %v6015_v46 = vpop.eup %6014 }
0x1401   :  { %2288 = vrot.lane.b32.xlu0 %v6015_v46, %s6409_s8 }
0x1404   :  { %v6017_v41 = vpop.eup %6016 }
0x1405   :  { %2184 = vrot.lane.b32.xlu1 %v6017_v41, %s6409_s8  ;;  %v2662_v41 = vld [vmem:[%s7457_s12 + $0x38] sm:$0xff] }
0x1473   :  { %v2289_v47 = vpop.permute.xlu0 %2288 }
0x1474   :  { %v2291_v49 = vmul.f32 %v6011_v45, %v2289_v47  ;;  %v2514_v45 = vld [vmem:[#allocation16 + $0x18] sm:$0xff] }
0x1475   :  { %v5717_v25 = vpack.c.bf16 %v2514_v45, %v2513_v22 }
0x1476   :  { %2399 = vrot.lane.b32.xlu0 %v2291_v49, %s6418_s0 }
0x1477   :  { %v2185_v50 = vpop.permute.xlu1 %2184 }
0x1478   :  { %v2187_v53 = vmul.f32 %v6013_v33, %v2185_v50  ;;  %v2657_v33 = vld [vmem:[%s7457_s12 + $0x10] sm:$0xff] }
0x1479   :  { %v5733_v29 = vpack.c.bf16 %v2658_v28, %v2657_v33 }
0x147a   :  { %2189 = vrot.lane.b32.xlu1 %v2187_v53, %s6418_s0 }
0x14e8   :  { %v2400_v0 = vpop.permute.xlu0 %2399 }
0x14e9   :  { %5323 = vmatmul.mubr.msk.f32.vlgmr.msra.gmra.mrb[34].mxu0 %vm856_vm4, %v2400_v0 }
0x14ea   :  { %5732 = vmatpush3.bf16.msra.mxu0 %v5729_v51 }
0x14eb   :  { %5734 = vmatprep.subr.bf16.mxu0 %v5733_v29 }
0x14ec   :  { %v6971_v54 = vpop.permute.xlu1 %2189 }
0x14ed   :  { %5312 = vmatmul.mubr.msk.f32.vlgmr.msra.gmra.mrb[26].mxu1 %vm856_vm4, %v6971_v54 }
0x14ee   :  { %5716 = vmatpush3.bf16.msra.mxu1 %v5713_v21  ;;  %5736 = vmatpush3.bf16.msra.mxu0 %v5733_v29 }
0x14ef   :  { %5718 = vmatprep.subr.bf16.mxu1 %v5717_v25 }
0x14f2   :  { %5720 = vmatpush3.bf16.msra.mxu1 %v5717_v25 }
0x14f3   :  { %5722 = vmatprep.subr.bf16.mxu1 %v5721_v39 }
0x14f6   :  { %5724 = vmatpush3.bf16.msra.mxu1 %v5721_v39 }
0x15bc   :  { %v2469_v56 = vpop.f32.mrb[34].mxu0 }
0x15bd   :  { %v2473_v40 = vadd.f32 %v2469_v56, %v6786_v59  ;;  %v5324_v57 = vpop.f32.mrb[35].mxu0 }
0x15bf   :  { %6018 = vtanh.f32 %v2473_v40  ;;  %v4718_v1 = vmul.f32 -1.442695, %v2473_v40 }
0x15c0   :  { %v2365_v58 = vpop.f32.mrb[26].mxu1 }
0x15c1   :  { %v2369_v60 = vadd.f32 %v2365_v58, %v6778_v48  ;;  %v5313_v61 = vpop.f32.mrb[27].mxu1 }
0x15c2   :  { %v2776_v61 = vld [vmem:[%s7455_s10 + $0x8] sm:$0xff] }
0x15c3   :  { %6020 = vtanh.f32 %v2369_v60  ;;  %v4716_v2 = vmul.f32 -1.442695, %v2369_v60  ;;  %v2780_v60 = vld [vmem:[%s7458_s13 + $0x8] sm:$0xff] }
0x15c4   :  { %6022 = vpow2.f32 %v4718_v1  ;;  %v2781_v1 = vld [vmem:[%s7458_s13 + $0x10] sm:$0xff] }
0x15c5   :  { %6024 = vpow2.f32 %v4716_v2  ;;  %v2782_v2 = vld [vmem:[%s7458_s13 + $0x18] sm:$0xff] }
0x15c9   :  { %v6019_v63 = vpop.eup %6018 }
0x15ca   :  { %2483 = vrot.lane.b32.xlu0 %v6019_v63, %s6409_s8 }
0x15cd   :  { %v6021_v52 = vpop.eup %6020 }
0x15ce   :  { %2379 = vrot.lane.b32.xlu1 %v6021_v52, %s6409_s8  ;;  %v6023_v30 = vpop.eup %6022 }
0x15cf   :  { %v2477_v4 = vadd.f32 1.0, %v6023_v30  ;;  %v6025_v59 = vpop.eup %6024 }
0x15d0   :  { %v2373_v5 = vadd.f32 1.0, %v6025_v59  ;;  %v2777_v59 = vld [vmem:[%s7455_s10 + $0x10] sm:$0xff] }
0x15d1   :  { %6026 = vrcp.f32 %v2477_v4 }
0x15d2   :  { %6028 = vrcp.f32 %v2373_v5  ;;  %v2778_v5 = vld [vmem:[%s7455_s10 + $0x18] sm:$0xff] }
0x15db   :  { %v6979_v6 = vpop.eup %6026 }
0x15dc   :  { %v6983_v8 = vpop.eup %6028  ;;  %v2481_v24 = vmul.f32 %v6979_v6, %v2285_v38  ;;  %v2659_v38 = vld [vmem:[%s7457_s12 + $0x20] sm:$0xff] }
0x15dd   :  { %v2377_v14 = vmul.f32 %v6983_v8, %v2181_v43  ;;  %v2518_v43 = vld [vmem:[#allocation16 + $0x38] sm:$0xff] }
0x163c   :  { %v2484_v48 = vpop.permute.xlu0 %2483 }
0x163d   :  { %v2486_v62 = vmul.f32 %v6979_v6, %v2484_v48  ;;  %v7079_v48 = vpack.c.bf16 %v2782_v2, %v2781_v1 }
0x163f   :  { %2488 = vrot.lane.b32.xlu0 %v2486_v62, %s6418_s0  ;;  %v7081_v62 = vpack.c.bf16 %v2778_v5, %v2777_v59 }
0x1640   :  { %v2380_v44 = vpop.permute.xlu1 %2379 }
0x1641   :  { %v2382_v9 = vmul.f32 %v6983_v8, %v2380_v44 }
0x1643   :  { %2384 = vrot.lane.b32.xlu1 %v2382_v9, %s6418_s0 }
0x16b1   :  { %v2489_v12 = vpop.permute.xlu0 %2488 }
0x16b2   :  { %v2491_v13 = vadd.f32 %v2489_v12, %v2481_v24 }
0x16b4   :  { %6030 = vtanh.f32 %v2491_v13 }
0x16b5   :  { %v2385_v15 = vpop.permute.xlu1 %2384 }
0x16b6   :  { %v2387_v16 = vadd.f32 %v2385_v15, %v2377_v14  ;;  %v4719_v14 = vld [vmem:[%s7456_s11] ss:$0 sm:$0xff] }
0x16b7   :  { %v4728_v15 = vld [vmem:[%s7459_s14] ss:$0 sm:$0xff] }
0x16b8   :  { %6032 = vtanh.f32 %v2387_v16 }
0x16be   :  { %v6031_v11 = vpop.eup %6030 }
0x16bf   :  { %2494 = vrot.lane.b32.xlu0 %v6031_v11, %s6409_s8 }
0x16c2   :  { %v6033_v27 = vpop.eup %6032 }
0x16c3   :  { %2390 = vrot.lane.b32.xlu1 %v6033_v27, %s6409_s8 }
0x16c7   :  { %2293 = vrot.lane.b32.xlu1 %v2291_v49, %s6409_s8 }
0x16cb   :  { %1881 = vrot.lane.b32.xlu1 %v6910_v26, %s6409_s8  ;;  %v2660_v26 = vld [vmem:[%s7457_s12 + $0x28] sm:$0xff] }
0x16cc   :  { %v5737_v42 = vpack.c.bf16 %v2660_v26, %v2659_v38 }
0x16ce   :  { %5738 = vmatprep.subr.bf16.mxu0 %v5737_v42 }
0x16cf   :  { %1469 = vrot.lane.b32.xlu1 %v6854_v3, %s6409_s8  ;;  %v2517_v3 = vld [vmem:[#allocation16 + $0x30] sm:$0xff]  ;;  %5740 = vmatpush3.bf16.msra.mxu0 %v5737_v42 }
0x16d0   :  { %v5725_v46 = vpack.c.bf16 %v2518_v43, %v2517_v3 }
0x16d2   :  { %5726 = vmatprep.subr.bf16.mxu1 %v5725_v46 }
0x16d3   :  { %1056 = vrot.lane.b32.xlu1 %v6798_v36, %s6409_s8  ;;  %v2661_v36 = vld [vmem:[%s7457_s12 + $0x30] sm:$0xff]  ;;  %5728 = vmatpush3.bf16.msra.mxu1 %v5725_v46 }
0x16d4   :  { %v5741_v47 = vpack.c.bf16 %v2662_v41, %v2661_v36  ;;  %5745 = vmatprep.subr.bf16.mxu1 %v6415_v37 }
0x16d6   :  { %5742 = vmatprep.subr.bf16.mxu0 %v5741_v47 }
0x16d7   :  { %5744 = vmatpush3.bf16.msra.mxu0 %v5741_v47 }
0x16d8   :  { %5751 = vmatprep.subr.bf16.mxu0 %v6415_v37 }
0x1731   :  { %v2495_v49 = vpop.permute.xlu0 %2494 }
0x1732   :  { %v2497_v50 = vmul.f32 %v6979_v6, %v2495_v49 }
0x1734   :  { %2499 = vrot.lane.b32.xlu0 %v2497_v50, %s6409_s8 }
0x1735   :  { %v2391_v53 = vpop.permute.xlu1 %2390 }
0x1736   :  { %v2393_v57 = vmul.f32 %v6983_v8, %v2391_v53 }
0x1738   :  { %2087 = vrot.lane.b32.xlu0 %v6940_v7, %s6409_s8 }
0x1739   :  { %v2294_v0 = vpop.permute.xlu1 %2293 }
0x173a   :  { %2296 = vst.msk [vmem:[#allocation2 + $0x8] sm:$0xff] %vm1059_vm5, %v2294_v0 }
0x173c   :  { %1675 = vrot.lane.b32.xlu0 %v6882_v35, %s6409_s8 }
0x173d   :  { %v1882_v56 = vpop.permute.xlu1 %1881 }
0x173e   :  { %1884 = vst.msk [vmem:[#allocation2 + $0x18] sm:$0xff] %vm1059_vm5, %v1882_v56 }
0x1740   :  { %1263 = vrot.lane.b32.xlu0 %v6826_v17, %s6409_s8  ;;  %v2779_v17 = vld [vmem:[%s7458_s13] sm:$0xff] }
0x1741   :  { %v1470_v40 = vpop.permute.xlu1 %1469  ;;  %v7054_v63 = vpack.c.bf16 %v2780_v60, %v2779_v17  ;;  %v2504_v6 = vld [vmem:[#allocation2 + $0x8] sm:$0xff] }
0x1742   :  { %1472 = vst.msk [vmem:[#allocation2 + $0x28] sm:$0xff] %vm1059_vm5, %v1470_v40 }
0x1743   :  { %1986 = vst.msk [vmem:[#allocation2 + $0x28] sm:$0xff] %vm856_vm4, %v6950_v10  ;;  %v2775_v10 = vld [vmem:[%s7455_s10] sm:$0xff] }
0x1744   :  { %2395 = vrot.lane.b32.xlu0 %v2393_v57, %s6418_s0  ;;  %v7056_v52 = vpack.c.bf16 %v2776_v61, %v2775_v10 }
0x1745   :  { %v1057_v7 = vpop.permute.xlu1 %1056 }
0x1746   :  { %1060 = vst.msk [vmem:[#allocation2 + $0x38] sm:$0xff] %vm1059_vm5, %v1057_v7 }
0x17a6   :  { %v2500_v35 = vpop.permute.xlu0 %2499 }
0x17a7   :  { %2502 = vst.msk [vmem:[#allocation2] sm:$0xff] %vm1059_vm5, %v2500_v35 }
0x17aa   :  { %v2088_v58 = vpop.permute.xlu0 %2087 }
0x17ab   :  { %2090 = vst.msk [vmem:[#allocation2 + $0x10] sm:$0xff] %vm1059_vm5, %v2088_v58 }
0x17ae   :  { %v1676_v30 = vpop.permute.xlu0 %1675  ;;  %v2503_v4 = vld [vmem:[#allocation2] sm:$0xff] }
0x17af   :  { %1678 = vst.msk [vmem:[#allocation2 + $0x20] sm:$0xff] %vm1059_vm5, %v1676_v30  ;;  %5341 = vmatprep.mubr.msk.f32.mxu1 %vm598_vm2, %v2503_v4  ;;  %5369 = vmatprep.mubr.msk.f32.mxu0 %vm598_vm2, %v2503_v4 }
0x17b0   :  { %1780 = vst.msk [vmem:[#allocation2 + $0x20] sm:$0xff] %vm856_vm4, %v6920_v31  ;;  %5342 = vmatmul.mubr.msk.f32.vlgmr.msra.gmra.mrb[28].mxu1 %vm598_vm2, %v2504_v6  ;;  %5370 = vmatmul.mubr.msk.f32.vlgmr.msra.gmra.mrb[36].mxu0 %vm598_vm2, %v2504_v6  ;;  %v2506_v31 = vld [vmem:[#allocation2 + $0x18] sm:$0xff] }
0x17b1   :  { %5753 = vmatpush3.bf16.msra.mxu0 %v7054_v63  ;;  %5747 = vmatpush3.bf16.msra.mxu1 %v7056_v52 }
0x17b2   :  { %v1264_v8 = vpop.permute.xlu0 %1263  ;;  %v2505_v44 = vld [vmem:[#allocation2 + $0x10] sm:$0xff]  ;;  %5754 = vmatprep.subr.bf16.mxu0 %v6415_v37  ;;  %5748 = vmatprep.subr.bf16.mxu1 %v6415_v37 }
0x17b3   :  { %1266 = vst.msk [vmem:[#allocation2 + $0x30] sm:$0xff] %vm1059_vm5, %v1264_v8  ;;  %5344 = vmatprep.mubr.msk.f32.mxu1 %vm598_vm2, %v2505_v44  ;;  %5372 = vmatprep.mubr.msk.f32.mxu0 %vm598_vm2, %v2505_v44 }
0x17b4   :  { %2192 = vst.msk [vmem:[#allocation2 + $0x30] sm:$0xff] %vm856_vm4, %v6971_v54  ;;  %5345 = vmatmul.mubr.msk.f32.gmra.mrb[30].mxu1 %vm598_vm2, %v2506_v31  ;;  %5373 = vmatmul.mubr.msk.f32.gmra.mrb[38].mxu0 %vm598_vm2, %v2506_v31  ;;  %v2508_v54 = vld [vmem:[#allocation2 + $0x28] sm:$0xff] }
0x17b5   :  { %5756 = vmatpush3.bf16.msra.mxu0 %v7079_v48  ;;  %5750 = vmatpush3.bf16.msra.mxu1 %v7081_v62 }
0x17b6   :  { %v2396_v9 = vpop.permute.xlu0 %2395  ;;  %5757 = vmatprep.subr.bf16.mxu1 %v6415_v37  ;;  %5763 = vmatprep.subr.bf16.mxu0 %v6415_v37 }
0x17b7   :  { %2398 = vst.msk [vmem:[#allocation2 + $0x38] sm:$0xff] %vm856_vm4, %v2396_v9  ;;  %v2507_v24 = vld [vmem:[#allocation2 + $0x20] sm:$0xff] }
0x17b8   :  { %5347 = vmatprep.mubr.msk.f32.mxu1 %vm598_vm2, %v2507_v24  ;;  %5375 = vmatprep.mubr.msk.f32.mxu0 %vm598_vm2, %v2507_v24 }
0x17b9   :  { %5348 = vmatmul.mubr.msk.f32.gmra.mrb[32].mxu1 %vm598_vm2, %v2508_v54  ;;  %5376 = vmatmul.mubr.msk.f32.gmra.mrb[40].mxu0 %vm598_vm2, %v2508_v54 }
0x17bb   :  { %v2509_v12 = vld [vmem:[#allocation2 + $0x30] sm:$0xff] }
0x17bc   :  { %5350 = vmatprep.mubr.msk.f32.mxu1 %vm598_vm2, %v2509_v12  ;;  %5378 = vmatprep.mubr.msk.f32.mxu0 %vm598_vm2, %v2509_v12 }
0x17be   :  { %v2510_v13 = vld [vmem:[#allocation2 + $0x38] sm:$0xff] }
0x17bf   :  { %5351 = vmatmul.mubr.msk.f32.gmra.mrb[34].mxu1 %vm598_vm2, %v2510_v13  ;;  %5379 = vmatmul.mubr.msk.f32.gmra.mrb[42].mxu0 %vm598_vm2, %v2510_v13 }
0x17c0   :  { %5389 = vmatprep.mubr.msk.f32.mxu1 %vm6416_vm3, %v6417_v23  ;;  %5400 = vmatprep.mubr.msk.f32.mxu0 %vm6416_vm3, %v6417_v23 }
0x17c3   :  { %5390 = vmatmul.mubr.f32.vlgmr.msra.gmra.mrb[36].mxu1 %v6417_v23  ;;  %5401 = vmatmul.mubr.f32.vlgmr.msra.gmra.mrb[44].mxu0 %v6417_v23 }
0x17c4   :  { %5759 = vmatpush3.bf16.msra.mxu1 %v7056_v52  ;;  %5765 = vmatpush3.bf16.msra.mxu0 %v7054_v63 }
0x17c5   :  { %5760 = vmatprep.subr.bf16.mxu1 %v6415_v37  ;;  %5766 = vmatprep.subr.bf16.mxu0 %v6415_v37 }
0x17c6   :  { %5422 = vmatprep.mubr.msk.f32.mxu0 %vm6416_vm3, %v6417_v23  ;;  %5411 = vmatprep.mubr.msk.f32.mxu1 %vm6416_vm3, %v6417_v23 }
0x17c8   :  { %5762 = vmatpush3.bf16.msra.mxu1 %v7081_v62  ;;  %5768 = vmatpush3.bf16.msra.mxu0 %v7079_v48 }
0x17c9   :  { %5769 = vmatprep.subr.bf16.mxu1 %v6415_v37  ;;  %5775 = vmatprep.subr.bf16.mxu0 %v6415_v37 }
0x1883   :  { %v5343_v16 = vpop.f32.mrb[28].mxu1  ;;  %v5371_v11 = vpop.f32.mrb[36].mxu0 }
0x1884   :  { %v7129_v27 = vadd.f32 %v5343_v16, %v4719_v14  ;;  %v7131_v18 = vadd.f32 %v5371_v11, %v4728_v15  ;;  %v2616_v19 = vpop.f32.mrb[29].mxu1  ;;  %v2736_v20 = vpop.f32.mrb[37].mxu0 }
0x1885   :  { %v7133_v21 = vadd.f32 %v4728_v15, %v2736_v20  ;;  %v2617_v0 = vadd.f32 %v4719_v14, %v2616_v19 }
0x1887   :  { %v5346_v55 = vpop.f32.mrb[30].mxu1  ;;  %v5374_v22 = vpop.f32.mrb[38].mxu0 }
0x1888   :  { %v7135_v45 = vadd.f32 %v5346_v55, %v4719_v14  ;;  %v7137_v51 = vadd.f32 %v5374_v22, %v4728_v15  ;;  %v2626_v25 = vpop.f32.mrb[31].mxu1  ;;  %v2746_v33 = vpop.f32.mrb[39].mxu0 }
0x1889   :  { %v7139_v28 = vadd.f32 %v4719_v14, %v2626_v25  ;;  %v7141_v29 = vadd.f32 %v4728_v15, %v2746_v33 }
0x188c   :  { %v5349_v32 = vpop.f32.mrb[32].mxu1  ;;  %v5377_v34 = vpop.f32.mrb[40].mxu0 }
0x188d   :  { %v7143_v38 = vadd.f32 %v5349_v32, %v4719_v14  ;;  %v7145_v39 = vadd.f32 %v5377_v34, %v4728_v15  ;;  %v2636_v26 = vpop.f32.mrb[33].mxu1  ;;  %v2756_v42 = vpop.f32.mrb[41].mxu0 }
0x188e   :  { %v7147_v3 = vadd.f32 %v4719_v14, %v2636_v26  ;;  %v7149_v43 = vadd.f32 %v4728_v15, %v2756_v42 }
0x1892   :  { %v5352_v36 = vpop.f32.mrb[34].mxu1  ;;  %v5380_v46 = vpop.f32.mrb[42].mxu0 }
0x1893   :  { %v7151_v41 = vadd.f32 %v5352_v36, %v4719_v14  ;;  %v2646_v47 = vpop.f32.mrb[35].mxu1  ;;  %v2766_v49 = vpop.f32.mrb[43].mxu0  ;;  %v2772_v56 = vadd.f32 %v5380_v46, %v4728_v15 }
0x1894   :  { %v7153_v50 = vadd.f32 %v4719_v14, %v2646_v47  ;;  %v7155_v53 = vadd.f32 %v4728_v15, %v2766_v49 }
0x1896   :  { %v2849_v40 = vpop.f32.mrb[36].mxu1  ;;  %v2949_v57 = vpop.f32.mrb[44].mxu0 }
0x1897   :  { %v2853_v7 = vadd.f32 %v2849_v40, %v2617_v0  ;;  %v2953_v35 = vadd.f32 %v2949_v57, %v2772_v56  ;;  %v5402_v17 = vpop.f32.mrb[45].mxu0  ;;  %v5391_v58 = vpop.f32.mrb[37].mxu1 }
0x1899   :  { %6034 = vtanh.f32 %v2853_v7  ;;  %v4737_v61 = vmul.f32 -1.442695, %v2853_v7  ;;  %v4738_v1 = vmul.f32 -1.442695, %v2953_v35 }
0x189a   :  { %6036 = vtanh.f32 %v2953_v35 }
0x189b   :  { %6038 = vpow2.f32 %v4737_v61 }
0x189c   :  { %6040 = vpow2.f32 %v4738_v1 }
0x18a3   :  { %v6035_v60 = vpop.eup %6034 }
0x18a4   :  { %v6037_v10 = vpop.eup %6036  ;;  %2863 = vrot.lane.b32.xlu0 %v6035_v60, %s6409_s8 }
0x18a5   :  { %2963 = vrot.lane.b32.xlu1 %v6037_v10, %s6409_s8  ;;  %v6039_v2 = vpop.eup %6038 }
0x18a6   :  { %v6041_v30 = vpop.eup %6040  ;;  %v2857_v4 = vadd.f32 1.0, %v6039_v2 }
0x18a7   :  { %v2957_v59 = vadd.f32 1.0, %v6041_v30 }
0x18a8   :  { %6042 = vrcp.f32 %v2857_v4 }
0x18a9   :  { %6044 = vrcp.f32 %v2957_v59 }
0x18b2   :  { %v6043_v5 = vpop.eup %6042 }
0x18b3   :  { %v6045_v8 = vpop.eup %6044  ;;  %v2861_v24 = vmul.f32 0.0, %v6043_v5 }
0x18b4   :  { %v2961_v54 = vmul.f32 0.0, %v6045_v8 }
0x1916   :  { %v2864_v6 = vpop.permute.xlu0 %2863 }
0x1917   :  { %v2964_v44 = vpop.permute.xlu1 %2963  ;;  %v2866_v31 = vmul.f32 %v6043_v5, %v2864_v6 }
0x1918   :  { %v2966_v9 = vmul.f32 %v6045_v8, %v2964_v44 }
0x1919   :  { %2868 = vrot.lane.b32.xlu0 %v2866_v31, %s6418_s0 }
0x191a   :  { %2968 = vrot.lane.b32.xlu1 %v2966_v9, %s6418_s0 }
0x198b   :  { %v2869_v12 = vpop.permute.xlu0 %2868 }
0x198c   :  { %v2969_v13 = vpop.permute.xlu1 %2968  ;;  %v2871_v14 = vadd.f32 %v2869_v12, %v2861_v24 }
0x198d   :  { %v2971_v15 = vadd.f32 %v2969_v13, %v2961_v54 }
0x198e   :  { %6046 = vtanh.f32 %v2871_v14 }
0x198f   :  { %6048 = vtanh.f32 %v2971_v15 }
0x1998   :  { %v6047_v16 = vpop.eup %6046 }
0x1999   :  { %v6049_v11 = vpop.eup %6048  ;;  %2874 = vrot.lane.b32.xlu0 %v6047_v16, %s6409_s8 }
0x199a   :  { %2974 = vrot.lane.b32.xlu1 %v6049_v11, %s6409_s8 }
0x1a0b   :  { %v2875_v19 = vpop.permute.xlu0 %2874 }
0x1a0c   :  { %v2975_v20 = vpop.permute.xlu1 %2974  ;;  %v2877_v55 = vmul.f32 %v6043_v5, %v2875_v19 }
0x1a0d   :  { %v7163_v22 = vmul.f32 %v6045_v8, %v2975_v20 }
0x1a0e   :  { %2879 = vrot.lane.b32.xlu0 %v2877_v55, %s6418_s0 }
0x1a0f   :  { %3085 = vrot.lane.b32.xlu1 %v7163_v22, %s6418_s0 }
0x1a80   :  { %v2880_v25 = vpop.permute.xlu0 %2879 }
0x1a81   :  { %v3086_v33 = vpop.permute.xlu1 %3085  ;;  %2882 = vst.msk [vmem:[#allocation2] sm:$0xff] %vm856_vm4, %v2880_v25  ;;  %5412 = vmatmul.mubr.msk.f32.vlgmr.msra.gmra.mrb[38].mxu1 %vm856_vm4, %v2880_v25 }
0x1a82   :  { %5423 = vmatmul.mubr.msk.f32.vlgmr.msra.gmra.mrb[46].mxu0 %vm856_vm4, %v3086_v33  ;;  %5771 = vmatpush3.bf16.msra.mxu1 %v7056_v52 }
0x1a83   :  { %5777 = vmatpush3.bf16.msra.mxu0 %v7054_v63  ;;  %5772 = vmatprep.subr.bf16.mxu1 %v6415_v37 }
0x1a84   :  { %5778 = vmatprep.subr.bf16.mxu0 %v6415_v37  ;;  %5444 = vmatprep.mubr.msk.f32.mxu0 %vm6416_vm3, %v6417_v23 }
0x1a85   :  { %5433 = vmatprep.mubr.msk.f32.mxu1 %vm6416_vm3, %v6417_v23 }
0x1a86   :  { %5774 = vmatpush3.bf16.msra.mxu1 %v7081_v62 }
0x1a87   :  { %5780 = vmatpush3.bf16.msra.mxu0 %v7079_v48  ;;  %5781 = vmatprep.subr.bf16.mxu1 %v6415_v37 }
0x1a88   :  { %5787 = vmatprep.subr.bf16.mxu0 %v6415_v37 }
0x1b54   :  { %v3051_v32 = vpop.f32.mrb[38].mxu1 }
0x1b55   :  { %v3055_v34 = vadd.f32 %v3051_v32, %v7129_v27  ;;  %v3155_v26 = vpop.f32.mrb[46].mxu0  ;;  %v5413_v42 = vpop.f32.mrb[39].mxu1 }
0x1b56   :  { %v3159_v36 = vadd.f32 %v3155_v26, %v7155_v53  ;;  %v5424_v46 = vpop.f32.mrb[47].mxu0 }
0x1b57   :  { %6050 = vtanh.f32 %v3055_v34  ;;  %v4740_v0 = vmul.f32 -1.442695, %v3055_v34 }
0x1b58   :  { %6052 = vtanh.f32 %v3159_v36  ;;  %v4742_v56 = vmul.f32 -1.442695, %v3159_v36 }
0x1b59   :  { %6054 = vpow2.f32 %v4740_v0 }
0x1b5a   :  { %6056 = vpow2.f32 %v4742_v56 }
0x1b61   :  { %v6051_v47 = vpop.eup %6050 }
0x1b62   :  { %v6053_v49 = vpop.eup %6052  ;;  %3065 = vrot.lane.b32.xlu0 %v6051_v47, %s6409_s8 }
0x1b63   :  { %3169 = vrot.lane.b32.xlu1 %v6053_v49, %s6409_s8  ;;  %v6055_v40 = vpop.eup %6054 }
0x1b64   :  { %v6057_v57 = vpop.eup %6056  ;;  %v3059_v27 = vadd.f32 1.0, %v6055_v40 }
0x1b65   :  { %v3163_v7 = vadd.f32 1.0, %v6057_v57 }
0x1b66   :  { %6058 = vrcp.f32 %v3059_v27 }
0x1b67   :  { %6060 = vrcp.f32 %v3163_v7 }
0x1b70   :  { %v6059_v53 = vpop.eup %6058 }
0x1b71   :  { %v6061_v17 = vpop.eup %6060  ;;  %v3063_v61 = vmul.f32 %v6059_v53, %v2871_v14 }
0x1b72   :  { %v3167_v1 = vmul.f32 %v6061_v17, %v2971_v15 }
0x1bd4   :  { %v3066_v35 = vpop.permute.xlu0 %3065 }
0x1bd5   :  { %v3170_v58 = vpop.permute.xlu1 %3169  ;;  %v3068_v60 = vmul.f32 %v6059_v53, %v3066_v35 }
0x1bd6   :  { %v3172_v10 = vmul.f32 %v6061_v17, %v3170_v58 }
0x1bd7   :  { %3070 = vrot.lane.b32.xlu0 %v3068_v60, %s6418_s0 }
0x1bd8   :  { %3174 = vrot.lane.b32.xlu1 %v3172_v10, %s6418_s0 }
0x1c49   :  { %v3071_v2 = vpop.permute.xlu0 %3070 }
0x1c4a   :  { %v3175_v30 = vpop.permute.xlu1 %3174  ;;  %v3073_v4 = vadd.f32 %v3071_v2, %v3063_v61 }
0x1c4b   :  { %v3177_v59 = vadd.f32 %v3175_v30, %v3167_v1 }
0x1c4c   :  { %6062 = vtanh.f32 %v3073_v4 }
0x1c4d   :  { %6064 = vtanh.f32 %v3177_v59 }
0x1c56   :  { %v6063_v5 = vpop.eup %6062 }
0x1c57   :  { %v6065_v6 = vpop.eup %6064  ;;  %3076 = vrot.lane.b32.xlu0 %v6063_v5, %s6409_s8 }
0x1c58   :  { %3180 = vrot.lane.b32.xlu1 %v6065_v6, %s6409_s8 }
0x1cc9   :  { %v3077_v8 = vpop.permute.xlu0 %3076 }
0x1cca   :  { %v3181_v44 = vpop.permute.xlu1 %3180  ;;  %v3079_v31 = vmul.f32 %v6059_v53, %v3077_v8 }
0x1ccb   :  { %v7191_v9 = vmul.f32 %v6061_v17, %v3181_v44 }
0x1ccc   :  { %3081 = vrot.lane.b32.xlu0 %v3079_v31, %s6418_s0 }
0x1ccd   :  { %3291 = vrot.lane.b32.xlu1 %v7191_v9, %s6418_s0 }
0x1d3e   :  { %v3082_v24 = vpop.permute.xlu0 %3081 }
0x1d3f   :  { %v3292_v54 = vpop.permute.xlu1 %3291  ;;  %3084 = vst.msk [vmem:[#allocation2 + $0x8] sm:$0xff] %vm856_vm4, %v3082_v24  ;;  %5434 = vmatmul.mubr.msk.f32.vlgmr.msra.gmra.mrb[40].mxu1 %vm856_vm4, %v3082_v24 }
0x1d40   :  { %5445 = vmatmul.mubr.msk.f32.vlgmr.msra.gmra.mrb[48].mxu0 %vm856_vm4, %v3292_v54  ;;  %5783 = vmatpush3.bf16.msra.mxu1 %v7056_v52 }
0x1d41   :  { %5789 = vmatpush3.bf16.msra.mxu0 %v7054_v63  ;;  %5784 = vmatprep.subr.bf16.mxu1 %v6415_v37 }
0x1d42   :  { %5790 = vmatprep.subr.bf16.mxu0 %v6415_v37  ;;  %5466 = vmatprep.mubr.msk.f32.mxu0 %vm6416_vm3, %v6417_v23 }
0x1d43   :  { %5455 = vmatprep.mubr.msk.f32.mxu1 %vm6416_vm3, %v6417_v23 }
0x1d44   :  { %5786 = vmatpush3.bf16.msra.mxu1 %v7081_v62 }
0x1d45   :  { %5792 = vmatpush3.bf16.msra.mxu0 %v7079_v48  ;;  %5793 = vmatprep.subr.bf16.mxu1 %v6415_v37 }
0x1d46   :  { %5799 = vmatprep.subr.bf16.mxu0 %v6415_v37 }
0x1e12   :  { %v3257_v12 = vpop.f32.mrb[40].mxu1 }
0x1e13   :  { %v3261_v13 = vadd.f32 %v3257_v12, %v7139_v28  ;;  %v3361_v14 = vpop.f32.mrb[48].mxu0  ;;  %v5435_v15 = vpop.f32.mrb[41].mxu1 }
0x1e14   :  { %v3365_v16 = vadd.f32 %v3361_v14, %v7145_v39  ;;  %v5446_v11 = vpop.f32.mrb[49].mxu0 }
0x1e15   :  { %6066 = vtanh.f32 %v3261_v13  ;;  %v4744_v55 = vmul.f32 -1.442695, %v3261_v13 }
0x1e16   :  { %6068 = vtanh.f32 %v3365_v16  ;;  %v4746_v25 = vmul.f32 -1.442695, %v3365_v16 }
0x1e17   :  { %6070 = vpow2.f32 %v4744_v55 }
0x1e18   :  { %6072 = vpow2.f32 %v4746_v25 }
0x1e1f   :  { %v6067_v19 = vpop.eup %6066 }
0x1e20   :  { %v6069_v20 = vpop.eup %6068  ;;  %3271 = vrot.lane.b32.xlu0 %v6067_v19, %s6409_s8 }
0x1e21   :  { %3375 = vrot.lane.b32.xlu1 %v6069_v20, %s6409_s8  ;;  %v6071_v33 = vpop.eup %6070 }
0x1e22   :  { %v6073_v32 = vpop.eup %6072  ;;  %v3265_v28 = vadd.f32 1.0, %v6071_v33 }
0x1e23   :  { %v3369_v34 = vadd.f32 1.0, %v6073_v32 }
0x1e24   :  { %6074 = vrcp.f32 %v3265_v28 }
0x1e25   :  { %6076 = vrcp.f32 %v3369_v34 }
0x1e2e   :  { %v6075_v39 = vpop.eup %6074 }
0x1e2f   :  { %v6077_v42 = vpop.eup %6076  ;;  %v3269_v49 = vmul.f32 %v6075_v39, %v3073_v4 }
0x1e30   :  { %v3373_v0 = vmul.f32 %v6077_v42, %v3177_v59 }
0x1e92   :  { %v3272_v26 = vpop.permute.xlu0 %3271 }
0x1e93   :  { %v3376_v36 = vpop.permute.xlu1 %3375  ;;  %v3274_v46 = vmul.f32 %v6075_v39, %v3272_v26 }
0x1e94   :  { %v3378_v47 = vmul.f32 %v6077_v42, %v3376_v36 }
0x1e95   :  { %3276 = vrot.lane.b32.xlu0 %v3274_v46, %s6418_s0 }
0x1e96   :  { %3380 = vrot.lane.b32.xlu1 %v3378_v47, %s6418_s0 }
0x1f07   :  { %v3277_v56 = vpop.permute.xlu0 %3276 }
0x1f08   :  { %v3381_v40 = vpop.permute.xlu1 %3380  ;;  %v3279_v57 = vadd.f32 %v3277_v56, %v3269_v49 }
0x1f09   :  { %v3383_v27 = vadd.f32 %v3381_v40, %v3373_v0 }
0x1f0a   :  { %6078 = vtanh.f32 %v3279_v57 }
0x1f0b   :  { %6080 = vtanh.f32 %v3383_v27 }
0x1f14   :  { %v6079_v7 = vpop.eup %6078 }
0x1f15   :  { %v6081_v53 = vpop.eup %6080  ;;  %3282 = vrot.lane.b32.xlu0 %v6079_v7, %s6409_s8 }
0x1f16   :  { %3386 = vrot.lane.b32.xlu1 %v6081_v53, %s6409_s8 }
0x1f87   :  { %v3283_v35 = vpop.permute.xlu0 %3282 }
0x1f88   :  { %v3387_v17 = vpop.permute.xlu1 %3386  ;;  %v3285_v58 = vmul.f32 %v6075_v39, %v3283_v35 }
0x1f89   :  { %v7219_v60 = vmul.f32 %v6077_v42, %v3387_v17 }
0x1f8a   :  { %3287 = vrot.lane.b32.xlu0 %v3285_v58, %s6418_s0 }
0x1f8b   :  { %3497 = vrot.lane.b32.xlu1 %v7219_v60, %s6418_s0 }
0x1ffc   :  { %v3288_v10 = vpop.permute.xlu0 %3287 }
0x1ffd   :  { %v3498_v61 = vpop.permute.xlu1 %3497  ;;  %3290 = vst.msk [vmem:[#allocation2 + $0x10] sm:$0xff] %vm856_vm4, %v3288_v10  ;;  %5456 = vmatmul.mubr.msk.f32.vlgmr.msra.gmra.mrb[42].mxu1 %vm856_vm4, %v3288_v10 }
0x1ffe   :  { %5467 = vmatmul.mubr.msk.f32.vlgmr.msra.gmra.mrb[50].mxu0 %vm856_vm4, %v3498_v61  ;;  %5795 = vmatpush3.bf16.msra.mxu1 %v7056_v52 }
0x1fff   :  { %5801 = vmatpush3.bf16.msra.mxu0 %v7054_v63  ;;  %5796 = vmatprep.subr.bf16.mxu1 %v6415_v37 }
0x2000   :  { %5802 = vmatprep.subr.bf16.mxu0 %v6415_v37  ;;  %5488 = vmatprep.mubr.msk.f32.mxu0 %vm6416_vm3, %v6417_v23 }
0x2001   :  { %5477 = vmatprep.mubr.msk.f32.mxu1 %vm6416_vm3, %v6417_v23 }
0x2002   :  { %5798 = vmatpush3.bf16.msra.mxu1 %v7081_v62 }
0x2003   :  { %5804 = vmatpush3.bf16.msra.mxu0 %v7079_v48  ;;  %5805 = vmatprep.subr.bf16.mxu1 %v6415_v37 }
0x2004   :  { %5811 = vmatprep.subr.bf16.mxu0 %v6415_v37 }
0x20d0   :  { %v3463_v1 = vpop.f32.mrb[42].mxu1 }
0x20d1   :  { %v3467_v2 = vadd.f32 %v3463_v1, %v7135_v45  ;;  %v3567_v30 = vpop.f32.mrb[50].mxu0  ;;  %v5457_v4 = vpop.f32.mrb[43].mxu1 }
0x20d2   :  { %v3571_v59 = vadd.f32 %v3567_v30, %v7149_v43  ;;  %v5468_v5 = vpop.f32.mrb[51].mxu0 }
0x20d3   :  { %6082 = vtanh.f32 %v3467_v2  ;;  %v4748_v44 = vmul.f32 -1.442695, %v3467_v2 }
0x20d4   :  { %6084 = vtanh.f32 %v3571_v59  ;;  %v4750_v31 = vmul.f32 -1.442695, %v3571_v59 }
0x20d5   :  { %6086 = vpow2.f32 %v4748_v44 }
0x20d6   :  { %6088 = vpow2.f32 %v4750_v31 }
0x20dd   :  { %v6083_v6 = vpop.eup %6082 }
0x20de   :  { %v6085_v8 = vpop.eup %6084  ;;  %3477 = vrot.lane.b32.xlu0 %v6083_v6, %s6409_s8 }
0x20df   :  { %3581 = vrot.lane.b32.xlu1 %v6085_v8, %s6409_s8  ;;  %v6087_v24 = vpop.eup %6086 }
0x20e0   :  { %v6089_v54 = vpop.eup %6088  ;;  %v3471_v45 = vadd.f32 1.0, %v6087_v24 }
0x20e1   :  { %v3575_v12 = vadd.f32 1.0, %v6089_v54 }
0x20e2   :  { %6090 = vrcp.f32 %v3471_v45 }
0x20e3   :  { %6092 = vrcp.f32 %v3575_v12 }
0x20ec   :  { %v6091_v43 = vpop.eup %6090 }
0x20ed   :  { %v6093_v14 = vpop.eup %6092  ;;  %v3475_v19 = vmul.f32 %v6091_v43, %v3279_v57 }
0x20ee   :  { %v3579_v20 = vmul.f32 %v6093_v14, %v3383_v27 }
0x2150   :  { %v3478_v13 = vpop.permute.xlu0 %3477 }
0x2151   :  { %v3582_v15 = vpop.permute.xlu1 %3581  ;;  %v3480_v16 = vmul.f32 %v6091_v43, %v3478_v13 }
0x2152   :  { %v3584_v11 = vmul.f32 %v6093_v14, %v3582_v15 }
0x2153   :  { %3482 = vrot.lane.b32.xlu0 %v3480_v16, %s6418_s0 }
0x2154   :  { %3586 = vrot.lane.b32.xlu1 %v3584_v11, %s6418_s0 }
0x21c5   :  { %v3483_v55 = vpop.permute.xlu0 %3482 }
0x21c6   :  { %v3587_v25 = vpop.permute.xlu1 %3586  ;;  %v3485_v33 = vadd.f32 %v3483_v55, %v3475_v19 }
0x21c7   :  { %v3589_v32 = vadd.f32 %v3587_v25, %v3579_v20 }
0x21c8   :  { %6094 = vtanh.f32 %v3485_v33 }
0x21c9   :  { %6096 = vtanh.f32 %v3589_v32 }
0x21d2   :  { %v6095_v28 = vpop.eup %6094 }
0x21d3   :  { %v6097_v34 = vpop.eup %6096  ;;  %3488 = vrot.lane.b32.xlu0 %v6095_v28, %s6409_s8 }
0x21d4   :  { %3592 = vrot.lane.b32.xlu1 %v6097_v34, %s6409_s8 }
0x2245   :  { %v3489_v39 = vpop.permute.xlu0 %3488 }
0x2246   :  { %v3593_v26 = vpop.permute.xlu1 %3592  ;;  %v3491_v42 = vmul.f32 %v6091_v43, %v3489_v39 }
0x2247   :  { %v7247_v36 = vmul.f32 %v6093_v14, %v3593_v26 }
0x2248   :  { %3493 = vrot.lane.b32.xlu0 %v3491_v42, %s6418_s0 }
0x2249   :  { %3703 = vrot.lane.b32.xlu1 %v7247_v36, %s6418_s0 }
0x22ba   :  { %v3494_v46 = vpop.permute.xlu0 %3493 }
0x22bb   :  { %v3704_v47 = vpop.permute.xlu1 %3703  ;;  %3496 = vst.msk [vmem:[#allocation2 + $0x18] sm:$0xff] %vm856_vm4, %v3494_v46  ;;  %5478 = vmatmul.mubr.msk.f32.vlgmr.msra.gmra.mrb[44].mxu1 %vm856_vm4, %v3494_v46 }
0x22bc   :  { %5489 = vmatmul.mubr.msk.f32.vlgmr.msra.gmra.mrb[52].mxu0 %vm856_vm4, %v3704_v47  ;;  %5807 = vmatpush3.bf16.msra.mxu1 %v7056_v52 }
0x22bd   :  { %5813 = vmatpush3.bf16.msra.mxu0 %v7054_v63  ;;  %5808 = vmatprep.subr.bf16.mxu1 %v6415_v37 }
0x22be   :  { %5814 = vmatprep.subr.bf16.mxu0 %v6415_v37  ;;  %5510 = vmatprep.mubr.msk.f32.mxu0 %vm6416_vm3, %v6417_v23 }
0x22bf   :  { %5499 = vmatprep.mubr.msk.f32.mxu1 %vm6416_vm3, %v6417_v23 }
0x22c0   :  { %5810 = vmatpush3.bf16.msra.mxu1 %v7081_v62 }
0x22c1   :  { %5816 = vmatpush3.bf16.msra.mxu0 %v7079_v48  ;;  %5817 = vmatprep.subr.bf16.mxu1 %v6415_v37 }
0x22c2   :  { %5823 = vmatprep.subr.bf16.mxu0 %v6415_v37 }
0x238e   :  { %v3669_v49 = vpop.f32.mrb[44].mxu1 }
0x238f   :  { %v3673_v0 = vadd.f32 %v3669_v49, %v7147_v3  ;;  %v3773_v56 = vpop.f32.mrb[52].mxu0  ;;  %v5479_v40 = vpop.f32.mrb[45].mxu1 }
0x2390   :  { %v3777_v57 = vadd.f32 %v3773_v56, %v7137_v51  ;;  %v5490_v27 = vpop.f32.mrb[53].mxu0 }
0x2391   :  { %6098 = vtanh.f32 %v3673_v0  ;;  %v4752_v35 = vmul.f32 -1.442695, %v3673_v0 }
0x2392   :  { %6100 = vtanh.f32 %v3777_v57  ;;  %v4754_v17 = vmul.f32 -1.442695, %v3777_v57 }
0x2393   :  { %6102 = vpow2.f32 %v4752_v35 }
0x2394   :  { %6104 = vpow2.f32 %v4754_v17 }
0x239b   :  { %v6099_v7 = vpop.eup %6098 }
0x239c   :  { %v6101_v53 = vpop.eup %6100  ;;  %3683 = vrot.lane.b32.xlu0 %v6099_v7, %s6409_s8 }
0x239d   :  { %3787 = vrot.lane.b32.xlu1 %v6101_v53, %s6409_s8  ;;  %v6103_v58 = vpop.eup %6102 }
0x239e   :  { %v6105_v10 = vpop.eup %6104  ;;  %v3677_v3 = vadd.f32 1.0, %v6103_v58 }
0x239f   :  { %v3781_v61 = vadd.f32 1.0, %v6105_v10 }
0x23a0   :  { %6106 = vrcp.f32 %v3677_v3 }
0x23a1   :  { %6108 = vrcp.f32 %v3781_v61 }
0x23aa   :  { %v6107_v51 = vpop.eup %6106 }
0x23ab   :  { %v6109_v2 = vpop.eup %6108  ;;  %v3681_v5 = vmul.f32 %v6107_v51, %v3485_v33 }
0x23ac   :  { %v3785_v6 = vmul.f32 %v6109_v2, %v3589_v32 }
0x240e   :  { %v3684_v1 = vpop.permute.xlu0 %3683 }
0x240f   :  { %v3788_v30 = vpop.permute.xlu1 %3787  ;;  %v3686_v4 = vmul.f32 %v6107_v51, %v3684_v1 }
0x2410   :  { %v3790_v59 = vmul.f32 %v6109_v2, %v3788_v30 }
0x2411   :  { %3688 = vrot.lane.b32.xlu0 %v3686_v4, %s6418_s0 }
0x2412   :  { %3792 = vrot.lane.b32.xlu1 %v3790_v59, %s6418_s0 }
0x2483   :  { %v3689_v8 = vpop.permute.xlu0 %3688 }
0x2484   :  { %v3793_v44 = vpop.permute.xlu1 %3792  ;;  %v3691_v31 = vadd.f32 %v3689_v8, %v3681_v5 }
0x2485   :  { %v3795_v24 = vadd.f32 %v3793_v44, %v3785_v6 }
0x2486   :  { %6110 = vtanh.f32 %v3691_v31 }
0x2487   :  { %6112 = vtanh.f32 %v3795_v24 }
0x2490   :  { %v6111_v54 = vpop.eup %6110 }
0x2491   :  { %v6113_v45 = vpop.eup %6112  ;;  %3694 = vrot.lane.b32.xlu0 %v6111_v54, %s6409_s8 }
0x2492   :  { %3798 = vrot.lane.b32.xlu1 %v6113_v45, %s6409_s8 }
0x2503   :  { %v3695_v12 = vpop.permute.xlu0 %3694 }
0x2504   :  { %v3799_v43 = vpop.permute.xlu1 %3798  ;;  %v3697_v13 = vmul.f32 %v6107_v51, %v3695_v12 }
0x2505   :  { %v7275_v14 = vmul.f32 %v6109_v2, %v3799_v43 }
0x2506   :  { %3699 = vrot.lane.b32.xlu0 %v3697_v13, %s6418_s0 }
0x2507   :  { %3909 = vrot.lane.b32.xlu1 %v7275_v14, %s6418_s0 }
0x2578   :  { %v7280_v15 = vpop.permute.xlu0 %3699 }
0x2579   :  { %v3910_v16 = vpop.permute.xlu1 %3909  ;;  %5500 = vmatmul.mubr.msk.f32.vlgmr.msra.gmra.mrb[46].mxu1 %vm856_vm4, %v7280_v15 }
0x257a   :  { %5511 = vmatmul.mubr.msk.f32.vlgmr.msra.gmra.mrb[54].mxu0 %vm856_vm4, %v3910_v16  ;;  %5819 = vmatpush3.bf16.msra.mxu1 %v7056_v52 }
0x257b   :  { %5825 = vmatpush3.bf16.msra.mxu0 %v7054_v63  ;;  %5820 = vmatprep.subr.bf16.mxu1 %v6415_v37 }
0x257c   :  { %5826 = vmatprep.subr.bf16.mxu0 %v6415_v37  ;;  %5532 = vmatprep.mubr.msk.f32.mxu0 %vm6416_vm3, %v6417_v23 }
0x257d   :  { %5521 = vmatprep.mubr.msk.f32.mxu1 %vm6416_vm3, %v6417_v23 }
0x257e   :  { %5822 = vmatpush3.bf16.msra.mxu1 %v7081_v62 }
0x257f   :  { %5828 = vmatpush3.bf16.msra.mxu0 %v7079_v48  ;;  %5829 = vmatprep.subr.bf16.mxu1 %v6415_v37 }
0x2580   :  { %5835 = vmatprep.subr.bf16.mxu0 %v6415_v37 }
0x264c   :  { %v3875_v11 = vpop.f32.mrb[46].mxu1 }
0x264d   :  { %v3879_v19 = vadd.f32 %v3875_v11, %v7143_v38  ;;  %v3979_v20 = vpop.f32.mrb[54].mxu0  ;;  %v5501_v55 = vpop.f32.mrb[47].mxu1 }
0x264e   :  { %v3983_v25 = vadd.f32 %v3979_v20, %v7141_v29  ;;  %v5512_v33 = vpop.f32.mrb[55].mxu0 }
0x264f   :  { %6114 = vtanh.f32 %v3879_v19  ;;  %v4756_v34 = vmul.f32 -1.442695, %v3879_v19 }
0x2650   :  { %6116 = vtanh.f32 %v3983_v25  ;;  %v4758_v39 = vmul.f32 -1.442695, %v3983_v25 }
0x2651   :  { %6118 = vpow2.f32 %v4756_v34 }
0x2652   :  { %6120 = vpow2.f32 %v4758_v39 }
0x2659   :  { %v6115_v32 = vpop.eup %6114 }
0x265a   :  { %v6117_v28 = vpop.eup %6116  ;;  %3889 = vrot.lane.b32.xlu0 %v6115_v32, %s6409_s8 }
0x265b   :  { %3993 = vrot.lane.b32.xlu1 %v6117_v28, %s6409_s8  ;;  %v6119_v26 = vpop.eup %6118 }
0x265c   :  { %v6121_v42 = vpop.eup %6120  ;;  %v3883_v38 = vadd.f32 1.0, %v6119_v26 }
0x265d   :  { %v3987_v46 = vadd.f32 1.0, %v6121_v42 }
0x265e   :  { %6122 = vrcp.f32 %v3883_v38 }
0x265f   :  { %6124 = vrcp.f32 %v3987_v46 }
0x2668   :  { %v6123_v29 = vpop.eup %6122 }
0x2669   :  { %v6125_v49 = vpop.eup %6124  ;;  %v3887_v57 = vmul.f32 %v6123_v29, %v3691_v31 }
0x266a   :  { %v3991_v27 = vmul.f32 %v6125_v49, %v3795_v24 }
0x26cc   :  { %v3890_v47 = vpop.permute.xlu0 %3889 }
0x26cd   :  { %v3994_v0 = vpop.permute.xlu1 %3993  ;;  %v3892_v56 = vmul.f32 %v6123_v29, %v3890_v47 }
0x26ce   :  { %v3996_v40 = vmul.f32 %v6125_v49, %v3994_v0 }
0x26cf   :  { %3894 = vrot.lane.b32.xlu0 %v3892_v56, %s6418_s0 }
0x26d0   :  { %3998 = vrot.lane.b32.xlu1 %v3996_v40, %s6418_s0 }
0x2741   :  { %v3895_v7 = vpop.permute.xlu0 %3894 }
0x2742   :  { %v3999_v53 = vpop.permute.xlu1 %3998  ;;  %v3897_v35 = vadd.f32 %v3895_v7, %v3887_v57 }
0x2743   :  { %v4001_v17 = vadd.f32 %v3999_v53, %v3991_v27 }
0x2744   :  { %6126 = vtanh.f32 %v3897_v35 }
0x2745   :  { %6128 = vtanh.f32 %v4001_v17 }
0x274e   :  { %v6127_v58 = vpop.eup %6126 }
0x274f   :  { %v6129_v10 = vpop.eup %6128  ;;  %3900 = vrot.lane.b32.xlu0 %v6127_v58, %s6409_s8 }
0x2750   :  { %4004 = vrot.lane.b32.xlu1 %v6129_v10, %s6409_s8 }
0x27c1   :  { %v3901_v3 = vpop.permute.xlu0 %3900 }
0x27c2   :  { %v4005_v61 = vpop.permute.xlu1 %4004  ;;  %v3903_v51 = vmul.f32 %v6123_v29, %v3901_v3 }
0x27c3   :  { %v7305_v1 = vmul.f32 %v6125_v49, %v4005_v61 }
0x27c4   :  { %3905 = vrot.lane.b32.xlu0 %v3903_v51, %s6418_s0 }
0x27c5   :  { %4115 = vrot.lane.b32.xlu1 %v7305_v1, %s6418_s0 }
0x2836   :  { %v7310_v2 = vpop.permute.xlu0 %3905 }
0x2837   :  { %v4116_v30 = vpop.permute.xlu1 %4115  ;;  %5522 = vmatmul.mubr.msk.f32.vlgmr.msra.gmra.mrb[48].mxu1 %vm856_vm4, %v7310_v2 }
0x2838   :  { %5533 = vmatmul.mubr.msk.f32.vlgmr.msra.gmra.mrb[56].mxu0 %vm856_vm4, %v4116_v30  ;;  %5831 = vmatpush3.bf16.msra.mxu1 %v7056_v52 }
0x2839   :  { %5837 = vmatpush3.bf16.msra.mxu0 %v7054_v63  ;;  %5832 = vmatprep.subr.bf16.mxu1 %v6415_v37 }
0x283a   :  { %5838 = vmatprep.subr.bf16.mxu0 %v6415_v37  ;;  %5554 = vmatprep.mubr.msk.f32.mxu0 %vm6416_vm3, %v6417_v23 }
0x283b   :  { %5543 = vmatprep.mubr.msk.f32.mxu1 %vm6416_vm3, %v6417_v23 }
0x283c   :  { %5834 = vmatpush3.bf16.msra.mxu1 %v7081_v62 }
0x283d   :  { %5840 = vmatpush3.bf16.msra.mxu0 %v7079_v48 }
0x290a   :  { %v4081_v4 = vpop.f32.mrb[48].mxu1 }
0x290b   :  { %v4085_v59 = vadd.f32 %v4081_v4, %v7153_v50  ;;  %v4185_v52 = vpop.f32.mrb[56].mxu0  ;;  %v5523_v5 = vpop.f32.mrb[49].mxu1 }
0x290c   :  { %v4189_v63 = vadd.f32 %v4185_v52, %v7131_v18  ;;  %v5534_v6 = vpop.f32.mrb[57].mxu0 }
0x290d   :  { %6130 = vtanh.f32 %v4085_v59  ;;  %v4760_v23 = vmul.f32 -1.442695, %v4085_v59 }
0x290e   :  { %6132 = vtanh.f32 %v4189_v63  ;;  %v4762_v62 = vmul.f32 -1.442695, %v4189_v63 }
0x290f   :  { %6134 = vpow2.f32 %v4760_v23  ;;  %v4435_v23 = vld [vmem:[%s7460_s15 + $0x10] sm:$0xff] }
0x2910   :  { %6136 = vpow2.f32 %v4762_v62 }
0x2917   :  { %v6131_v37 = vpop.eup %6130 }
0x2918   :  { %v6133_v8 = vpop.eup %6132  ;;  %4095 = vrot.lane.b32.xlu0 %v6131_v37, %s6409_s8  ;;  %v4433_v37 = vld [vmem:[%s7460_s15] sm:$0xff] }
0x2919   :  { %4199 = vrot.lane.b32.xlu1 %v6133_v8, %s6409_s8  ;;  %v6135_v48 = vpop.eup %6134  ;;  %v4434_v8 = vld [vmem:[%s7460_s15 + $0x8] sm:$0xff] }
0x291a   :  { %v6137_v44 = vpop.eup %6136  ;;  %v4089_v50 = vadd.f32 1.0, %v6135_v48  ;;  %v5841_v62 = vpack.c.bf16 %v4434_v8, %v4433_v37  ;;  %v4436_v48 = vld [vmem:[%s7460_s15 + $0x18] sm:$0xff] }
0x291b   :  { %v4193_v31 = vadd.f32 1.0, %v6137_v44  ;;  %v5845_v44 = vpack.c.bf16 %v4436_v48, %v4435_v23 }
0x291c   :  { %6138 = vrcp.f32 %v4089_v50  ;;  %5842 = vmatprep.subr.bf16.mxu1 %v5841_v62  ;;  %v4437_v50 = vld [vmem:[%s7460_s15 + $0x20] sm:$0xff] }
0x291d   :  { %6140 = vrcp.f32 %v4193_v31  ;;  %v4438_v31 = vld [vmem:[%s7460_s15 + $0x28] sm:$0xff] }
0x2926   :  { %v6139_v18 = vpop.eup %6138 }
0x2927   :  { %v6141_v54 = vpop.eup %6140  ;;  %v4093_v13 = vmul.f32 %v6139_v18, %v3897_v35 }
0x2928   :  { %v4197_v16 = vmul.f32 %v6141_v54, %v4001_v17 }
0x298a   :  { %v4096_v24 = vpop.permute.xlu0 %4095 }
0x298b   :  { %v4200_v45 = vpop.permute.xlu1 %4199  ;;  %v4098_v12 = vmul.f32 %v6139_v18, %v4096_v24 }
0x298c   :  { %v4202_v43 = vmul.f32 %v6141_v54, %v4200_v45 }
0x298d   :  { %4100 = vrot.lane.b32.xlu0 %v4098_v12, %s6418_s0 }
0x298e   :  { %4204 = vrot.lane.b32.xlu1 %v4202_v43, %s6418_s0 }
0x29ff   :  { %v4101_v11 = vpop.permute.xlu0 %4100 }
0x2a00   :  { %v4205_v19 = vpop.permute.xlu1 %4204  ;;  %v4103_v20 = vadd.f32 %v4101_v11, %v4093_v13 }
0x2a01   :  { %v4207_v55 = vadd.f32 %v4205_v19, %v4197_v16 }
0x2a02   :  { %6142 = vtanh.f32 %v4103_v20 }
0x2a03   :  { %6144 = vtanh.f32 %v4207_v55 }
0x2a0c   :  { %v6143_v25 = vpop.eup %6142 }
0x2a0d   :  { %v6145_v33 = vpop.eup %6144  ;;  %4106 = vrot.lane.b32.xlu0 %v6143_v25, %s6409_s8 }
0x2a0e   :  { %4210 = vrot.lane.b32.xlu1 %v6145_v33, %s6409_s8 }
0x2a7f   :  { %v4107_v32 = vpop.permute.xlu0 %4106 }
0x2a80   :  { %v4211_v28 = vpop.permute.xlu1 %4210  ;;  %v4109_v34 = vmul.f32 %v6139_v18, %v4107_v32  ;;  %v4439_v18 = vld [vmem:[%s7460_s15 + $0x30] sm:$0xff] }
0x2a81   :  { %v4213_v39 = vmul.f32 %v6141_v54, %v4211_v28 }
0x2a82   :  { %4111 = vrot.lane.b32.xlu0 %v4109_v34, %s6418_s0 }
0x2a83   :  { %4321 = vrot.lane.b32.xlu1 %v4213_v39, %s6418_s0 }
0x2af4   :  { %v7335_v26 = vpop.permute.xlu0 %4111 }
0x2af5   :  { %v4322_v42 = vpop.permute.xlu1 %4321  ;;  %5544 = vmatmul.mubr.msk.f32.vlgmr.msra.gmra.mrb[50].mxu1 %vm856_vm4, %v7335_v26 }
0x2af6   :  { %5555 = vmatmul.mubr.msk.f32.vlgmr.msra.gmra.mrb[58].mxu0 %vm856_vm4, %v4322_v42  ;;  %5844 = vmatpush3.bf16.msra.mxu1 %v5841_v62 }
0x2af7   :  { %5846 = vmatprep.subr.bf16.mxu1 %v5845_v44 }
0x2afa   :  { %5848 = vmatpush3.bf16.msra.mxu1 %v5845_v44 }
0x2bc8   :  { %v4287_v38 = vpop.f32.mrb[50].mxu1 }
0x2bc9   :  { %v4291_v46 = vadd.f32 %v4287_v38, %v7151_v41  ;;  %v4391_v29 = vpop.f32.mrb[58].mxu0  ;;  %v5545_v47 = vpop.f32.mrb[51].mxu1 }
0x2bca   :  { %v4395_v49 = vadd.f32 %v4391_v29, %v7133_v21  ;;  %v5556_v0 = vpop.f32.mrb[59].mxu0 }
0x2bcb   :  { %6146 = vtanh.f32 %v4291_v46  ;;  %v4764_v57 = vmul.f32 -1.442695, %v4291_v46 }
0x2bcc   :  { %6148 = vtanh.f32 %v4395_v49  ;;  %v4766_v27 = vmul.f32 -1.442695, %v4395_v49 }
0x2bcd   :  { %6150 = vpow2.f32 %v4764_v57 }
0x2bce   :  { %6152 = vpow2.f32 %v4766_v27 }
0x2bd5   :  { %v6147_v56 = vpop.eup %6146 }
0x2bd6   :  { %v6149_v40 = vpop.eup %6148  ;;  %4301 = vrot.lane.b32.xlu0 %v6147_v56, %s6409_s8 }
0x2bd7   :  { %4405 = vrot.lane.b32.xlu1 %v6149_v40, %s6409_s8  ;;  %v6151_v7 = vpop.eup %6150 }
0x2bd8   :  { %v6153_v53 = vpop.eup %6152  ;;  %v4295_v41 = vadd.f32 1.0, %v6151_v7 }
0x2bd9   :  { %v4399_v35 = vadd.f32 1.0, %v6153_v53 }
0x2bda   :  { %6154 = vrcp.f32 %v4295_v41 }
0x2bdb   :  { %6156 = vrcp.f32 %v4399_v35 }
0x2be4   :  { %v6155_v21 = vpop.eup %6154 }
0x2be5   :  { %v6157_v58 = vpop.eup %6156  ;;  %v4299_v51 = vmul.f32 %v6155_v21, %v4103_v20 }
0x2be6   :  { %v4403_v30 = vmul.f32 %v6157_v58, %v4207_v55 }
0x2c48   :  { %v4302_v17 = vpop.permute.xlu0 %4301 }
0x2c49   :  { %v4406_v10 = vpop.permute.xlu1 %4405  ;;  %v4304_v3 = vmul.f32 %v6155_v21, %v4302_v17 }
0x2c4a   :  { %v4408_v61 = vmul.f32 %v6157_v58, %v4406_v10 }
0x2c4b   :  { %4306 = vrot.lane.b32.xlu0 %v4304_v3, %s6418_s0 }
0x2c4c   :  { %4410 = vrot.lane.b32.xlu1 %v4408_v61, %s6418_s0 }
0x2cbd   :  { %v4307_v4 = vpop.permute.xlu0 %4306 }
0x2cbe   :  { %v4411_v59 = vpop.permute.xlu1 %4410  ;;  %v4309_v52 = vadd.f32 %v4307_v4, %v4299_v51 }
0x2cbf   :  { %v4413_v5 = vadd.f32 %v4411_v59, %v4403_v30 }
0x2cc0   :  { %6158 = vtanh.f32 %v4309_v52 }
0x2cc1   :  { %6160 = vtanh.f32 %v4413_v5 }
0x2cca   :  { %v6159_v63 = vpop.eup %6158 }
0x2ccb   :  { %v6161_v6 = vpop.eup %6160  ;;  %4312 = vrot.lane.b32.xlu0 %v6159_v63, %s6409_s8 }
0x2ccc   :  { %4416 = vrot.lane.b32.xlu1 %v6161_v6, %s6409_s8 }
0x2ccf   :  { %4215 = vrot.lane.b32.xlu0 %v4213_v39, %s6409_s8  ;;  %v4767_v39 = vld [vmem:[%s7461_s16] ss:$0 sm:$0xff] }
0x2cd3   :  { %3803 = vrot.lane.b32.xlu0 %v7275_v14, %s6409_s8  ;;  %v5849_v14 = vpack.c.bf16 %v4438_v31, %v4437_v50 }
0x2cd5   :  { %5850 = vmatprep.subr.bf16.mxu1 %v5849_v14 }
0x2cd6   :  { %5852 = vmatpush3.bf16.msra.mxu1 %v5849_v14 }
0x2cd7   :  { %3391 = vrot.lane.b32.xlu0 %v7219_v60, %s6409_s8  ;;  %v4440_v60 = vld [vmem:[%s7460_s15 + $0x38] sm:$0xff] }
0x2cdb   :  { %2979 = vrot.lane.b32.xlu0 %v7163_v22, %s6409_s8  ;;  %v5853_v22 = vpack.c.bf16 %v4440_v60, %v4439_v18 }
0x2cdd   :  { %5854 = vmatprep.subr.bf16.mxu1 %v5853_v22 }
0x2cde   :  { %5856 = vmatpush3.bf16.msra.mxu1 %v5853_v22 }
0x2d3d   :  { %v4313_v24 = vpop.permute.xlu0 %4312 }
0x2d3e   :  { %v4417_v54 = vpop.permute.xlu1 %4416  ;;  %v4315_v11 = vmul.f32 %v6155_v21, %v4313_v24 }
0x2d3f   :  { %v4419_v45 = vmul.f32 %v6157_v58, %v4417_v54 }
0x2d41   :  { %4421 = vrot.lane.b32.xlu1 %v4419_v45, %s6409_s8  ;;  %v4216_v12 = vpop.permute.xlu0 %4215 }
0x2d42   :  { %4218 = vst.msk [vmem:[#allocation2 + $0x8] sm:$0xff] %vm1059_vm5, %v4216_v12 }
0x2d45   :  { %4009 = vrot.lane.b32.xlu1 %v7305_v1, %s6409_s8  ;;  %v3804_v43 = vpop.permute.xlu0 %3803 }
0x2d46   :  { %3806 = vst.msk [vmem:[#allocation2 + $0x18] sm:$0xff] %vm1059_vm5, %v3804_v43 }
0x2d49   :  { %3597 = vrot.lane.b32.xlu1 %v7247_v36, %s6409_s8  ;;  %v3392_v13 = vpop.permute.xlu0 %3391 }
0x2d4a   :  { %3394 = vst.msk [vmem:[#allocation2 + $0x28] sm:$0xff] %vm1059_vm5, %v3392_v13 }
0x2d4b   :  { %3908 = vst.msk [vmem:[#allocation2 + $0x28] sm:$0xff] %vm856_vm4, %v7310_v2  ;;  %v4426_v2 = vld [vmem:[#allocation2 + $0x8] sm:$0xff] }
0x2d4d   :  { %3185 = vrot.lane.b32.xlu1 %v7191_v9, %s6409_s8  ;;  %v2980_v16 = vpop.permute.xlu0 %2979  ;;  %v4428_v25 = vld [vmem:[#allocation2 + $0x18] sm:$0xff] }
0x2d4e   :  { %2982 = vst.msk [vmem:[#allocation2 + $0x38] sm:$0xff] %vm1059_vm5, %v2980_v16 }
0x2d51   :  { %4317 = vrot.lane.b32.xlu1 %v4315_v11, %s6418_s0 }
0x2db3   :  { %v4422_v1 = vpop.permute.xlu1 %4421 }
0x2db4   :  { %4424 = vst.msk [vmem:[#allocation2] sm:$0xff] %vm1059_vm5, %v4422_v1 }
0x2db7   :  { %v4010_v19 = vpop.permute.xlu1 %4009 }
0x2db8   :  { %4012 = vst.msk [vmem:[#allocation2 + $0x10] sm:$0xff] %vm1059_vm5, %v4010_v19 }
0x2dbb   :  { %v3598_v36 = vpop.permute.xlu1 %3597  ;;  %v4425_v20 = vld [vmem:[#allocation2] sm:$0xff] }
0x2dbc   :  { %3600 = vst.msk [vmem:[#allocation2 + $0x20] sm:$0xff] %vm1059_vm5, %v3598_v36  ;;  %5573 = vmatprep.mubr.msk.f32.mxu1 %vm598_vm2, %v4425_v20 }
0x2dbd   :  { %3702 = vst.msk [vmem:[#allocation2 + $0x20] sm:$0xff] %vm856_vm4, %v7280_v15  ;;  %5574 = vmatmul.mubr.msk.f32.vlgmr.msra.gmra.mrb[52].mxu1 %vm598_vm2, %v4426_v2  ;;  %v4430_v15 = vld [vmem:[#allocation2 + $0x28] sm:$0xff] }
0x2dbf   :  { %v3186_v9 = vpop.permute.xlu1 %3185  ;;  %v4427_v55 = vld [vmem:[#allocation2 + $0x10] sm:$0xff] }
0x2dc0   :  { %3188 = vst.msk [vmem:[#allocation2 + $0x30] sm:$0xff] %vm1059_vm5, %v3186_v9  ;;  %5576 = vmatprep.mubr.msk.f32.mxu1 %vm598_vm2, %v4427_v55 }
0x2dc1   :  { %4114 = vst.msk [vmem:[#allocation2 + $0x30] sm:$0xff] %vm856_vm4, %v7335_v26  ;;  %5577 = vmatmul.mubr.msk.f32.gmra.mrb[54].mxu1 %vm598_vm2, %v4428_v25 }
0x2dc3   :  { %v4318_v33 = vpop.permute.xlu1 %4317 }
0x2dc4   :  { %4320 = vst.msk [vmem:[#allocation2 + $0x38] sm:$0xff] %vm856_vm4, %v4318_v33  ;;  %v4429_v32 = vld [vmem:[#allocation2 + $0x20] sm:$0xff] }
0x2dc5   :  { %5579 = vmatprep.mubr.msk.f32.mxu1 %vm598_vm2, %v4429_v32 }
0x2dc6   :  { %5580 = vmatmul.mubr.msk.f32.gmra.mrb[56].mxu1 %vm598_vm2, %v4430_v15 }
0x2dc8   :  { %v4431_v28 = vld [vmem:[#allocation2 + $0x30] sm:$0xff] }
0x2dc9   :  { %5582 = vmatprep.mubr.msk.f32.mxu1 %vm598_vm2, %v4431_v28 }
0x2dcb   :  { %v4432_v34 = vld [vmem:[#allocation2 + $0x38] sm:$0xff] }
0x2dcc   :  { %5583 = vmatmul.mubr.msk.f32.gmra.mrb[58].mxu1 %vm598_vm2, %v4432_v34 }
0x2e90   :  { %v5575_v26 = vpop.f32.mrb[52].mxu1 }
0x2e91   :  { %v4544_v42 = vadd.f32 %v5575_v26, %v4767_v39  ;;  %v4538_v38 = vpop.f32.mrb[53].mxu1 }
0x2e92   :  { %v4539_v46 = vadd.f32 %v4767_v39, %v4538_v38 }
0x2e93   :  { %v4777_v29 = vmul.f32 -1.442695, %v4544_v42 }
0x2e94   :  { %v4776_v47 = vmul.f32 -1.442695, %v4539_v46  ;;  %v5578_v49 = vpop.f32.mrb[54].mxu1 }
0x2e95   :  { %6162 = vpow2.f32 %v4777_v29  ;;  %v4554_v0 = vadd.f32 %v5578_v49, %v4767_v39  ;;  %v4548_v56 = vpop.f32.mrb[55].mxu1 }
0x2e96   :  { %6164 = vpow2.f32 %v4776_v47  ;;  %v4549_v40 = vadd.f32 %v4767_v39, %v4548_v56 }
0x2e97   :  { %v4779_v57 = vmul.f32 -1.442695, %v4554_v0 }
0x2e98   :  { %v4778_v27 = vmul.f32 -1.442695, %v4549_v40 }
0x2e99   :  { %6166 = vpow2.f32 %v4779_v57  ;;  %v5581_v7 = vpop.f32.mrb[56].mxu1 }
0x2e9a   :  { %6168 = vpow2.f32 %v4778_v27  ;;  %v4564_v53 = vadd.f32 %v5581_v7, %v4767_v39  ;;  %v4558_v41 = vpop.f32.mrb[57].mxu1 }
0x2e9b   :  { %v4559_v35 = vadd.f32 %v4767_v39, %v4558_v41 }
0x2e9c   :  { %v4781_v21 = vmul.f32 -1.442695, %v4564_v53 }
0x2e9d   :  { %v4780_v17 = vmul.f32 -1.442695, %v4559_v35 }
0x2e9e   :  { %6170 = vpow2.f32 %v4781_v21 }
0x2e9f   :  { %v6163_v58 = vpop.eup %6162  ;;  %6172 = vpow2.f32 %v4780_v17  ;;  %v5584_v10 = vpop.f32.mrb[58].mxu1 }
0x2ea0   :  { %v6165_v3 = vpop.eup %6164  ;;  %v4602_v61 = vadd.f32 1.0, %v6163_v58  ;;  %v4574_v51 = vadd.f32 %v5584_v10, %v4767_v39  ;;  %v4568_v30 = vpop.f32.mrb[59].mxu1 }
0x2ea1   :  { %v4601_v4 = vadd.f32 1.0, %v6165_v3  ;;  %v4569_v59 = vadd.f32 %v4767_v39, %v4568_v30 }
0x2ea2   :  { %6174 = vrcp.f32 %v4602_v61  ;;  %v4783_v52 = vmul.f32 -1.442695, %v4574_v51 }
0x2ea3   :  { %v6167_v5 = vpop.eup %6166  ;;  %6176 = vrcp.f32 %v4601_v4  ;;  %v4782_v63 = vmul.f32 -1.442695, %v4569_v59 }
0x2ea4   :  { %v6169_v6 = vpop.eup %6168  ;;  %v4604_v37 = vadd.f32 1.0, %v6167_v5  ;;  %6178 = vpow2.f32 %v4783_v52 }
0x2ea5   :  { %v4603_v8 = vadd.f32 1.0, %v6169_v6  ;;  %6180 = vpow2.f32 %v4782_v63 }
0x2ea6   :  { %6182 = vrcp.f32 %v4604_v37 }
0x2ea7   :  { %6184 = vrcp.f32 %v4603_v8 }
0x2ea8   :  { %v6171_v23 = vpop.eup %6170 }
0x2ea9   :  { %v6173_v62 = vpop.eup %6172  ;;  %v4606_v48 = vadd.f32 1.0, %v6171_v23 }
0x2eaa   :  { %v4605_v44 = vadd.f32 1.0, %v6173_v62 }
0x2eab   :  { %6186 = vrcp.f32 %v4606_v48 }
0x2eac   :  { %v6175_v50 = vpop.eup %6174  ;;  %6188 = vrcp.f32 %v4605_v44 }
0x2ead   :  { %v6177_v31 = vpop.eup %6176  ;;  %4627 = vst.msk [vmem:[%s7462_s17 + $0x8] sm:$0xff] %vm4625_vm6, %v6175_v50 }
0x2eae   :  { %v6179_v14 = vpop.eup %6178  ;;  %4626 = vst.msk [vmem:[%s7462_s17] sm:$0xff] %vm4625_vm6, %v6177_v31 }
0x2eaf   :  { %v6181_v18 = vpop.eup %6180  ;;  %v4608_v60 = vadd.f32 1.0, %v6179_v14 }
0x2eb0   :  { %v6183_v22 = vpop.eup %6182  ;;  %v4607_v24 = vadd.f32 1.0, %v6181_v18 }
0x2eb1   :  { %v6185_v54 = vpop.eup %6184  ;;  %4629 = vst.msk [vmem:[%s7462_s17 + $0x18] sm:$0xff] %vm4625_vm6, %v6183_v22  ;;  %6190 = vrcp.f32 %v4608_v60 }
0x2eb2   :  { %4628 = vst.msk [vmem:[%s7462_s17 + $0x10] sm:$0xff] %vm4625_vm6, %v6185_v54  ;;  %6192 = vrcp.f32 %v4607_v24 }
0x2eb5   :  { %v6187_v45 = vpop.eup %6186 }
0x2eb6   :  { %v6189_v12 = vpop.eup %6188  ;;  %4631 = vst.msk [vmem:[%s7462_s17 + $0x28] sm:$0xff] %vm4625_vm6, %v6187_v45 }
0x2eb7   :  { %4630 = vst.msk [vmem:[%s7462_s17 + $0x20] sm:$0xff] %vm4625_vm6, %v6189_v12 }
0x2ebb   :  { %v6191_v43 = vpop.eup %6190 }
0x2ebc   :  { %v6193_v13 = vpop.eup %6192  ;;  %4633 = vst.msk [vmem:[%s7462_s17 + $0x38] sm:$0xff] %vm4625_vm6, %v6191_v43 }
0x2ebd   :  { %4632 = vst.msk [vmem:[%s7462_s17 + $0x30] sm:$0xff] %vm4625_vm6, %v6193_v13 }
0x2ebe   :  { %4638 = vsyncpa [#allocation4], 1 }
0x2ebf   :  { %4639 = vsyncpa [#allocation6], 1 }
0x2ec0   :  { %4640 = vsyncpa [#allocation9], 1 }
0x2ec1   :  { %4641 = vsyncpa [#allocation12], 1 }
0x2ec2   :  { %4642 = vsyncpa [#allocation15], 1 }

</bundles_post_ra>
